<compile_context>
chip_gen: v7x
topology: tpu7x:2x2x1
jax: 0.10.0
libtpu: 0.0.40
codegen_flags: <defaults>
</compile_context>

<pallas_src>
import functools

import jax
import jax.numpy as jnp
import numpy as np
from jax.experimental import pallas as pl
from jax.experimental.pallas import tpu as pltpu


def _linear_att_kernel(ctx_ref, vol_ref,
                       wq_ref, bq_ref, wk_ref, bk_ref,
                       wv_ref, bv_ref, wo_ref, bo_ref,
                       mask_ref, gamma_ref,
                       out_ref,
                       kv_acc, ksum_acc,
                       *, eps, hdv, fuse_att, mxu_dtype):
    phase = pl.program_id(1)          # 0: accumulate KV / ksum, 1: emit outputs
    l_idx = pl.program_id(2)          # L-chunk index
    mdt = mxu_dtype

    bt, lc, d_model = ctx_ref.shape

    def feature_map(x):               # elu(x) + 1 == where(x > 0, x + 1, exp(x))
        return jnp.where(x > 0, x + 1.0, jnp.exp(x))

    @pl.when(jnp.logical_and(phase == 0, l_idx == 0))
    def _init():
        kv_acc[...] = jnp.zeros_like(kv_acc)
        ksum_acc[...] = jnp.zeros_like(ksum_acc)

    @pl.when(phase == 0)
    def _accumulate():
        ctx2 = ctx_ref[...].reshape(bt * lc, d_model)            # already mxu dtype
        vol2 = vol_ref[...].astype(mdt).reshape(bt * lc, d_model)
        k = jnp.dot(ctx2, wk_ref[...],
                    preferred_element_type=jnp.float32) + bk_ref[...]
        v = jnp.dot(vol2, wv_ref[...],
                    preferred_element_type=jnp.float32) + bv_ref[...]
        kf = feature_map(k).astype(mdt).reshape(bt, lc, -1)      # (Bt, Lc, HDk)
        vm = v.astype(mdt).reshape(bt, lc, -1)                   # (Bt, Lc, HDv)
        # All-heads KV: contract over the chunked sequence axis (f32 accumulation).
        kv_acc[...] += jnp.einsum('bld,blm->bdm', kf, vm,
                                  preferred_element_type=jnp.float32)
        # Per-feature K sum, accumulated directly in column (sublane) orientation so
        # phase 1 folds it into the Q@KV matmul without any transpose.
        ones = jnp.ones((bt, lc, 1), mdt)
        ksum_acc[...] += jnp.einsum('bld,blo->bdo', kf, ones,
                                    preferred_element_type=jnp.float32)

    @pl.when(phase == 1)
    def _emit():
        ctx2 = ctx_ref[...].reshape(bt * lc, d_model)
        q = jnp.dot(ctx2, wq_ref[...],
                    preferred_element_type=jnp.float32) + bq_ref[...]
        qf = feature_map(q).astype(mdt).reshape(bt, lc, -1)      # (Bt, Lc, HDk)

        mask = mask_ref[...]                                     # (HDk, HDv), {0,1}
        # NOTE: kv/zmask are cast to mxu_dtype for full-rate MXU; pass
        # mxu_dtype=jnp.float32 for very long sequences if the O(L) growth of KV
        # makes bf16 rounding a concern.
        kv_m = (kv_acc[...] * mask).astype(mdt)                  # block-diag per-head KV
        zmask = (ksum_acc[...] * mask).astype(mdt)               # ksum-scaled indicator

        if fuse_att:
            # Single fused MXU pass: Q @ [KV | ksum*mask], lane-aligned split.
            rhs = jnp.concatenate([kv_m, zmask], axis=-1)        # (Bt, HDk, 2*HDv)
            fused = jnp.einsum('bld,bdm->blm', qf, rhs,
                               preferred_element_type=jnp.float32)
            nv, denom = fused[..., :hdv], fused[..., hdv:]
        else:
            nv = jnp.einsum('bld,bdm->blm', qf, kv_m,
                            preferred_element_type=jnp.float32)
            denom = jnp.einsum('bld,bdm->blm', qf, zmask,
                               preferred_element_type=jnp.float32)

        z = pl.reciprocal(denom + eps, approx=True)              # EUP, ~free
        new_values = (nv * z).astype(mdt).reshape(bt * lc, hdv)  # (Bt*Lc, HDv)

        att = jnp.dot(new_values, wo_ref[...],
                      preferred_element_type=jnp.float32) + bo_ref[...]
        att = att.reshape(bt, lc, d_model)
        vol = vol_ref[...].astype(jnp.float32)
        out_ref[...] = (vol + gamma_ref[0] * att).astype(out_ref.dtype)


def _auto_l_chunk(L, widest_cols, row_align, budget_bytes=4 * 1024 * 1024):
    """Largest divisor of L (multiple of row_align, or L itself) whose per-chunk
    f32 activation working set (~8 live slabs of the widest activation) fits."""
    per_row = widest_cols * 4 * 8
    cands = [c for c in range(1, L + 1)
             if L % c == 0 and (c == L or c % row_align == 0)]
    fitting = [c for c in cands if c * per_row <= budget_bytes]
    return max(fitting) if fitting else min(cands)


def linear_att_layer(context, encoded_volume, params, *, n_heads, eps=1e-6,
                     mxu_dtype=jnp.bfloat16, l_chunk=None, batch_block=1):
    """Pallas implementation of LinearAttLayer.forward (see module docstring)."""
    N, L, d_model = context.shape
    wq, bq, wk, bk, wv, bv, wo, bo, gamma = params
    HDk, HDv = wq.shape[1], wv.shape[1]
    assert HDk % n_heads == 0 and HDv % n_heads == 0
    d_keys, d_values = HDk // n_heads, HDv // n_heads

    mdt = jnp.dtype(mxu_dtype)
    in_sub32 = (mdt.itemsize < 4
                or jnp.dtype(context.dtype).itemsize < 4
                or jnp.dtype(encoded_volume.dtype).itemsize < 4)
    row_align = 16 if in_sub32 else 8       # sublane packing for sub-32-bit blocks

    assert N % batch_block == 0, "batch_block must divide N"
    Bt = batch_block
    if l_chunk is None:
        l_chunk = _auto_l_chunk(L, max(d_model, HDk, 2 * HDv), row_align)
    Lc = l_chunk
    assert L % Lc == 0 and (Lc == L or Lc % row_align == 0)
    nL = L // Lc

    # Lane-aligned head width => fused Q @ [KV | ksum*mask] with a free split;
    # otherwise two matmuls (both still mxu_dtype) to avoid unaligned lane slices.
    fuse_att = (HDv % 128 == 0)

    # Host-side prep: MXU operands in mxu_dtype (bf16 by default: full MXU rate,
    # half the weight DMA/VMEM); biases stay f32 (added to f32 accumulators);
    # encoded_volume keeps its dtype so the residual add stays exact.
    ctx_in = context.astype(mdt)
    wq_m, wk_m, wv_m, wo_m = (w.astype(mdt) for w in (wq, wk, wv, wo))
    bq_f, bk_f, bv_f, bo_f = (b.astype(jnp.float32) for b in (bq, bk, bv, bo))
    gamma_f = gamma.astype(jnp.float32)
    mask_np = (np.arange(HDk)[:, None] // d_keys
               == np.arange(HDv)[None, :] // d_values)
    mask = jnp.asarray(mask_np, dtype=mdt)                       # (HDk, HDv), exact 0/1

    # TODO(synk): on v5e with d_keys >= 128, replace the dense block-diagonal mask
    # trick with a per-head loop/grid axis — the mask inflates MACs by n_heads and
    # v5e has ~5x less MXU headroom than v6e/v7x.
    # TODO(synk): pad d_model / HDv to multiples of 128 when the model config is not
    # lane-aligned, to get unmasked lane-dense output stores.

    kernel = functools.partial(_linear_att_kernel, eps=eps, hdv=HDv,
                               fuse_att=fuse_att, mxu_dtype=mdt)

    # Conservative VMEM budget (kept below v7x's 64 MiB physical VMEM).
    w_bytes = mdt.itemsize
    est = (Bt * Lc * d_model * (ctx_in.dtype.itemsize
                                + 2 * encoded_volume.dtype.itemsize) * 2
           + (d_model * (2 * HDk + HDv) + HDv * d_model + HDk * HDv) * w_bytes * 2
           + (2 * HDk + HDv + d_model) * 4 * 2
           + Bt * HDk * (HDv + 1) * 4
           + Bt * Lc * (HDk + 3 * HDv + d_model) * 4 * 3)
    vmem_limit = int(min(48 * 2**20, max(32 * 2**20, 2 * est)))

    act_shape = (Bt, Lc, d_model)
    act_map = lambda n, p, l: (n, l, 0)
    # Output block index stays frozen at (n, 0) during phase 0 (which never writes)
    # and tracks the L-chunk during phase 1, so every HBM writeback carries final data.
    out_map = lambda n, p, l: (n, l * p, 0)

    def build_and_run(single_buffer_weights):
        def resident(shape):
            if single_buffer_weights:
                return pl.BlockSpec(shape, lambda n, p, l: (0, 0),
                                    pipeline_mode=pl.Buffered(1))
            return pl.BlockSpec(shape, lambda n, p, l: (0, 0))

        in_specs = [
            pl.BlockSpec(act_shape, act_map),                    # context
            pl.BlockSpec(act_shape, act_map),                    # encoded_volume
            resident((d_model, HDk)),                            # wq
            resident((1, HDk)),                                  # bq
            resident((d_model, HDk)),                            # wk
            resident((1, HDk)),                                  # bk
            resident((d_model, HDv)),                            # wv
            resident((1, HDv)),                                  # bv
            resident((HDv, d_model)),                            # wo
            resident((1, d_model)),                              # bo
            resident((HDk, HDv)),                                # block-diag head mask
            pl.BlockSpec(memory_space=pltpu.MemorySpace.SMEM),   # gamma (scalar)
        ]
        return pl.pallas_call(
            kernel,
            out_shape=jax.ShapeDtypeStruct((N, L, d_model), encoded_volume.dtype),
            grid=(N // Bt, 2, nL),
            in_specs=in_specs,
            out_specs=pl.BlockSpec(act_shape, out_map),
            scratch_shapes=[pltpu.VMEM((Bt, HDk, HDv), jnp.float32),
                            pltpu.VMEM((Bt, HDk, 1), jnp.float32)],
            compiler_params=pltpu.CompilerParams(
                dimension_semantics=("parallel", "arbitrary", "arbitrary"),
                vmem_limit_bytes=vmem_limit),
        )(ctx_in, encoded_volume, wq_m, bq_f, wk_m, bk_f, wv_m, bv_f,
          wo_m, bo_f, mask, gamma_f)

    try:
        # Constant-index (resident) weight blocks only need a single VMEM buffer.
        return build_and_run(single_buffer_weights=True)
    except Exception:
        # pipeline_mode=pl.Buffered(1) rejected by this jax/Mosaic version:
        # fall back to default double buffering.
        return build_and_run(single_buffer_weights=False)


def linear_att_layer_ref(context, encoded_volume, params, *, n_heads, eps=1e-6):
    """Pure-JAX reference mirroring the PyTorch module."""
    wq, bq, wk, bk, wv, bv, wo, bo, gamma = params
    N, L, d_model = context.shape
    d_keys = wq.shape[1] // n_heads
    d_values = wv.shape[1] // n_heads

    q = (context @ wq + bq).reshape(N, L, n_heads, d_keys)
    k = (context @ wk + bk).reshape(N, L, n_heads, d_keys)
    v = (encoded_volume @ wv + bv).reshape(N, L, n_heads, d_values)

    feat = lambda x: jnp.where(x > 0, x, jnp.exp(x) - 1.0) + 1.0
    Q, K = feat(q), feat(k)

    KV = jnp.einsum('nshd,nshm->nhmd', K, v)
    Z = 1.0 / (jnp.einsum('nlhd,nhd->nlh', Q, K.sum(axis=1)) + eps)
    V = jnp.einsum('nlhd,nhmd,nlh->nlhm', Q, KV, Z)
    new_values = V.reshape(N, L, n_heads * d_values)
    att = new_values @ wo + bo
    return encoded_volume + gamma[0] * att


def make_params(key, d_model, n_heads):
    d_keys = d_model // n_heads
    d_values = d_model // n_heads
    HDk, HDv = n_heads * d_keys, n_heads * d_values
    ks = jax.random.split(key, 8)
    scale = 0.1
    wq = scale * jax.random.normal(ks[0], (d_model, HDk), jnp.float32)
    bq = scale * jax.random.normal(ks[1], (1, HDk), jnp.float32)
    wk = scale * jax.random.normal(ks[2], (d_model, HDk), jnp.float32)
    bk = scale * jax.random.normal(ks[3], (1, HDk), jnp.float32)
    wv = scale * jax.random.normal(ks[4], (d_model, HDv), jnp.float32)
    bv = scale * jax.random.normal(ks[5], (1, HDv), jnp.float32)
    wo = scale * jax.random.normal(ks[6], (HDv, d_model), jnp.float32)
    bo = scale * jax.random.normal(ks[7], (1, d_model), jnp.float32)
    # nn.Parameter(torch.zeros(1)) in the module; use nonzero here so the
    # attention path is actually exercised (deterministic in-script init).
    gamma = jnp.array([0.5], jnp.float32)
    return (wq, bq, wk, bk, wv, bv, wo, bo, gamma)


if __name__ == "__main__":
    key = jax.random.PRNGKey(0)
    N = 2
    configs = [
        # small, HDv=32 (unfused attention path); exercises batch blocking + L chunks
        dict(L=16, d_model=32, n_heads=4, f32_chunk=8, f32_bt=2, bf16_chunk=None),
        # lane-aligned heads (HDk=HDv=256): fused attention path, bf16 L-chunking
        dict(L=32, d_model=256, n_heads=2, f32_chunk=16, f32_bt=1, bf16_chunk=16),
    ]
    for cfg in configs:
        key, k_ctx, k_vol, k_par = jax.random.split(key, 4)
        L, d_model, n_heads = cfg["L"], cfg["d_model"], cfg["n_heads"]
        context = jax.random.normal(k_ctx, (N, L, d_model), jnp.float32)
        encoded_volume = jax.random.normal(k_vol, (N, L, d_model), jnp.float32)
        params = make_params(k_par, d_model, n_heads)
        ref = linear_att_layer_ref(context, encoded_volume, params, n_heads=n_heads)

        # f32 MXU path: tight numerical check (exercises chunked two-phase grid).
        out_f32 = linear_att_layer(context, encoded_volume, params, n_heads=n_heads,
                                   mxu_dtype=jnp.float32,
                                   l_chunk=cfg["f32_chunk"],
                                   batch_block=cfg["f32_bt"])
        out_f32 = jax.block_until_ready(out_f32)
        np.testing.assert_allclose(np.asarray(out_f32), np.asarray(ref),
                                   rtol=3e-3, atol=3e-3)

        # bf16 MXU path (default performance mode): looser check for bf16 rounding.
        out_bf16 = linear_att_layer(context, encoded_volume, params, n_heads=n_heads,
                                    l_chunk=cfg["bf16_chunk"])
        out_bf16 = jax.block_until_ready(out_bf16)
        np.testing.assert_allclose(np.asarray(out_bf16), np.asarray(ref),
                                   rtol=5e-2, atol=5e-2)

    print("KERNEL_OK")
</pallas_src>

<mosaic_0001>
module attributes {stable_mosaic.version = 11 : i64} {
  func.func @_linear_att_kernel(%arg0: i32, %arg1: i32, %arg2: i32, %arg3: memref<2x8x32xf32, #tpu.memory_space<vmem>>, %arg4: memref<2x8x32xf32, #tpu.memory_space<vmem>>, %arg5: memref<32x32xf32, #tpu.memory_space<vmem>>, %arg6: memref<1x32xf32, #tpu.memory_space<vmem>>, %arg7: memref<32x32xf32, #tpu.memory_space<vmem>>, %arg8: memref<1x32xf32, #tpu.memory_space<vmem>>, %arg9: memref<32x32xf32, #tpu.memory_space<vmem>>, %arg10: memref<1x32xf32, #tpu.memory_space<vmem>>, %arg11: memref<32x32xf32, #tpu.memory_space<vmem>>, %arg12: memref<1x32xf32, #tpu.memory_space<vmem>>, %arg13: memref<32x32xf32, #tpu.memory_space<vmem>>, %arg14: memref<1xf32, #tpu.memory_space<smem>>, %arg15: memref<2x8x32xf32, #tpu.memory_space<vmem>>, %arg16: memref<2x32x32xf32, #tpu.memory_space<vmem>>, %arg17: memref<2x32x1xf32, #tpu.memory_space<vmem>>) attributes {dimension_semantics = [#tpu.dimension_semantics<parallel>, #tpu.dimension_semantics<arbitrary>, #tpu.dimension_semantics<arbitrary>], iteration_bounds = array<i64: 1, 2, 2>, scalar_prefetch = 0 : i64, scratch_operands = 2 : i64, tpu.core_type = #tpu.core_type<tc>, window_params = [{transform_indices = @transform_0, window_bounds = array<i64: 2, 8, 32>}, {transform_indices = @transform_1, window_bounds = array<i64: 2, 8, 32>}, {pipeline_mode = #tpu.pipeline_mode<synchronous>, transform_indices = @transform_2, window_bounds = array<i64: 32, 32>}, {pipeline_mode = #tpu.pipeline_mode<synchronous>, transform_indices = @transform_3, window_bounds = array<i64: 1, 32>}, {pipeline_mode = #tpu.pipeline_mode<synchronous>, transform_indices = @transform_4, window_bounds = array<i64: 32, 32>}, {pipeline_mode = #tpu.pipeline_mode<synchronous>, transform_indices = @transform_5, window_bounds = array<i64: 1, 32>}, {pipeline_mode = #tpu.pipeline_mode<synchronous>, transform_indices = @transform_6, window_bounds = array<i64: 32, 32>}, {pipeline_mode = #tpu.pipeline_mode<synchronous>, transform_indices = @transform_7, window_bounds = array<i64: 1, 32>}, {pipeline_mode = #tpu.pipeline_mode<synchronous>, transform_indices = @transform_8, window_bounds = array<i64: 32, 32>}, {pipeline_mode = #tpu.pipeline_mode<synchronous>, transform_indices = @transform_9, window_bounds = array<i64: 1, 32>}, {pipeline_mode = #tpu.pipeline_mode<synchronous>, transform_indices = @transform_10, window_bounds = array<i64: 32, 32>}, {transform_indices = @transform_11, window_bounds = array<i64: 1>}, {transform_indices = @transform_12, window_bounds = array<i64: 2, 8, 32>}]} {
    %c0_i32 = arith.constant 0 : i32
    %0 = arith.cmpi eq, %arg1, %c0_i32 : i32
    %c0_i32_0 = arith.constant 0 : i32
    %1 = arith.cmpi eq, %arg2, %c0_i32_0 : i32
    %2 = arith.andi %0, %1 : i1
    %3 = arith.extui %2 : i1 to i32
    %c0_i32_1 = arith.constant 0 : i32
    %4 = arith.cmpi ne, %3, %c0_i32_1 : i32
    scf.if %4 {
      %cst = arith.constant 0.000000e+00 : f32
      %11 = vector.broadcast %cst : f32 to vector<2x32x32xf32>
      %c0 = arith.constant 0 : index
      %c0_5 = arith.constant 0 : index
      %c0_6 = arith.constant 0 : index
      %12 = vector.load %arg16[%c0, %c0_5, %c0_6] : memref<2x32x32xf32, #tpu.memory_space<vmem>>, vector<2x32x32xf32>
      tpu.vector_store %arg16[%c0, %c0_5, %c0_6], %11 {strides = array<i32>} : memref<2x32x32xf32, #tpu.memory_space<vmem>>, vector<2x32x32xf32>,
      %cst_7 = arith.constant 0.000000e+00 : f32
      %13 = vector.broadcast %cst_7 : f32 to vector<2x32x1xf32>
      %c0_8 = arith.constant 0 : index
      %c0_9 = arith.constant 0 : index
      %c0_10 = arith.constant 0 : index
      %14 = vector.load %arg17[%c0_8, %c0_9, %c0_10] : memref<2x32x1xf32, #tpu.memory_space<vmem>>, vector<2x32x1xf32>
      tpu.vector_store %arg17[%c0_8, %c0_9, %c0_10], %13 {strides = array<i32>} : memref<2x32x1xf32, #tpu.memory_space<vmem>>, vector<2x32x1xf32>,
    } else {
    }
    %c0_i32_2 = arith.constant 0 : i32
    %5 = arith.cmpi eq, %arg1, %c0_i32_2 : i32
    %6 = arith.extui %5 : i1 to i32
    %c0_i32_3 = arith.constant 0 : i32
    %7 = arith.cmpi ne, %6, %c0_i32_3 : i32
    scf.if %7 {
      %c0 = arith.constant 0 : index
      %c0_5 = arith.constant 0 : index
      %c0_6 = arith.constant 0 : index
      %11 = vector.load %arg3[%c0, %c0_5, %c0_6] : memref<2x8x32xf32, #tpu.memory_space<vmem>>, vector<2x8x32xf32>
      %12 = vector.shape_cast %11 : vector<2x8x32xf32> to vector<16x32xf32>
      %c0_7 = arith.constant 0 : index
      %c0_8 = arith.constant 0 : index
      %c0_9 = arith.constant 0 : index
      %13 = vector.load %arg4[%c0_7, %c0_8, %c0_9] : memref<2x8x32xf32, #tpu.memory_space<vmem>>, vector<2x8x32xf32>
      %14 = vector.shape_cast %13 : vector<2x8x32xf32> to vector<16x32xf32>
      %c0_10 = arith.constant 0 : index
      %c0_11 = arith.constant 0 : index
      %15 = vector.load %arg7[%c0_10, %c0_11] : memref<32x32xf32, #tpu.memory_space<vmem>>, vector<32x32xf32>
      %cst = arith.constant dense<0.000000e+00> : vector<16x32xf32>
      %16 = tpu.matmul %12, %15, %cst {dimension_numbers = #tpu.dot_dimension_numbers<[1], [0], [0], [1], [0, 0, 1, 1], [], []>} : vector<16x32xf32>, vector<32x32xf32>, vector<16x32xf32> -> vector<16x32xf32>
      %c0_12 = arith.constant 0 : index
      %c0_13 = arith.constant 0 : index
      %17 = vector.load %arg8[%c0_12, %c0_13] : memref<1x32xf32, #tpu.memory_space<vmem>>, vector<1x32xf32>
      %18 = vector.broadcast %17 : vector<1x32xf32> to vector<16x32xf32>
      %19 = arith.addf %16, %18 : vector<16x32xf32>
      %c0_14 = arith.constant 0 : index
      %c0_15 = arith.constant 0 : index
      %20 = vector.load %arg9[%c0_14, %c0_15] : memref<32x32xf32, #tpu.memory_space<vmem>>, vector<32x32xf32>
      %cst_16 = arith.constant dense<0.000000e+00> : vector<16x32xf32>
      %21 = tpu.matmul %14, %20, %cst_16 {dimension_numbers = #tpu.dot_dimension_numbers<[1], [0], [0], [1], [0, 0, 1, 1], [], []>} : vector<16x32xf32>, vector<32x32xf32>, vector<16x32xf32> -> vector<16x32xf32>
      %c0_17 = arith.constant 0 : index
      %c0_18 = arith.constant 0 : index
      %22 = vector.load %arg10[%c0_17, %c0_18] : memref<1x32xf32, #tpu.memory_space<vmem>>, vector<1x32xf32>
      %23 = vector.broadcast %22 : vector<1x32xf32> to vector<16x32xf32>
      %24 = arith.addf %21, %23 : vector<16x32xf32>
      %cst_19 = arith.constant 0.000000e+00 : f32
      %25 = vector.broadcast %cst_19 : f32 to vector<16x32xf32>
      %26 = arith.cmpf ogt, %19, %25 : vector<16x32xf32>
      %cst_20 = arith.constant 1.000000e+00 : f32
      %27 = vector.broadcast %cst_20 : f32 to vector<16x32xf32>
      %28 = arith.addf %19, %27 : vector<16x32xf32>
      %29 = math.exp %19 : vector<16x32xf32>
      %30 = arith.select %26, %28, %29 : vector<16x32xi1>, vector<16x32xf32>
      %31 = vector.shape_cast %30 : vector<16x32xf32> to vector<2x8x32xf32>
      %32 = vector.shape_cast %24 : vector<16x32xf32> to vector<2x8x32xf32>
      %c0_21 = arith.constant 0 : index
      %c0_22 = arith.constant 0 : index
      %c0_23 = arith.constant 0 : index
      %33 = vector.load %arg16[%c0_21, %c0_22, %c0_23] : memref<2x32x32xf32, #tpu.memory_space<vmem>>, vector<2x32x32xf32>
      "tpu.trace_start"() <{level = 10 : i32, message = "bld,blm->bdm"}> : () -> ()
      %cst_24 = arith.constant dense<0.000000e+00> : vector<2x32x32xf32>
      %34 = tpu.matmul %31, %32, %cst_24 {dimension_numbers = #tpu.dot_dimension_numbers<[1], [1], [2], [2], [0, 0, 0, 2, 1, 2], [0], [0]>} : vector<2x8x32xf32>, vector<2x8x32xf32>, vector<2x32x32xf32> -> vector<2x32x32xf32>
      "tpu.trace_stop"() : () -> ()
      %35 = arith.addf %33, %34 : vector<2x32x32xf32>
      %c0_25 = arith.constant 0 : index
      %c0_26 = arith.constant 0 : index
      %c0_27 = arith.constant 0 : index
      %36 = vector.load %arg16[%c0_25, %c0_26, %c0_27] : memref<2x32x32xf32, #tpu.memory_space<vmem>>, vector<2x32x32xf32>
      tpu.vector_store %arg16[%c0_25, %c0_26, %c0_27], %35 {strides = array<i32>} : memref<2x32x32xf32, #tpu.memory_space<vmem>>, vector<2x32x32xf32>,
      %cst_28 = arith.constant 1.000000e+00 : f32
      %37 = vector.broadcast %cst_28 : f32 to vector<2x8x1xf32>
      %c0_29 = arith.constant 0 : index
      %c0_30 = arith.constant 0 : index
      %c0_31 = arith.constant 0 : index
      %38 = vector.load %arg17[%c0_29, %c0_30, %c0_31] : memref<2x32x1xf32, #tpu.memory_space<vmem>>, vector<2x32x1xf32>
      "tpu.trace_start"() <{level = 10 : i32, message = "bld,blo->bdo"}> : () -> ()
      %cst_32 = arith.constant dense<0.000000e+00> : vector<2x32x1xf32>
      %39 = tpu.matmul %31, %37, %cst_32 {dimension_numbers = #tpu.dot_dimension_numbers<[1], [1], [2], [2], [0, 0, 0, 2, 1, 2], [0], [0]>} : vector<2x8x32xf32>, vector<2x8x1xf32>, vector<2x32x1xf32> -> vector<2x32x1xf32>
      "tpu.trace_stop"() : () -> ()
      %40 = arith.addf %38, %39 : vector<2x32x1xf32>
      %c0_33 = arith.constant 0 : index
      %c0_34 = arith.constant 0 : index
      %c0_35 = arith.constant 0 : index
      %41 = vector.load %arg17[%c0_33, %c0_34, %c0_35] : memref<2x32x1xf32, #tpu.memory_space<vmem>>, vector<2x32x1xf32>
      tpu.vector_store %arg17[%c0_33, %c0_34, %c0_35], %40 {strides = array<i32>} : memref<2x32x1xf32, #tpu.memory_space<vmem>>, vector<2x32x1xf32>,
    } else {
    }
    %c1_i32 = arith.constant 1 : i32
    %8 = arith.cmpi eq, %arg1, %c1_i32 : i32
    %9 = arith.extui %8 : i1 to i32
    %c0_i32_4 = arith.constant 0 : i32
    %10 = arith.cmpi ne, %9, %c0_i32_4 : i32
    scf.if %10 {
      %c0 = arith.constant 0 : index
      %c0_5 = arith.constant 0 : index
      %c0_6 = arith.constant 0 : index
      %11 = vector.load %arg3[%c0, %c0_5, %c0_6] : memref<2x8x32xf32, #tpu.memory_space<vmem>>, vector<2x8x32xf32>
      %12 = vector.shape_cast %11 : vector<2x8x32xf32> to vector<16x32xf32>
      %c0_7 = arith.constant 0 : index
      %c0_8 = arith.constant 0 : index
      %13 = vector.load %arg5[%c0_7, %c0_8] : memref<32x32xf32, #tpu.memory_space<vmem>>, vector<32x32xf32>
      %cst = arith.constant dense<0.000000e+00> : vector<16x32xf32>
      %14 = tpu.matmul %12, %13, %cst {dimension_numbers = #tpu.dot_dimension_numbers<[1], [0], [0], [1], [0, 0, 1, 1], [], []>} : vector<16x32xf32>, vector<32x32xf32>, vector<16x32xf32> -> vector<16x32xf32>
      %c0_9 = arith.constant 0 : index
      %c0_10 = arith.constant 0 : index
      %15 = vector.load %arg6[%c0_9, %c0_10] : memref<1x32xf32, #tpu.memory_space<vmem>>, vector<1x32xf32>
      %16 = vector.broadcast %15 : vector<1x32xf32> to vector<16x32xf32>
      %17 = arith.addf %14, %16 : vector<16x32xf32>
      %cst_11 = arith.constant 0.000000e+00 : f32
      %18 = vector.broadcast %cst_11 : f32 to vector<16x32xf32>
      %19 = arith.cmpf ogt, %17, %18 : vector<16x32xf32>
      %cst_12 = arith.constant 1.000000e+00 : f32
      %20 = vector.broadcast %cst_12 : f32 to vector<16x32xf32>
      %21 = arith.addf %17, %20 : vector<16x32xf32>
      %22 = math.exp %17 : vector<16x32xf32>
      %23 = arith.select %19, %21, %22 : vector<16x32xi1>, vector<16x32xf32>
      %24 = vector.shape_cast %23 : vector<16x32xf32> to vector<2x8x32xf32>
      %c0_13 = arith.constant 0 : index
      %c0_14 = arith.constant 0 : index
      %25 = vector.load %arg13[%c0_13, %c0_14] : memref<32x32xf32, #tpu.memory_space<vmem>>, vector<32x32xf32>
      %c0_15 = arith.constant 0 : index
      %c0_16 = arith.constant 0 : index
      %c0_17 = arith.constant 0 : index
      %26 = vector.load %arg16[%c0_15, %c0_16, %c0_17] : memref<2x32x32xf32, #tpu.memory_space<vmem>>, vector<2x32x32xf32>
      %27 = vector.shape_cast %25 : vector<32x32xf32> to vector<1x32x32xf32>
      %28 = vector.broadcast %27 : vector<1x32x32xf32> to vector<2x32x32xf32>
      %29 = arith.mulf %26, %28 : vector<2x32x32xf32>
      %c0_18 = arith.constant 0 : index
      %c0_19 = arith.constant 0 : index
      %c0_20 = arith.constant 0 : index
      %30 = vector.load %arg17[%c0_18, %c0_19, %c0_20] : memref<2x32x1xf32, #tpu.memory_space<vmem>>, vector<2x32x1xf32>
      %31 = vector.shape_cast %25 : vector<32x32xf32> to vector<1x32x32xf32>
      %32 = vector.broadcast %30 : vector<2x32x1xf32> to vector<2x32x32xf32>
      %33 = vector.broadcast %31 : vector<1x32x32xf32> to vector<2x32x32xf32>
      %34 = arith.mulf %32, %33 : vector<2x32x32xf32>
      "tpu.trace_start"() <{level = 10 : i32, message = "bld,bdm->blm"}> : () -> ()
      %cst_21 = arith.constant dense<0.000000e+00> : vector<2x8x32xf32>
      %35 = tpu.matmul %24, %29, %cst_21 {dimension_numbers = #tpu.dot_dimension_numbers<[2], [1], [1], [2], [0, 0, 0, 1, 1, 2], [0], [0]>} : vector<2x8x32xf32>, vector<2x32x32xf32>, vector<2x8x32xf32> -> vector<2x8x32xf32>
      %cst_22 = arith.constant dense<0.000000e+00> : vector<2x8x32xf32>
      %36 = tpu.matmul %24, %34, %cst_22 {dimension_numbers = #tpu.dot_dimension_numbers<[2], [1], [1], [2], [0, 0, 0, 1, 1, 2], [0], [0]>} : vector<2x8x32xf32>, vector<2x32x32xf32>, vector<2x8x32xf32> -> vector<2x8x32xf32>
      "tpu.trace_stop"() : () -> ()
      %cst_23 = arith.constant 9.99999997E-7 : f32
      %37 = vector.broadcast %cst_23 : f32 to vector<2x8x32xf32>
      %38 = arith.addf %36, %37 : vector<2x8x32xf32>
      %39 = tpu.reciprocal %38 {approx = true} : vector<2x8x32xf32> -> vector<2x8x32xf32>
      %40 = arith.mulf %35, %39 : vector<2x8x32xf32>
      %41 = vector.shape_cast %40 : vector<2x8x32xf32> to vector<16x32xf32>
      %c0_24 = arith.constant 0 : index
      %c0_25 = arith.constant 0 : index
      %42 = vector.load %arg11[%c0_24, %c0_25] : memref<32x32xf32, #tpu.memory_space<vmem>>, vector<32x32xf32>
      %cst_26 = arith.constant dense<0.000000e+00> : vector<16x32xf32>
      %43 = tpu.matmul %41, %42, %cst_26 {dimension_numbers = #tpu.dot_dimension_numbers<[1], [0], [0], [1], [0, 0, 1, 1], [], []>} : vector<16x32xf32>, vector<32x32xf32>, vector<16x32xf32> -> vector<16x32xf32>
      %c0_27 = arith.constant 0 : index
      %c0_28 = arith.constant 0 : index
      %44 = vector.load %arg12[%c0_27, %c0_28] : memref<1x32xf32, #tpu.memory_space<vmem>>, vector<1x32xf32>
      %45 = vector.broadcast %44 : vector<1x32xf32> to vector<16x32xf32>
      %46 = arith.addf %43, %45 : vector<16x32xf32>
      %47 = vector.shape_cast %46 : vector<16x32xf32> to vector<2x8x32xf32>
      %c0_29 = arith.constant 0 : index
      %c0_30 = arith.constant 0 : index
      %c0_31 = arith.constant 0 : index
      %48 = vector.load %arg4[%c0_29, %c0_30, %c0_31] : memref<2x8x32xf32, #tpu.memory_space<vmem>>, vector<2x8x32xf32>
      %c0_32 = arith.constant 0 : index
      %49 = memref.load %arg14[%c0_32] : memref<1xf32, #tpu.memory_space<smem>>
      %50 = vector.broadcast %49 : f32 to vector<2x8x32xf32>
      %51 = arith.mulf %50, %47 : vector<2x8x32xf32>
      %52 = arith.addf %48, %51 : vector<2x8x32xf32>
      %c0_33 = arith.constant 0 : index
      %c0_34 = arith.constant 0 : index
      %c0_35 = arith.constant 0 : index
      %53 = vector.load %arg15[%c0_33, %c0_34, %c0_35] : memref<2x8x32xf32, #tpu.memory_space<vmem>>, vector<2x8x32xf32>
      tpu.vector_store %arg15[%c0_33, %c0_34, %c0_35], %52 {strides = array<i32>} : memref<2x8x32xf32, #tpu.memory_space<vmem>>, vector<2x8x32xf32>,
    } else {
    }
    return
  }
  func.func @transform_0(%arg0: i32, %arg1: i32, %arg2: i32) -> (i32, i32, i32) {
    %c0_i32 = arith.constant 0 : i32
    %c0_i32_0 = arith.constant 0 : i32
    return %arg0, %arg2, %c0_i32 : i32, i32, i32
  }
  func.func @transform_1(%arg0: i32, %arg1: i32, %arg2: i32) -> (i32, i32, i32) {
    %c0_i32 = arith.constant 0 : i32
    %c0_i32_0 = arith.constant 0 : i32
    return %arg0, %arg2, %c0_i32 : i32, i32, i32
  }
  func.func @transform_2(%arg0: i32, %arg1: i32, %arg2: i32) -> (i32, i32) {
    %c0_i32 = arith.constant 0 : i32
    %c0_i32_0 = arith.constant 0 : i32
    %c0_i32_1 = arith.constant 0 : i32
    return %c0_i32, %c0_i32_0 : i32, i32
  }
  func.func @transform_3(%arg0: i32, %arg1: i32, %arg2: i32) -> (i32, i32) {
    %c0_i32 = arith.constant 0 : i32
    %c0_i32_0 = arith.constant 0 : i32
    %c0_i32_1 = arith.constant 0 : i32
    return %c0_i32, %c0_i32_0 : i32, i32
  }
  func.func @transform_4(%arg0: i32, %arg1: i32, %arg2: i32) -> (i32, i32) {
    %c0_i32 = arith.constant 0 : i32
    %c0_i32_0 = arith.constant 0 : i32
    %c0_i32_1 = arith.constant 0 : i32
    return %c0_i32, %c0_i32_0 : i32, i32
  }
  func.func @transform_5(%arg0: i32, %arg1: i32, %arg2: i32) -> (i32, i32) {
    %c0_i32 = arith.constant 0 : i32
    %c0_i32_0 = arith.constant 0 : i32
    %c0_i32_1 = arith.constant 0 : i32
    return %c0_i32, %c0_i32_0 : i32, i32
  }
  func.func @transform_6(%arg0: i32, %arg1: i32, %arg2: i32) -> (i32, i32) {
    %c0_i32 = arith.constant 0 : i32
    %c0_i32_0 = arith.constant 0 : i32
    %c0_i32_1 = arith.constant 0 : i32
    return %c0_i32, %c0_i32_0 : i32, i32
  }
  func.func @transform_7(%arg0: i32, %arg1: i32, %arg2: i32) -> (i32, i32) {
    %c0_i32 = arith.constant 0 : i32
    %c0_i32_0 = arith.constant 0 : i32
    %c0_i32_1 = arith.constant 0 : i32
    return %c0_i32, %c0_i32_0 : i32, i32
  }
  func.func @transform_8(%arg0: i32, %arg1: i32, %arg2: i32) -> (i32, i32) {
    %c0_i32 = arith.constant 0 : i32
    %c0_i32_0 = arith.constant 0 : i32
    %c0_i32_1 = arith.constant 0 : i32
    return %c0_i32, %c0_i32_0 : i32, i32
  }
  func.func @transform_9(%arg0: i32, %arg1: i32, %arg2: i32) -> (i32, i32) {
    %c0_i32 = arith.constant 0 : i32
    %c0_i32_0 = arith.constant 0 : i32
    %c0_i32_1 = arith.constant 0 : i32
    return %c0_i32, %c0_i32_0 : i32, i32
  }
  func.func @transform_10(%arg0: i32, %arg1: i32, %arg2: i32) -> (i32, i32) {
    %c0_i32 = arith.constant 0 : i32
    %c0_i32_0 = arith.constant 0 : i32
    %c0_i32_1 = arith.constant 0 : i32
    return %c0_i32, %c0_i32_0 : i32, i32
  }
  func.func @transform_11(%arg0: i32, %arg1: i32, %arg2: i32) -> i32 {
    %c0_i32 = arith.constant 0 : i32
    %c0_i32_0 = arith.constant 0 : i32
    return %c0_i32 : i32
  }
  func.func @transform_12(%arg0: i32, %arg1: i32, %arg2: i32) -> (i32, i32, i32) {
    %0 = arith.muli %arg2, %arg1 : i32
    %c0_i32 = arith.constant 0 : i32
    %c0_i32_0 = arith.constant 0 : i32
    return %arg0, %0, %c0_i32 : i32, i32, i32
  }
}

module attributes {stable_mosaic.version = 11 : i64} {
  func.func @_linear_att_kernel(%arg0: i32, %arg1: i32, %arg2: i32, %arg3: memref<2x8x32xf32, #tpu.memory_space<vmem>>, %arg4: memref<2x8x32xf32, #tpu.memory_space<vmem>>, %arg5: memref<32x32xf32, #tpu.memory_space<vmem>>, %arg6: memref<1x32xf32, #tpu.memory_space<vmem>>, %arg7: memref<32x32xf32, #tpu.memory_space<vmem>>, %arg8: memref<1x32xf32, #tpu.memory_space<vmem>>, %arg9: memref<32x32xf32, #tpu.memory_space<vmem>>, %arg10: memref<1x32xf32, #tpu.memory_space<vmem>>, %arg11: memref<32x32xf32, #tpu.memory_space<vmem>>, %arg12: memref<1x32xf32, #tpu.memory_space<vmem>>, %arg13: memref<32x32xf32, #tpu.memory_space<vmem>>, %arg14: memref<1xf32, #tpu.memory_space<smem>>, %arg15: memref<2x8x32xf32, #tpu.memory_space<vmem>>, %arg16: memref<2x32x32xf32, #tpu.memory_space<vmem>>, %arg17: memref<2x32x1xf32, #tpu.memory_space<vmem>>) attributes {dimension_semantics = [#tpu.dimension_semantics<parallel>, #tpu.dimension_semantics<arbitrary>, #tpu.dimension_semantics<arbitrary>], iteration_bounds = array<i64: 1, 2, 2>, scalar_prefetch = 0 : i64, scratch_operands = 2 : i64, tpu.core_type = #tpu.core_type<tc>, window_params = [{transform_indices = @transform_0, window_bounds = array<i64: 2, 8, 32>}, {transform_indices = @transform_1, window_bounds = array<i64: 2, 8, 32>}, {pipeline_mode = #tpu.pipeline_mode<synchronous>, transform_indices = @transform_2, window_bounds = array<i64: 32, 32>}, {pipeline_mode = #tpu.pipeline_mode<synchronous>, transform_indices = @transform_3, window_bounds = array<i64: 1, 32>}, {pipeline_mode = #tpu.pipeline_mode<synchronous>, transform_indices = @transform_4, window_bounds = array<i64: 32, 32>}, {pipeline_mode = #tpu.pipeline_mode<synchronous>, transform_indices = @transform_5, window_bounds = array<i64: 1, 32>}, {pipeline_mode = #tpu.pipeline_mode<synchronous>, transform_indices = @transform_6, window_bounds = array<i64: 32, 32>}, {pipeline_mode = #tpu.pipeline_mode<synchronous>, transform_indices = @transform_7, window_bounds = array<i64: 1, 32>}, {pipeline_mode = #tpu.pipeline_mode<synchronous>, transform_indices = @transform_8, window_bounds = array<i64: 32, 32>}, {pipeline_mode = #tpu.pipeline_mode<synchronous>, transform_indices = @transform_9, window_bounds = array<i64: 1, 32>}, {pipeline_mode = #tpu.pipeline_mode<synchronous>, transform_indices = @transform_10, window_bounds = array<i64: 32, 32>}, {transform_indices = @transform_11, window_bounds = array<i64: 1>}, {transform_indices = @transform_12, window_bounds = array<i64: 2, 8, 32>}]} {
    %c0_i32 = arith.constant 0 : i32
    %0 = arith.cmpi eq, %arg1, %c0_i32 : i32
    %c0_i32_0 = arith.constant 0 : i32
    %1 = arith.cmpi eq, %arg2, %c0_i32_0 : i32
    %2 = arith.andi %0, %1 : i1
    %3 = arith.extui %2 : i1 to i32
    %c0_i32_1 = arith.constant 0 : i32
    %4 = arith.cmpi ne, %3, %c0_i32_1 : i32
    scf.if %4 {
      %cst = arith.constant 0.000000e+00 : f32
      %11 = vector.broadcast %cst : f32 to vector<2x32x32xf32>
      %c0 = arith.constant 0 : index
      %c0_5 = arith.constant 0 : index
      %c0_6 = arith.constant 0 : index
      %12 = vector.load %arg16[%c0, %c0_5, %c0_6] : memref<2x32x32xf32, #tpu.memory_space<vmem>>, vector<2x32x32xf32>
      tpu.vector_store %arg16[%c0, %c0_5, %c0_6], %11 {strides = array<i32>} : memref<2x32x32xf32, #tpu.memory_space<vmem>>, vector<2x32x32xf32>,
      %cst_7 = arith.constant 0.000000e+00 : f32
      %13 = vector.broadcast %cst_7 : f32 to vector<2x32x1xf32>
      %c0_8 = arith.constant 0 : index
      %c0_9 = arith.constant 0 : index
      %c0_10 = arith.constant 0 : index
      %14 = vector.load %arg17[%c0_8, %c0_9, %c0_10] : memref<2x32x1xf32, #tpu.memory_space<vmem>>, vector<2x32x1xf32>
      tpu.vector_store %arg17[%c0_8, %c0_9, %c0_10], %13 {strides = array<i32>} : memref<2x32x1xf32, #tpu.memory_space<vmem>>, vector<2x32x1xf32>,
    } else {
    }
    %c0_i32_2 = arith.constant 0 : i32
    %5 = arith.cmpi eq, %arg1, %c0_i32_2 : i32
    %6 = arith.extui %5 : i1 to i32
    %c0_i32_3 = arith.constant 0 : i32
    %7 = arith.cmpi ne, %6, %c0_i32_3 : i32
    scf.if %7 {
      %c0 = arith.constant 0 : index
      %c0_5 = arith.constant 0 : index
      %c0_6 = arith.constant 0 : index
      %11 = vector.load %arg3[%c0, %c0_5, %c0_6] : memref<2x8x32xf32, #tpu.memory_space<vmem>>, vector<2x8x32xf32>
      %12 = vector.shape_cast %11 : vector<2x8x32xf32> to vector<16x32xf32>
      %c0_7 = arith.constant 0 : index
      %c0_8 = arith.constant 0 : index
      %c0_9 = arith.constant 0 : index
      %13 = vector.load %arg4[%c0_7, %c0_8, %c0_9] : memref<2x8x32xf32, #tpu.memory_space<vmem>>, vector<2x8x32xf32>
      %14 = vector.shape_cast %13 : vector<2x8x32xf32> to vector<16x32xf32>
      %c0_10 = arith.constant 0 : index
      %c0_11 = arith.constant 0 : index
      %15 = vector.load %arg7[%c0_10, %c0_11] : memref<32x32xf32, #tpu.memory_space<vmem>>, vector<32x32xf32>
      %cst = arith.constant dense<0.000000e+00> : vector<16x32xf32>
      %16 = tpu.matmul %12, %15, %cst {dimension_numbers = #tpu.dot_dimension_numbers<[1], [0], [0], [1], [0, 0, 1, 1], [], []>} : vector<16x32xf32>, vector<32x32xf32>, vector<16x32xf32> -> vector<16x32xf32>
      %c0_12 = arith.constant 0 : index
      %c0_13 = arith.constant 0 : index
      %17 = vector.load %arg8[%c0_12, %c0_13] : memref<1x32xf32, #tpu.memory_space<vmem>>, vector<1x32xf32>
      %18 = vector.broadcast %17 : vector<1x32xf32> to vector<16x32xf32>
      %19 = arith.addf %16, %18 : vector<16x32xf32>
      %c0_14 = arith.constant 0 : index
      %c0_15 = arith.constant 0 : index
      %20 = vector.load %arg9[%c0_14, %c0_15] : memref<32x32xf32, #tpu.memory_space<vmem>>, vector<32x32xf32>
      %cst_16 = arith.constant dense<0.000000e+00> : vector<16x32xf32>
      %21 = tpu.matmul %14, %20, %cst_16 {dimension_numbers = #tpu.dot_dimension_numbers<[1], [0], [0], [1], [0, 0, 1, 1], [], []>} : vector<16x32xf32>, vector<32x32xf32>, vector<16x32xf32> -> vector<16x32xf32>
      %c0_17 = arith.constant 0 : index
      %c0_18 = arith.constant 0 : index
      %22 = vector.load %arg10[%c0_17, %c0_18] : memref<1x32xf32, #tpu.memory_space<vmem>>, vector<1x32xf32>
      %23 = vector.broadcast %22 : vector<1x32xf32> to vector<16x32xf32>
      %24 = arith.addf %21, %23 : vector<16x32xf32>
      %cst_19 = arith.constant 0.000000e+00 : f32
      %25 = vector.broadcast %cst_19 : f32 to vector<16x32xf32>
      %26 = arith.cmpf ogt, %19, %25 : vector<16x32xf32>
      %cst_20 = arith.constant 1.000000e+00 : f32
      %27 = vector.broadcast %cst_20 : f32 to vector<16x32xf32>
      %28 = arith.addf %19, %27 : vector<16x32xf32>
      %29 = math.exp %19 : vector<16x32xf32>
      %30 = arith.select %26, %28, %29 : vector<16x32xi1>, vector<16x32xf32>
      %31 = vector.shape_cast %30 : vector<16x32xf32> to vector<2x8x32xf32>
      %32 = vector.shape_cast %24 : vector<16x32xf32> to vector<2x8x32xf32>
      %c0_21 = arith.constant 0 : index
      %c0_22 = arith.constant 0 : index
      %c0_23 = arith.constant 0 : index
      %33 = vector.load %arg16[%c0_21, %c0_22, %c0_23] : memref<2x32x32xf32, #tpu.memory_space<vmem>>, vector<2x32x32xf32>
      "tpu.trace_start"() <{level = 10 : i32, message = "bld,blm->bdm"}> : () -> ()
      %cst_24 = arith.constant dense<0.000000e+00> : vector<2x32x32xf32>
      %34 = tpu.matmul %31, %32, %cst_24 {dimension_numbers = #tpu.dot_dimension_numbers<[1], [1], [2], [2], [0, 0, 0, 2, 1, 2], [0], [0]>} : vector<2x8x32xf32>, vector<2x8x32xf32>, vector<2x32x32xf32> -> vector<2x32x32xf32>
      "tpu.trace_stop"() : () -> ()
      %35 = arith.addf %33, %34 : vector<2x32x32xf32>
      %c0_25 = arith.constant 0 : index
      %c0_26 = arith.constant 0 : index
      %c0_27 = arith.constant 0 : index
      %36 = vector.load %arg16[%c0_25, %c0_26, %c0_27] : memref<2x32x32xf32, #tpu.memory_space<vmem>>, vector<2x32x32xf32>
      tpu.vector_store %arg16[%c0_25, %c0_26, %c0_27], %35 {strides = array<i32>} : memref<2x32x32xf32, #tpu.memory_space<vmem>>, vector<2x32x32xf32>,
      %cst_28 = arith.constant 1.000000e+00 : f32
      %37 = vector.broadcast %cst_28 : f32 to vector<2x8x1xf32>
      %c0_29 = arith.constant 0 : index
      %c0_30 = arith.constant 0 : index
      %c0_31 = arith.constant 0 : index
      %38 = vector.load %arg17[%c0_29, %c0_30, %c0_31] : memref<2x32x1xf32, #tpu.memory_space<vmem>>, vector<2x32x1xf32>
      "tpu.trace_start"() <{level = 10 : i32, message = "bld,blo->bdo"}> : () -> ()
      %cst_32 = arith.constant dense<0.000000e+00> : vector<2x32x1xf32>
      %39 = tpu.matmul %31, %37, %cst_32 {dimension_numbers = #tpu.dot_dimension_numbers<[1], [1], [2], [2], [0, 0, 0, 2, 1, 2], [0], [0]>} : vector<2x8x32xf32>, vector<2x8x1xf32>, vector<2x32x1xf32> -> vector<2x32x1xf32>
      "tpu.trace_stop"() : () -> ()
      %40 = arith.addf %38, %39 : vector<2x32x1xf32>
      %c0_33 = arith.constant 0 : index
      %c0_34 = arith.constant 0 : index
      %c0_35 = arith.constant 0 : index
      %41 = vector.load %arg17[%c0_33, %c0_34, %c0_35] : memref<2x32x1xf32, #tpu.memory_space<vmem>>, vector<2x32x1xf32>
      tpu.vector_store %arg17[%c0_33, %c0_34, %c0_35], %40 {strides = array<i32>} : memref<2x32x1xf32, #tpu.memory_space<vmem>>, vector<2x32x1xf32>,
    } else {
    }
    %c1_i32 = arith.constant 1 : i32
    %8 = arith.cmpi eq, %arg1, %c1_i32 : i32
    %9 = arith.extui %8 : i1 to i32
    %c0_i32_4 = arith.constant 0 : i32
    %10 = arith.cmpi ne, %9, %c0_i32_4 : i32
    scf.if %10 {
      %c0 = arith.constant 0 : index
      %c0_5 = arith.constant 0 : index
      %c0_6 = arith.constant 0 : index
      %11 = vector.load %arg3[%c0, %c0_5, %c0_6] : memref<2x8x32xf32, #tpu.memory_space<vmem>>, vector<2x8x32xf32>
      %12 = vector.shape_cast %11 : vector<2x8x32xf32> to vector<16x32xf32>
      %c0_7 = arith.constant 0 : index
      %c0_8 = arith.constant 0 : index
      %13 = vector.load %arg5[%c0_7, %c0_8] : memref<32x32xf32, #tpu.memory_space<vmem>>, vector<32x32xf32>
      %cst = arith.constant dense<0.000000e+00> : vector<16x32xf32>
      %14 = tpu.matmul %12, %13, %cst {dimension_numbers = #tpu.dot_dimension_numbers<[1], [0], [0], [1], [0, 0, 1, 1], [], []>} : vector<16x32xf32>, vector<32x32xf32>, vector<16x32xf32> -> vector<16x32xf32>
      %c0_9 = arith.constant 0 : index
      %c0_10 = arith.constant 0 : index
      %15 = vector.load %arg6[%c0_9, %c0_10] : memref<1x32xf32, #tpu.memory_space<vmem>>, vector<1x32xf32>
      %16 = vector.broadcast %15 : vector<1x32xf32> to vector<16x32xf32>
      %17 = arith.addf %14, %16 : vector<16x32xf32>
      %cst_11 = arith.constant 0.000000e+00 : f32
      %18 = vector.broadcast %cst_11 : f32 to vector<16x32xf32>
      %19 = arith.cmpf ogt, %17, %18 : vector<16x32xf32>
      %cst_12 = arith.constant 1.000000e+00 : f32
      %20 = vector.broadcast %cst_12 : f32 to vector<16x32xf32>
      %21 = arith.addf %17, %20 : vector<16x32xf32>
      %22 = math.exp %17 : vector<16x32xf32>
      %23 = arith.select %19, %21, %22 : vector<16x32xi1>, vector<16x32xf32>
      %24 = vector.shape_cast %23 : vector<16x32xf32> to vector<2x8x32xf32>
      %c0_13 = arith.constant 0 : index
      %c0_14 = arith.constant 0 : index
      %25 = vector.load %arg13[%c0_13, %c0_14] : memref<32x32xf32, #tpu.memory_space<vmem>>, vector<32x32xf32>
      %c0_15 = arith.constant 0 : index
      %c0_16 = arith.constant 0 : index
      %c0_17 = arith.constant 0 : index
      %26 = vector.load %arg16[%c0_15, %c0_16, %c0_17] : memref<2x32x32xf32, #tpu.memory_space<vmem>>, vector<2x32x32xf32>
      %27 = vector.shape_cast %25 : vector<32x32xf32> to vector<1x32x32xf32>
      %28 = vector.broadcast %27 : vector<1x32x32xf32> to vector<2x32x32xf32>
      %29 = arith.mulf %26, %28 : vector<2x32x32xf32>
      %c0_18 = arith.constant 0 : index
      %c0_19 = arith.constant 0 : index
      %c0_20 = arith.constant 0 : index
      %30 = vector.load %arg17[%c0_18, %c0_19, %c0_20] : memref<2x32x1xf32, #tpu.memory_space<vmem>>, vector<2x32x1xf32>
      %31 = vector.shape_cast %25 : vector<32x32xf32> to vector<1x32x32xf32>
      %32 = vector.broadcast %30 : vector<2x32x1xf32> to vector<2x32x32xf32>
      %33 = vector.broadcast %31 : vector<1x32x32xf32> to vector<2x32x32xf32>
      %34 = arith.mulf %32, %33 : vector<2x32x32xf32>
      "tpu.trace_start"() <{level = 10 : i32, message = "bld,bdm->blm"}> : () -> ()
      %cst_21 = arith.constant dense<0.000000e+00> : vector<2x8x32xf32>
      %35 = tpu.matmul %24, %29, %cst_21 {dimension_numbers = #tpu.dot_dimension_numbers<[2], [1], [1], [2], [0, 0, 0, 1, 1, 2], [0], [0]>} : vector<2x8x32xf32>, vector<2x32x32xf32>, vector<2x8x32xf32> -> vector<2x8x32xf32>
      %cst_22 = arith.constant dense<0.000000e+00> : vector<2x8x32xf32>
      %36 = tpu.matmul %24, %34, %cst_22 {dimension_numbers = #tpu.dot_dimension_numbers<[2], [1], [1], [2], [0, 0, 0, 1, 1, 2], [0], [0]>} : vector<2x8x32xf32>, vector<2x32x32xf32>, vector<2x8x32xf32> -> vector<2x8x32xf32>
      "tpu.trace_stop"() : () -> ()
      %cst_23 = arith.constant 9.99999997E-7 : f32
      %37 = vector.broadcast %cst_23 : f32 to vector<2x8x32xf32>
      %38 = arith.addf %36, %37 : vector<2x8x32xf32>
      %39 = tpu.reciprocal %38 {approx = true} : vector<2x8x32xf32> -> vector<2x8x32xf32>
      %40 = arith.mulf %35, %39 : vector<2x8x32xf32>
      %41 = vector.shape_cast %40 : vector<2x8x32xf32> to vector<16x32xf32>
      %c0_24 = arith.constant 0 : index
      %c0_25 = arith.constant 0 : index
      %42 = vector.load %arg11[%c0_24, %c0_25] : memref<32x32xf32, #tpu.memory_space<vmem>>, vector<32x32xf32>
      %cst_26 = arith.constant dense<0.000000e+00> : vector<16x32xf32>
      %43 = tpu.matmul %41, %42, %cst_26 {dimension_numbers = #tpu.dot_dimension_numbers<[1], [0], [0], [1], [0, 0, 1, 1], [], []>} : vector<16x32xf32>, vector<32x32xf32>, vector<16x32xf32> -> vector<16x32xf32>
      %c0_27 = arith.constant 0 : index
      %c0_28 = arith.constant 0 : index
      %44 = vector.load %arg12[%c0_27, %c0_28] : memref<1x32xf32, #tpu.memory_space<vmem>>, vector<1x32xf32>
      %45 = vector.broadcast %44 : vector<1x32xf32> to vector<16x32xf32>
      %46 = arith.addf %43, %45 : vector<16x32xf32>
      %47 = vector.shape_cast %46 : vector<16x32xf32> to vector<2x8x32xf32>
      %c0_29 = arith.constant 0 : index
      %c0_30 = arith.constant 0 : index
      %c0_31 = arith.constant 0 : index
      %48 = vector.load %arg4[%c0_29, %c0_30, %c0_31] : memref<2x8x32xf32, #tpu.memory_space<vmem>>, vector<2x8x32xf32>
      %c0_32 = arith.constant 0 : index
      %49 = memref.load %arg14[%c0_32] : memref<1xf32, #tpu.memory_space<smem>>
      %50 = vector.broadcast %49 : f32 to vector<2x8x32xf32>
      %51 = arith.mulf %50, %47 : vector<2x8x32xf32>
      %52 = arith.addf %48, %51 : vector<2x8x32xf32>
      %c0_33 = arith.constant 0 : index
      %c0_34 = arith.constant 0 : index
      %c0_35 = arith.constant 0 : index
      %53 = vector.load %arg15[%c0_33, %c0_34, %c0_35] : memref<2x8x32xf32, #tpu.memory_space<vmem>>, vector<2x8x32xf32>
      tpu.vector_store %arg15[%c0_33, %c0_34, %c0_35], %52 {strides = array<i32>} : memref<2x8x32xf32, #tpu.memory_space<vmem>>, vector<2x8x32xf32>,
    } else {
    }
    return
  }
  func.func @transform_0(%arg0: i32, %arg1: i32, %arg2: i32) -> (i32, i32, i32) {
    %c0_i32 = arith.constant 0 : i32
    %c0_i32_0 = arith.constant 0 : i32
    return %arg0, %arg2, %c0_i32 : i32, i32, i32
  }
  func.func @transform_1(%arg0: i32, %arg1: i32, %arg2: i32) -> (i32, i32, i32) {
    %c0_i32 = arith.constant 0 : i32
    %c0_i32_0 = arith.constant 0 : i32
    return %arg0, %arg2, %c0_i32 : i32, i32, i32
  }
  func.func @transform_2(%arg0: i32, %arg1: i32, %arg2: i32) -> (i32, i32) {
    %c0_i32 = arith.constant 0 : i32
    %c0_i32_0 = arith.constant 0 : i32
    %c0_i32_1 = arith.constant 0 : i32
    return %c0_i32, %c0_i32_0 : i32, i32
  }
  func.func @transform_3(%arg0: i32, %arg1: i32, %arg2: i32) -> (i32, i32) {
    %c0_i32 = arith.constant 0 : i32
    %c0_i32_0 = arith.constant 0 : i32
    %c0_i32_1 = arith.constant 0 : i32
    return %c0_i32, %c0_i32_0 : i32, i32
  }
  func.func @transform_4(%arg0: i32, %arg1: i32, %arg2: i32) -> (i32, i32) {
    %c0_i32 = arith.constant 0 : i32
    %c0_i32_0 = arith.constant 0 : i32
    %c0_i32_1 = arith.constant 0 : i32
    return %c0_i32, %c0_i32_0 : i32, i32
  }
  func.func @transform_5(%arg0: i32, %arg1: i32, %arg2: i32) -> (i32, i32) {
    %c0_i32 = arith.constant 0 : i32
    %c0_i32_0 = arith.constant 0 : i32
    %c0_i32_1 = arith.constant 0 : i32
    return %c0_i32, %c0_i32_0 : i32, i32
  }
  func.func @transform_6(%arg0: i32, %arg1: i32, %arg2: i32) -> (i32, i32) {
    %c0_i32 = arith.constant 0 : i32
    %c0_i32_0 = arith.constant 0 : i32
    %c0_i32_1 = arith.constant 0 : i32
    return %c0_i32, %c0_i32_0 : i32, i32
  }
  func.func @transform_7(%arg0: i32, %arg1: i32, %arg2: i32) -> (i32, i32) {
    %c0_i32 = arith.constant 0 : i32
    %c0_i32_0 = arith.constant 0 : i32
    %c0_i32_1 = arith.constant 0 : i32
    return %c0_i32, %c0_i32_0 : i32, i32
  }
  func.func @transform_8(%arg0: i32, %arg1: i32, %arg2: i32) -> (i32, i32) {
    %c0_i32 = arith.constant 0 : i32
    %c0_i32_0 = arith.constant 0 : i32
    %c0_i32_1 = arith.constant 0 : i32
    return %c0_i32, %c0_i32_0 : i32, i32
  }
  func.func @transform_9(%arg0: i32, %arg1: i32, %arg2: i32) -> (i32, i32) {
    %c0_i32 = arith.constant 0 : i32
    %c0_i32_0 = arith.constant 0 : i32
    %c0_i32_1 = arith.constant 0 : i32
    return %c0_i32, %c0_i32_0 : i32, i32
  }
  func.func @transform_10(%arg0: i32, %arg1: i32, %arg2: i32) -> (i32, i32) {
    %c0_i32 = arith.constant 0 : i32
    %c0_i32_0 = arith.constant 0 : i32
    %c0_i32_1 = arith.constant 0 : i32
    return %c0_i32, %c0_i32_0 : i32, i32
  }
  func.func @transform_11(%arg0: i32, %arg1: i32, %arg2: i32) -> i32 {
    %c0_i32 = arith.constant 0 : i32
    %c0_i32_0 = arith.constant 0 : i32
    return %c0_i32 : i32
  }
  func.func @transform_12(%arg0: i32, %arg1: i32, %arg2: i32) -> (i32, i32, i32) {
    %0 = arith.muli %arg2, %arg1 : i32
    %c0_i32 = arith.constant 0 : i32
    %c0_i32_0 = arith.constant 0 : i32
    return %arg0, %0, %c0_i32 : i32, i32, i32
  }
}

</mosaic_0001>

<bundles_post_ra>
// kernel: tpu_custom_call.1
= control target key start
LH: loop header
LB: loop body
LE: loop exit
PB: predicated region body
PF: predicated region fallthrough
CT: control target
= control target key end

     0   :  { %s3498_s0 = inlined_call_operand.hbm [shape: f32[2,16,32], index: 0, kind: input, shape index: {}]   ;;  %s3499_s1 = inlined_call_operand.hbm [shape: f32[2,16,32], index: 1, kind: input, shape index: {}]   ;;  %s3500_s2 = inlined_call_operand.hbm [shape: f32[32,32], index: 2, kind: input, shape index: {}]   ;;  %s3501_s3 = inlined_call_operand.vmem [shape: f32[1,32], index: 3, kind: input, shape index: {}]   ;;  %s3502_s4 = inlined_call_operand.hbm [shape: f32[32,32], index: 4, kind: input, shape index: {}]   ;;  %s3503_s5 = inlined_call_operand.vmem [shape: f32[1,32], index: 5, kind: input, shape index: {}]   ;;  %s3504_s6 = inlined_call_operand.hbm [shape: f32[32,32], index: 6, kind: input, shape index: {}]   ;;  %s3505_s7 = inlined_call_operand.hbm [shape: f32[1,32], index: 7, kind: input, shape index: {}]   ;;  %s3506_s8 = inlined_call_operand.vmem [shape: f32[32,32], index: 8, kind: input, shape index: {}]   ;;  %s3507_s9 = inlined_call_operand.vmem [shape: f32[1,32], index: 9, kind: input, shape index: {}]   ;;  %s3508_s10 = inlined_call_operand.hbm [shape: f32[32,32], index: 10, kind: input, shape index: {}]   ;;  %s3509_s11 = inlined_call_operand.<no memory space> [shape: f32[1], index: 11, kind: input, shape index: {}]   ;;  %s3510_s12 = inlined_call_operand.hbm [shape: f32[2,16,32], index: 12, kind: output, shape index: {}]  }
   0x1   :  { %3529 = sst [smem:[#allocation31_spill]] %s3498_s0 }
   0x2   :  { %3530 = sst [smem:[#allocation32_spill]] %s3500_s2 }
   0x3   :  { %3531 = sst [smem:[#allocation33_spill]] %s3501_s3 }
   0x4   :  { %3532 = sst [smem:[#allocation34_spill]] %s3502_s4 }
   0x5   :  { %3533 = sst [smem:[#allocation35_spill]] %s3503_s5 }
   0x6   :  { %3534 = sst [smem:[#allocation36_spill]] %s3504_s6 }
   0x7   :  { %3535 = sst [smem:[#allocation37_spill]] %s3505_s7 }
   0x8   :  { %3536 = sst [smem:[#allocation38_spill]] %s3506_s8 }
   0x9   :  { %3537 = sst [smem:[#allocation39_spill]] %s3507_s9 }
   0xa   :  { %3538 = sst [smem:[#allocation40_spill]] %s3510_s12 }
   0xb   :  { %17 = sst [smem:[#allocation4]] %s3509_s11 }
   0xc   :  { %18 = vsyncpa [#allocation6], 0 }
   0xd   :  { %20 = vsyncpa [#allocation6 + $0x1], 0 }
   0xe   :  { %21 = vsyncpa [#allocation9], 0 }
   0xf   :  { %23 = vsyncpa [#allocation9 + $0x1], 0 }
  0x10   :  { %24 = vsyncpa [#allocation12], 0 }
  0x11   :  { %25 = vsyncpa [#allocation15], 0 }
  0x12   :  { %26 = vsyncpa [#allocation7], 0 }
  0x13   :  { %28 = vsyncpa [#allocation7 + $0x1], 0  ;;  %s2952_s23 = smov 0   ;;  %s2954_s24 = smov 0  }
  0x14   :  { %s2956_s25 = smov 0   ;;  %s2958_s26 = smov 0  }
  0x15   :  { %s2960_s27 = smov 0   ;;  %s2962_s28 = smov 0  }
  0x16   :  { %s2964_s11 = smov 0   ;;  %s2966_s29 = smov 0  }
  0x17   :  { %s2968_s30 = smov 0   ;;  %s2970_s13 = smov 0  }
  0x18   :  { %s2972_s14 = smov 0  }
  0x19 LB: > { %3539 = sst [smem:[#allocation24_spill]] %s2822_s23  ;;  %s3006_s15 = sadd.s32 4294967295, %s2862_s14   ;;  %s2862_s14 = sphi %s2972_s14, %s34_s14   ;;  %s2858_s13 = sphi %s2970_s13, %s3599_s13   ;;  %s2854_s30 = sphi %s2968_s30, %s3598_s30   ;;  %s2850_s29 = sphi %s2966_s29, %s3597_s29   ;;  %s2846_s11 = sphi %s2964_s11, %s3596_s11   ;;  %s2842_s28 = sphi %s2962_s28, %s3595_s28   ;;  %s2838_s27 = sphi %s2960_s27, %s3594_s27   ;;  %s2834_s26 = sphi %s2958_s26, %s3593_s26   ;;  %s2830_s25 = sphi %s2956_s25, %s3592_s25   ;;  %s2826_s24 = sphi %s2954_s24, %s3591_s24   ;;  %s2822_s23 = sphi %s2952_s23, %s3588_s23  }
  0x1a   : > { %3540 = sst [smem:[#allocation25_spill]] %s2826_s24  ;;  %s2040_s16 = sadd.s32 4294967294, %s2862_s14  }
  0x1b   : > { %3541 = sst [smem:[#allocation26_spill]] %s2846_s11  ;;  %p75_p0 = scmp.ne.s32.totalorder %s2838_s27, %s2834_s26 }
  0x1c   : > { %3542 = sst [smem:[#allocation27_spill]] %s2850_s29  ;;  %p3517_p1 = scmp.eq.s32.totalorder %s3006_s15, 0 }
  0x1d   : > { %3543 = sst [smem:[#allocation28_spill]] %s3006_s15  ;;  %p340_p2 = scmp.ne.s32.totalorder %s2830_s25, %s2826_s24 }
  0x1e   : > { %p341_p3 = scmp.eq.s32.totalorder %s3006_s15, 3  ;;  %p3016_p4 = por %p3517_p1, %p75_p0 }
  0x1f   : > { %p346_p5 = scmp.ne.s32.totalorder %s2826_s24, %s2822_s23  ;;  %p347_p7 = scmp.eq.s32.totalorder %s2040_s16, 3 }
  0x20   : > { %s3544_s17 = scalar_select %p3016_p4, 1, 0 }
  0x21   : > { %p3022_p6 = por %p341_p3, %p340_p2  ;;  %p2041_p8 = scmp.ge.s32.totalorder %s2862_s14, 1 }
  0x22   : > { %p354_p9 = scmp.lt.s32.totalorder %s2862_s14, 5  ;;  %p3028_p10 = por %p347_p7, %p346_p5 }
  0x23   : > { %s3545_s18 = scalar_select %p3022_p6, 1, 0 }
  0x24   : > { %s3547_s19 = scalar_select %p3028_p10, 1, 0 }
  0x25   : > { %3546 = sst [smem:[#allocation29_spill]] %s3545_s18  ;;  %p3032_p11 = pnand %p2041_p8, %p354_p9 }
  0x26   : > { %3548 = sst [smem:[#allocation30_spill]] %s3547_s19  ;;  %s2864_s21 = smov [#allocation10]  }
  0x27   : > { %s3549_s20 = scalar_select %p3032_p11, 1, 0 }
  0x28   : > { %s366_s22 = sshll.u32 %s2864_s21, 4  ;;  %p2365_p12 = pneg %p3032_p11  ;;  %s367_s22 = int_to_ptr.vmem [resolvable:$true] %s366_s22 }
  0x29   : > { %s2865_s16 = smov [#allocation11]   ;;  %s3551_s2 = sld [smem:[#allocation32_spill]] }
  0x2a   : > { %p3040_p13 = pnand %p2365_p12, %p3517_p1  ;;  %s382_s23 = sshll.u32 %s2865_s16, 4  ;;  %s3044_s23 = int_to_ptr.vmem [resolvable:$true] %s382_s23 }
  0x2c   : > { %p3054_p2 = pneg %p3040_p13 }
  0x2f   : > { %s2524_s18 = scalar_lea.hbm %s3551_s2, 512 }
  0x30   : > { %p2525_p0 = scmp.ne.s32.totalorder %s3551_s2, %s2524_s18  ;;  %p2531_p7 = scmp.lt.u32.totalorder %s2524_s18, %s3551_s2 }
  0x32   : > { %p2527_p3 = pnand %p3054_p2, %p2525_p0 }
  0x34   : > { %p2528_p5 = pneg %p2527_p3 }
  0x36   : > { %p2533_p8 = pnand %p2531_p7, %p2528_p5 }
  0x38   : > { %2536 = shalt.err (!%p2533_p8)
}
  0x39   : > { %s2537_s12 = scalar_lea.vmem %s367_s22, 512  ;;  %p2545_p10 = scmp.lt.s32.totalorder %s367_s22, %s367_s22 }
  0x3a   : > { %p2538_p9 = scmp.ne.s32.totalorder %s367_s22, %s2537_s12  ;;  %p2546_p6 = scmp.lt.s32.totalorder %s2537_s12, %s2537_s12 }
  0x3c   : > { %p2540_p12 = pnand %p2538_p9, %p3054_p2  ;;  %p2547_p4 = por %p2546_p6, %p2545_p10 }
  0x3e   : > { %p2541_p1 = pneg %p2540_p12 }
  0x40   : > { %p2548_p11 = pnand %p2547_p4, %p2541_p1 }
  0x42   : > { %2551 = shalt.err (!%p2548_p11)
}
  0x43   : > { %s3525_s8 = smov 128   ;;  %s3527_s9 = smov 8  }
  0x44   : > { %2368 = dma.hbm_to_vmem [thread:$0]  (!%p3040_p13), %s3551_s2, 512, %s367_s22, [#allocation9], %s3525_s8, %s3525_s8, %s3527_s9  }
  0x45   : > { %s3553_s4 = sld [smem:[#allocation34_spill]] }
  0x4b   : > { %s2552_s5 = scalar_lea.hbm %s3553_s4, 512 }
  0x4c   : > { %p2553_p1 = scmp.ne.s32.totalorder %s3553_s4, %s2552_s5  ;;  %p2559_p10 = scmp.lt.u32.totalorder %s2552_s5, %s3553_s4 }
  0x4e   : > { %p2555_p4 = pnand %p2553_p1, %p3054_p2 }
  0x50   : > { %p2556_p6 = pneg %p2555_p4 }
  0x52   : > { %p2561_p11 = pnand %p2559_p10, %p2556_p6 }
  0x54   : > { %2564 = shalt.err (!%p2561_p11)
}
  0x55   : > { %s2565_s22 = scalar_lea.vmem %s3044_s23, 512  ;;  %p2573_p7 = scmp.lt.s32.totalorder %s3044_s23, %s3044_s23 }
  0x56   : > { %p2566_p0 = scmp.ne.s32.totalorder %s3044_s23, %s2565_s22  ;;  %p2574_p8 = scmp.lt.s32.totalorder %s2565_s22, %s2565_s22 }
  0x58   : > { %p2568_p3 = pnand %p2566_p0, %p3054_p2  ;;  %p2575_p9 = por %p2574_p8, %p2573_p7 }
  0x5a   : > { %p2569_p5 = pneg %p2568_p3 }
  0x5c   : > { %p2576_p12 = pnand %p2575_p9, %p2569_p5 }
  0x5e   : > { %2579 = shalt.err (!%p2576_p12)
}
  0x5f   : > { %2371 = dma.hbm_to_vmem [thread:$0]  (!%p3040_p13), %s3553_s4, 512, %s3044_s23, [#allocation12], %s3525_s8, %s3525_s8, %s3527_s9  }
  0x60   : > { %s2868_s11 = smov [#allocation14]   ;;  %s2869_s3 = smov [#allocation13]  }
  0x61   : > { %s412_s29 = sshll.u32 %s2868_s11, 4  ;;  %s398_s18 = sshll.u32 %s2869_s3, 4  ;;  %s413_s29 = int_to_ptr.vmem [resolvable:$true] %s412_s29  ;;  %s399_s18 = int_to_ptr.vmem [resolvable:$true] %s398_s18 }
  0x62   : > { %s3554_s7 = sld [smem:[#allocation37_spill]] }
  0x68   : > { %s2580_s12 = scalar_lea.hbm %s3554_s7, 16 }
  0x69   : > { %p2581_p1 = scmp.ne.s32.totalorder %s3554_s7, %s2580_s12  ;;  %p2587_p10 = scmp.lt.u32.totalorder %s2580_s12, %s3554_s7 }
  0x6b   : > { %p2583_p4 = pnand %p2581_p1, %p3054_p2 }
  0x6d   : > { %p2584_p6 = pneg %p2583_p4 }
  0x6f   : > { %p2589_p11 = pnand %p2587_p10, %p2584_p6 }
  0x71   : > { %2592 = shalt.err (!%p2589_p11)
}
  0x72   : > { %s2593_s23 = scalar_lea.vmem %s413_s29, 16  ;;  %s2600_s24 = scalar_lea.vmem %s413_s29, 32 }
  0x73   : > { %p2594_p0 = scmp.ne.s32.totalorder %s413_s29, %s2593_s23  ;;  %p2601_p7 = scmp.lt.s32.totalorder %s413_s29, %s413_s29 }
  0x74   : > { %p2602_p8 = scmp.lt.s32.totalorder %s2600_s24, %s2593_s23 }
  0x75   : > { %p2596_p3 = pnand %p2594_p0, %p3054_p2 }
  0x76   : > { %p2603_p9 = por %p2602_p8, %p2601_p7 }
  0x77   : > { %p2597_p5 = pneg %p2596_p3 }
  0x79   : > { %p2604_p12 = pnand %p2603_p9, %p2597_p5 }
  0x7b   : > { %2607 = shalt.err (!%p2604_p12)
}
  0x7c   : > { %2377 = dma.hbm_to_vmem [thread:$0]  (!%p3040_p13), %s3554_s7, 16, %s413_s29, [#allocation15]  }
  0x7d   : > { %s3555_s6 = sld [smem:[#allocation36_spill]] }
  0x83   : > { %s2608_s19 = scalar_lea.hbm %s3555_s6, 512 }
  0x84   : > { %p2609_p1 = scmp.ne.s32.totalorder %s3555_s6, %s2608_s19  ;;  %p2615_p10 = scmp.lt.u32.totalorder %s2608_s19, %s3555_s6 }
  0x86   : > { %p2611_p4 = pnand %p2609_p1, %p3054_p2 }
  0x88   : > { %p2612_p6 = pneg %p2611_p4 }
  0x8a   : > { %p2617_p11 = pnand %p2615_p10, %p2612_p6 }
  0x8c   : > { %2620 = shalt.err (!%p2617_p11)
}
  0x8d   : > { %s2621_s23 = scalar_lea.vmem %s399_s18, 512  ;;  %p2629_p7 = scmp.lt.s32.totalorder %s399_s18, %s399_s18 }
  0x8e   : > { %p2622_p0 = scmp.ne.s32.totalorder %s399_s18, %s2621_s23  ;;  %p2630_p8 = scmp.lt.s32.totalorder %s2621_s23, %s2621_s23 }
  0x90   : > { %p2624_p3 = pnand %p2622_p0, %p3054_p2  ;;  %p2631_p9 = por %p2630_p8, %p2629_p7 }
  0x92   : > { %p2625_p5 = pneg %p2624_p3 }
  0x94   : > { %p2632_p12 = pnand %p2631_p9, %p2625_p5 }
  0x96   : > { %2635 = shalt.err (!%p2632_p12)
}
  0x97   : > { %2374 = dma.hbm_to_vmem [thread:$0]  (!%p3040_p13), %s3555_s6, 512, %s399_s18, [#allocation12], %s3525_s8, %s3525_s8, %s3527_s9  }
  0x98   : > { %s2870_s2 = smov [#allocation16]   ;;  %s2636_s19 = scalar_lea.hbm %s3508_s10, 512 }
  0x99   : > { %s428_s11 = sshll.u32 %s2870_s2, 4  ;;  %p2637_p1 = scmp.ne.s32.totalorder %s3508_s10, %s2636_s19  ;;  %s429_s11 = int_to_ptr.vmem [resolvable:$true] %s428_s11 }
  0x9a   : > { %p2643_p10 = scmp.lt.u32.totalorder %s2636_s19, %s3508_s10 }
  0x9b   : > { %p2639_p4 = pnand %p2637_p1, %p3054_p2 }
  0x9d   : > { %p2640_p6 = pneg %p2639_p4 }
  0x9f   : > { %p2645_p11 = pnand %p2643_p10, %p2640_p6 }
  0xa1   : > { %2648 = shalt.err (!%p2645_p11)
}
  0xa2   : > { %s2649_s18 = scalar_lea.vmem %s429_s11, 512  ;;  %p2657_p7 = scmp.lt.s32.totalorder %s429_s11, %s429_s11 }
  0xa3   : > { %p2650_p0 = scmp.ne.s32.totalorder %s429_s11, %s2649_s18  ;;  %p2658_p8 = scmp.lt.s32.totalorder %s2649_s18, %s2649_s18 }
  0xa5   : > { %p2652_p3 = pnand %p2650_p0, %p3054_p2  ;;  %p2659_p9 = por %p2658_p8, %p2657_p7 }
  0xa7   : > { %p2653_p5 = pneg %p2652_p3 }
  0xa9   : > { %p2660_p12 = pnand %p2659_p9, %p2653_p5 }
  0xab   : > { %2663 = shalt.err (!%p2660_p12)
}
  0xac   : > { %2380 = dma.hbm_to_vmem [thread:$0]  (!%p3040_p13), %s3508_s10, 512, %s429_s11, [#allocation15], %s3525_s8, %s3525_s8, %s3527_s9  }
  0xad   : > { %s46_s26 = sadd.s32 1, %s2854_s30  ;;  %s49_s21 = sadd.s32 1, %s2858_s13 }
  0xae   : > { %p47_p2 = scmp.ge.s32.totalorder %s46_s26, 2  ;;  %s62_s24 = sadd.s32 1, %s2842_s28 }
  0xaf   : > { %p69_p1 = scmp.ne.s32.totalorder %s2842_s28, %s2838_s27  ;;  %p70_p4 = scmp.eq.s32.totalorder %s2862_s14, 0 }
  0xb0   : > { %s3601_s26 = smov (%p47_p2, %s46_s26), 0  ;;  %s3603_s21 = smov (!%p47_p2, %s49_s21), %s2858_s13 }
  0xb1   : > { %s58_s2 = ssub.s32 %s2854_s30, %s3601_s26  ;;  %p3170_p6 = por %p70_p4, %p69_p1 }
  0xb2   : > { %p51_p13 = scmp.ge.s32.totalorder %s3603_s21, 2  ;;  %p60_p10 = scmp.eq.s32.totalorder %s58_s2, 0 }
  0xb3   : > { %s323_s15 = smul.u32 %s2854_s30, %s2858_s13  ;;  %s330_s3 = sadd.s32 1, %s2830_s25 }
  0xb4   : > { %s3605_s21 = smov (%p51_p13, %s3603_s21), 0  ;;  %p2397_p11 = scmp.lt.s32.totalorder %s2862_s14, 4 }
  0xb5   : > { %s3180_s19 = scalar_select %p60_p10, %s2842_s28, %s62_s24  }
  0xb6   : > { %s324_s16 = smul.u32 %s3605_s21, %s3601_s26  ;;  %s445_s12 = sand.u32 1, %s2842_s28  }
  0xb7   : > { %s2049_s22 = sshll.u32 %s2854_s30, 7  ;;  %s3187_s18 = sshll.u32 %s445_s12, 4 }
  0xb8   : > { %s326_s5 = ssub.s32 %s323_s15, %s324_s16  ;;  %s3557_s0 = sld [smem:[#allocation31_spill]] }
  0xb9   : > { %p328_p0 = scmp.eq.s32.totalorder %s326_s5, 0  ;;  %s449_s8 = scalar_lea.vmem [#allocation5], %s3187_s18 }
  0xba   : > { %s458_s9 = sshll.u32 %s449_s8, 4  ;;  %p3202_p3 = pnand %p2397_p11, %p3170_p6  ;;  %s3206_s9 = int_to_ptr.vmem [resolvable:$true] %s458_s9 }
  0xbb   : > { %s3197_s24 = scalar_select %p328_p0, %s2830_s25, %s330_s3  }
  0xbc   : > { %s3208_s16 = scalar_lea.sflag [#allocation6], %s445_s12  ;;  %p2666_p7 = pneg %p3202_p3 }
  0xbe   : > { %s3194_s2 = scalar_lea.hbm %s3557_s0, %s2049_s22  ;;  %s2669_s3 = scalar_lea.hbm %s3557_s0, 512 }
  0xbf   : > { %s2664_s5 = scalar_lea.hbm %s3194_s2, 256  ;;  %p2670_p12 = scmp.lt.u32.totalorder %s3194_s2, %s3557_s0 }
  0xc0   : > { %p2665_p5 = scmp.ne.s32.totalorder %s3194_s2, %s2664_s5  ;;  %p2671_p2 = scmp.lt.u32.totalorder %s2669_s3, %s2664_s5 }
  0xc1   : > { %p2673_p4 = scmp.lt.u32.totalorder %s2664_s5, %s3194_s2 }
  0xc2   : > { %p2667_p8 = pnand %p2666_p7, %p2665_p5  ;;  %p2672_p1 = por %p2671_p2, %p2670_p12 }
  0xc4   : > { %p2668_p9 = pneg %p2667_p8  ;;  %p2674_p6 = por %p2673_p4, %p2672_p1 }
  0xc6   : > { %p2675_p13 = pnand %p2674_p6, %p2668_p9 }
  0xc8   : > { %2678 = shalt.err (!%p2675_p13)
}
  0xc9   : > { %s2679_s12 = scalar_lea.vmem %s3206_s9, 256  ;;  %s2871_s8 = smov [#allocation5]  }
  0xca   : > { %p2680_p10 = scmp.ne.s32.totalorder %s3206_s9, %s2679_s12  ;;  %s2684_s11 = sshll.u32 %s2871_s8, 4  ;;  %s2685_s11 = int_to_ptr.vmem [resolvable:$false] %s2684_s11 }
  0xcb   : > { %s2686_s23 = scalar_lea.vmem %s2685_s11, 512  ;;  %p2687_p5 = scmp.lt.s32.totalorder %s3206_s9, %s2685_s11 }
  0xcc   : > { %p2682_p11 = pnand %p2680_p10, %p2666_p7  ;;  %p2688_p8 = scmp.lt.s32.totalorder %s2686_s23, %s2679_s12 }
  0xce   : > { %p2683_p0 = pneg %p2682_p11  ;;  %p2689_p12 = por %p2688_p8, %p2687_p5 }
  0xd0   : > { %p2690_p2 = pnand %p2689_p12, %p2683_p0 }
  0xd2   : > { %2693 = shalt.err (!%p2690_p2)
}
  0xd3   : > { %s2872_s5 = smov 256   ;;  %s3559_s3 = smov 8  }
  0xd4   : > { %s3560_s29 = smov 128   ;;  %s3244_s11 = scalar_lea.hbm %s3499_s1, %s2049_s22 }
  0xd5   : > { %2384 = dma.hbm_to_vmem [thread:$0]  (!%p3202_p3), %s3194_s2, 256, %s3206_s9, %s3208_s16, %s2872_s5, %s3560_s29, %s3559_s3  }
  0xd6   : > { %s472_s23 = scalar_lea.vmem [#allocation8], %s3187_s18  ;;  %s468_s4 = sand.u32 1, %s2862_s14  }
  0xd7   : > { %s481_s0 = sshll.u32 %s472_s23, 4  ;;  %s3250_s6 = scalar_lea.sflag [#allocation9], %s468_s4  ;;  %s3247_s0 = int_to_ptr.vmem [resolvable:$true] %s481_s0 }
  0xd8   : > { %s2694_s7 = scalar_lea.hbm %s3244_s11, 256  ;;  %s2699_s2 = scalar_lea.hbm %s3499_s1, 512 }
  0xd9   : > { %p2695_p9 = scmp.ne.s32.totalorder %s3244_s11, %s2694_s7  ;;  %p2700_p6 = scmp.lt.u32.totalorder %s3244_s11, %s3499_s1 }
  0xda   : > { %p2701_p13 = scmp.lt.u32.totalorder %s2699_s2, %s2694_s7  ;;  %p2703_p11 = scmp.lt.u32.totalorder %s2694_s7, %s3244_s11 }
  0xdb   : > { %p2697_p1 = pnand %p2695_p9, %p2666_p7 }
  0xdc   : > { %p2702_p10 = por %p2701_p13, %p2700_p6 }
  0xdd   : > { %p2698_p4 = pneg %p2697_p1 }
  0xde   : > { %p2704_p0 = por %p2703_p11, %p2702_p10 }
  0xe0   : > { %p2705_p5 = pnand %p2704_p0, %p2698_p4 }
  0xe2   : > { %2708 = shalt.err (!%p2705_p5)
}
  0xe3   : > { %s2709_s4 = scalar_lea.vmem %s3247_s0, 256  ;;  %s2873_s18 = smov [#allocation8]  }
  0xe4   : > { %p2710_p8 = scmp.ne.s32.totalorder %s3247_s0, %s2709_s4  ;;  %s2714_s12 = sshll.u32 %s2873_s18, 4  ;;  %s2715_s12 = int_to_ptr.vmem [resolvable:$false] %s2714_s12 }
  0xe5   : > { %s2716_s23 = scalar_lea.vmem %s2715_s12, 512  ;;  %p2717_p9 = scmp.lt.s32.totalorder %s3247_s0, %s2715_s12 }
  0xe6   : > { %p2712_p12 = pnand %p2710_p8, %p2666_p7  ;;  %p2718_p1 = scmp.lt.s32.totalorder %s2716_s23, %s2709_s4 }
  0xe8   : > { %p2713_p2 = pneg %p2712_p12  ;;  %p2719_p6 = por %p2718_p1, %p2717_p9 }
  0xea   : > { %p2720_p13 = pnand %p2719_p6, %p2713_p2 }
  0xec   : > { %2723 = shalt.err (!%p2720_p13)
}
  0xed   : > { %2387 = dma.hbm_to_vmem [thread:$0]  (!%p3202_p3), %s3244_s11, 256, %s3247_s0, %s3250_s6, %s2872_s5, %s3560_s29, %s3559_s3  }
  0xee   : > { %p3561_p7 = scmp.ne.s32.totalorder %s3549_s20, 0 }
  0xef   : > { %s495_s7 = sand.u32 (!%p3561_p7), 1, %s2838_s27   ;;  %p3562_p4 = scmp.ne.s32.totalorder (!%p3561_p7), %s3544_s17, 0 }
  0xf0   : > { %493 = sbr.rel (%p3561_p7) target bundleno = 1647 (0x66f), region = 68  ;;  %s2053_s9 = sshll.u32 (!%p3561_p7), %s495_s7, 4 }
  0xf1   : > { %s496_s22 = scalar_lea.sflag (!%p3561_p7), [#allocation6], %s495_s7  ;;  %s3282_s2 = scalar_lea.vmem (!%p3561_p7), [#allocation5], %s2053_s9 }
  0xf7   : > { %2797 = dma.done.wait (%p3562_p4), %s496_s22, 256  }
  0xf8   : > { %2799 = vsyncadd (%p3562_p4), %s496_s22, 4294967040  ;;  %s3563_s15 = sld [smem:[#allocation28_spill]]  ;;  %s3289_s0 = scalar_lea.vmem [#allocation8], %s2053_s9 }
  0xfe   : > { %s504_s16 = sand.u32 1, %s3563_s15  }
  0xff   : > { %s505_s8 = scalar_lea.sflag [#allocation9], %s504_s16 }
 0x100   : > { %2801 = dma.done.wait (%p3562_p4), %s505_s8, 256  }
 0x101   : > { %2803 = vsyncadd (%p3562_p4), %s505_s8, 4294967040  ;;  %p3564_p3 = scmp.eq.s32.totalorder %s3563_s15, 0 }
 0x103   : > { %2805 = dma.done.wait (%p3564_p3), [#allocation9], 512   ;;  %p3565_p10 = pmov %p3564_p3 }
 0x104   : > { %p3566_p11 = pmov %p3564_p3 }
 0x105   : > { %2807 = vsyncadd (%p3565_p10), [#allocation9], 4294966784 }
 0x106   : > { %2809 = dma.done.wait (%p3566_p11), [#allocation12], 1024   ;;  %p3567_p0 = pmov %p3564_p3 }
 0x108   : > { %2811 = vsyncadd (%p3567_p0), [#allocation12], 4294966272  ;;  %p3568_p5 = pmov %p3567_p0 }
 0x109   : > { %p3569_p8 = pmov %p3567_p0 }
 0x10a   : > { %2813 = dma.done.wait (%p3568_p5), [#allocation15], 528  }
 0x10b   : > { %2815 = vsyncadd (%p3569_p8), [#allocation15], 4294966768  ;;  %s3570_s6 = sld [smem:[#allocation25_spill]]  ;;  %s3571_s17 = sld [smem:[#allocation27_spill]] }
 0x10c   : > { %s3572_s20 = sld [smem:[#allocation26_spill]] }
 0x111   : > { %s571_s5 = sand.u32 1, %s3570_s6   ;;  %p578_p12 = scmp.eq.s32.totalorder %s3571_s17, 0 }
 0x112   : > { %s2060_s3 = sshll.u32 %s571_s5, 4  ;;  %p579_p2 = scmp.eq.s32.totalorder %s3572_s20, 0 }
 0x113   : > { %s3312_s29 = scalar_lea.vmem [#allocation17], %s2060_s3 }
 0x114   : > { %p580_p9 = pnand %p579_p2, %p578_p12 }
 0x115   : > { %vm584_vm0 = vcmask (!%p580_p9), 261120   ;;  %vm593_vm1 = vcmask (!%p580_p9), 7168   ;;  %v2874_v0 = vmov (!%p580_p9), 0.0  }
 0x116   : > { %583 = sbr.rel (%p580_p9) target bundleno = 286 (0x11e), region = 100  ;;  %585 = vst.msk [vmem:[#allocation2] sm:$0xff] (!%p580_p9), %vm584_vm0, %v2874_v0  ;;  %586 = vst.msk [vmem:[#allocation2 + $0x8] sm:$0xff] (!%p580_p9), %vm584_vm0, %v2874_v0 }
 0x117   : > { %587 = vst.msk [vmem:[#allocation2 + $0x10] sm:$0xff] (!%p580_p9), %vm584_vm0, %v2874_v0  ;;  %588 = vst.msk [vmem:[#allocation2 + $0x18] sm:$0xff] (!%p580_p9), %vm584_vm0, %v2874_v0 }
 0x118   : > { %589 = vst.msk [vmem:[#allocation2 + $0x20] sm:$0xff] (!%p580_p9), %vm584_vm0, %v2874_v0  ;;  %590 = vst.msk [vmem:[#allocation2 + $0x28] sm:$0xff] (!%p580_p9), %vm584_vm0, %v2874_v0 }
 0x119   : > { %591 = vst.msk [vmem:[#allocation2 + $0x30] sm:$0xff] (!%p580_p9), %vm584_vm0, %v2874_v0  ;;  %592 = vst.msk [vmem:[#allocation2 + $0x38] sm:$0xff] (!%p580_p9), %vm584_vm0, %v2874_v0 }
 0x11a   : > { %594 = vst.msk [vmem:[#allocation3] sm:$0xff] (!%p580_p9), %vm593_vm1, %v2874_v0  ;;  %595 = vst.msk [vmem:[#allocation3 + $0x8] sm:$0xff] (!%p580_p9), %vm593_vm1, %v2874_v0 }
 0x11b   : > { %596 = vst.msk [vmem:[#allocation3 + $0x10] sm:$0xff] (!%p580_p9), %vm593_vm1, %v2874_v0  ;;  %597 = vst.msk [vmem:[#allocation3 + $0x18] sm:$0xff] (!%p580_p9), %vm593_vm1, %v2874_v0 }
 0x11c   : > { %598 = vst.msk [vmem:[#allocation3 + $0x20] sm:$0xff] (!%p580_p9), %vm593_vm1, %v2874_v0  ;;  %599 = vst.msk [vmem:[#allocation3 + $0x28] sm:$0xff] (!%p580_p9), %vm593_vm1, %v2874_v0 }
 0x11d   : > { %600 = vst.msk [vmem:[#allocation3 + $0x30] sm:$0xff] %vm593_vm1, %v2874_v0  ;;  %601 = vst.msk [vmem:[#allocation3 + $0x38] sm:$0xff] %vm593_vm1, %v2874_v0 }
 0x11e PF: > { %s3573_s11 = sld [smem:[#allocation27_spill]] }
 0x124   : > { %p2061_p1 = scmp.ne.s32.totalorder %s3573_s11, 0 }
 0x125   : > { %v609_v1 = vld [vmem:[#allocation11] sm:$0xff] (!%p2061_p1)  ;;  %v610_v2 = vld [vmem:[#allocation11 + $0x8] sm:$0xff] (!%p2061_p1)  ;;  %v611_v3 = vld [vmem:[#allocation11 + $0x10] sm:$0xff] (!%p2061_p1)  ;;  %vm620_vm2 = vcmask (!%p2061_p1), 261120   ;;  %s3574_s12 = sld [smem:[#allocation35_spill]] (!%p2061_p1)  ;;  %v2875_v35 = vmov (!%p2061_p1), 1.0  }
 0x126   : > { %604 = sbr.rel (%p2061_p1) target bundleno = 914 (0x392), region = 104  ;;  %v2283_v4 = vpack.c.bf16 (!%p2061_p1), %v610_v2, %v609_v1  ;;  %v612_v5 = vld [vmem:[#allocation11 + $0x18] sm:$0xff] (!%p2061_p1)  ;;  %v605_v6 = vld [vmem:[%s3282_s2] sm:$0xff] (!%p2061_p1)  ;;  %v703_v9 = vld [vmem:[#allocation13 + $0x8] sm:$0xff] (!%p2061_p1)  ;;  %vm844_vm5 = vcmask (!%p2061_p1), 64512   ;;  %vm1273_vm6 = vcmask (!%p2061_p1), 7168  }
 0x127   : > { %v2287_v7 = vpack.c.bf16 (!%p2061_p1), %v612_v5, %v611_v3  ;;  %2171 = vmatprep.mubr.msk.f32.mxu0 (!%p2061_p1), %vm620_vm2, %v605_v6  ;;  %v702_v8 = vld [vmem:[#allocation13] sm:$0xff] (!%p2061_p1)  ;;  %v704_v10 = vld [vmem:[#allocation13 + $0x10] sm:$0xff] (!%p2061_p1)  ;;  %v705_v12 = vld [vmem:[#allocation13 + $0x18] sm:$0xff] (!%p2061_p1) }
 0x128   : > { %2284 = vmatprep.subr.bf16.mxu0 (!%p2061_p1), %v2283_v4  ;;  %v2291_v11 = vpack.c.bf16 (!%p2061_p1), %v703_v9, %v702_v8  ;;  %v607_v13 = vld [vmem:[%s3289_s0] sm:$0xff] (!%p2061_p1)  ;;  %v2295_v14 = vpack.c.bf16 (!%p2061_p1), %v705_v12, %v704_v10  ;;  %v606_v15 = vld [vmem:[%s3282_s2 + $0x8] sm:$0xff] (!%p2061_p1) }
 0x129   : > { %2286 = vmatpush3.bf16.msra.mxu0 (!%p2061_p1), %v2283_v4  ;;  %2182 = vmatprep.mubr.msk.f32.mxu1 (!%p2061_p1), %vm620_vm2, %v607_v13  ;;  %v608_v16 = vld [vmem:[%s3289_s0 + $0x8] sm:$0xff] (!%p2061_p1)  ;;  %v2065_v20 = vld [vmem:[#allocation14] ss:$0 sm:$0xff] (!%p2061_p1)  ;;  %v806_v51 = vld [vmem:[#allocation2 + $0x10] sm:$0xff] (!%p2061_p1) }
 0x12a   : > { %2288 = vmatprep.subr.bf16.mxu0 (!%p2061_p1), %v2287_v7  ;;  %2292 = vmatprep.subr.bf16.mxu1 (!%p2061_p1), %v2291_v11  ;;  %v805_v44 = vld [vmem:[#allocation2 + $0x8] sm:$0xff] (!%p2061_p1)  ;;  %v804_v45 = vld [vmem:[#allocation2] sm:$0xff] (!%p2061_p1)  ;;  %v807_v50 = vld [vmem:[#allocation2 + $0x18] sm:$0xff] (!%p2061_p1) }
 0x12b   : > { %2294 = vmatpush3.bf16.msra.mxu1 (!%p2061_p1), %v2291_v11  ;;  %v2062_v17 = vld [vmem:[%s3574_s12] ss:$0 sm:$0xff] (!%p2061_p1)  ;;  %v1088_v56 = vld [vmem:[#allocation3 + $0x8] sm:$0xff] (!%p2061_p1)  ;;  %v1090_v63 = vld [vmem:[#allocation3 + $0x18] sm:$0xff] (!%p2061_p1) }
 0x12c   : > { %2296 = vmatprep.subr.bf16.mxu1 (!%p2061_p1), %v2295_v14  ;;  %v1087_v57 = vld [vmem:[#allocation3] sm:$0xff] (!%p2061_p1)  ;;  %v809_v62 = vld [vmem:[#allocation2 + $0x28] sm:$0xff] (!%p2061_p1)  ;;  %v1089_v1 = vld [vmem:[#allocation3 + $0x10] sm:$0xff] (!%p2061_p1) }
 0x12d   : > { %2290 = vmatpush3.bf16.msra.mxu0 %v2287_v7  ;;  %v808_v0 = vld [vmem:[#allocation2 + $0x20] sm:$0xff]  ;;  %v811_v10 = vld [vmem:[#allocation2 + $0x38] sm:$0xff]  ;;  %v810_v11 = vld [vmem:[#allocation2 + $0x30] sm:$0xff] }
 0x12f   : > { %2298 = vmatpush3.bf16.msra.mxu1 %v2295_v14 }
 0x130   : > { %2172 = vmatmul.mubr.msk.f32.vlgmr.msra.gmra.mrb[0].mxu0 %vm620_vm2, %v606_v15 }
 0x132   : > { %2183 = vmatmul.mubr.msk.f32.vlgmr.msra.gmra.mrb[0].mxu1 %vm620_vm2, %v608_v16  ;;  %v1092_v16 = vld [vmem:[#allocation3 + $0x28] sm:$0xff] }
 0x203   : > { %v2173_v18 = vpop.f32.mrb[0].mxu0 }
 0x204   : > { %v693_v19 = vpop.f32.mrb[1].mxu0  ;;  %v699_v27 = vadd.f32 %v2173_v18, %v2062_v17 }
 0x205   : > { %v694_v21 = vadd.f32 %v2062_v17, %v693_v19  ;;  %v2184_v22 = vpop.f32.mrb[0].mxu1  ;;  %v1091_v17 = vld [vmem:[#allocation3 + $0x20] sm:$0xff] }
 0x206   : > { %v791_v23 = vadd.f32 %v2184_v22, %v2065_v20  ;;  %v785_v24 = vpop.f32.mrb[1].mxu1  ;;  %v800_v28 = vmul.f32 1.442695, %v699_v27  ;;  %v797_v33 = vadd.f32 1.0, %v699_v27  ;;  %vm795_vm4 = vcmp.gt.f32.partialorder %v699_v27, 0.0  ;;  %v1094_v22 = vld [vmem:[#allocation3 + $0x38] sm:$0xff] }
 0x207   : > { %v798_v25 = vmul.f32 1.442695, %v694_v21  ;;  %v786_v26 = vadd.f32 %v2065_v20, %v785_v24  ;;  %v796_v29 = vadd.f32 1.0, %v694_v21  ;;  %vm794_vm3 = vcmp.gt.f32.partialorder %v694_v21, 0.0 }
 0x208   : > { %2193 = vmatprep.subr.mxu1 %v791_v23 }
 0x209   : > { %2510 = vpow2.f32 %v798_v25  ;;  %2185 = vmatprep.subr.mxu0 %v786_v26  ;;  %2194 = vmatpush3.msra.mxu1 %v791_v23  ;;  %v1093_v23 = vld [vmem:[#allocation3 + $0x30] sm:$0xff] }
 0x20a   : > { %2186 = vmatpush3.msra.mxu0 %v786_v26  ;;  %2512 = vpow2.f32 %v800_v28  ;;  %2209 = vmatprep.subr.mxu1 %v2875_v35 }
 0x20b   : > { %2201 = vmatprep.subr.mxu0 %v2875_v35 }
 0x213   : > { %v2511_v30 = vpop.eup %2510 }
 0x214   : > { %v802_v31 = vsel %vm794_vm3, %v796_v29, %v2511_v30  ;;  %v2513_v32 = vpop.eup %2512 }
 0x215   : > { %812 = vxpose.xlu0.b32.start.end [1/1] (short) (narrow) %v802_v31, 32  ;;  %v803_v34 = vsel %vm795_vm4, %v797_v33, %v2513_v32 }
 0x222   : > { %942 = vxpose.xlu0.b32.start.end [1/1] (short) (narrow) %v803_v34, 32 }
 0x295   : > { %v828_v36 = vpop.trf.xlu0 }
 0x296   : > { %2187 = vmatprep.mubr.msk.f32.mxu0 %vm844_vm5, %v828_v36 }
 0x299   : > { %v829_v37 = vpop.trf.xlu0 }
 0x29a   : > { %2188 = vmatmul.mubr.msk.f32.vlgmr.msra.gmra.mrb[2].mxu0 %vm844_vm5, %v829_v37 }
 0x29b   : > { %2202 = vmatpush3.msra.mxu0 %v2875_v35 }
 0x29d   : > { %v830_v38 = vpop.trf.xlu0 }
 0x29e   : > { %2190 = vmatprep.mubr.msk.f32.mxu0 %vm844_vm5, %v830_v38 }
 0x2a1   : > { %v831_v39 = vpop.trf.xlu0 }
 0x2a2   : > { %2191 = vmatmul.mubr.msk.f32.gmra.mrb[4].mxu0 %vm844_vm5, %v831_v39 }
 0x2a3   : > { %2203 = vmatprep.mubr.msk.f32.mxu0 %vm844_vm5, %v828_v36 }
 0x2a5   : > { %v958_v40 = vpop.trf.xlu0 }
 0x2a6   : > { %2195 = vmatprep.mubr.msk.f32.mxu1 %vm844_vm5, %v958_v40  ;;  %2204 = vmatmul.mubr.msk.f32.vlgmr.msra.gmra.mrb[6].mxu0 %vm844_vm5, %v829_v37 }
 0x2a7   : > { %2206 = vmatprep.mubr.msk.f32.mxu0 %vm844_vm5, %v830_v38 }
 0x2a9   : > { %v959_v41 = vpop.trf.xlu0 }
 0x2aa   : > { %2196 = vmatmul.mubr.msk.f32.vlgmr.msra.gmra.mrb[2].mxu1 %vm844_vm5, %v959_v41  ;;  %2207 = vmatmul.mubr.msk.f32.gmra.mrb[8].mxu0 %vm844_vm5, %v831_v39 }
 0x2ab   : > { %2210 = vmatpush3.msra.mxu1 %v2875_v35 }
 0x2ad   : > { %v960_v42 = vpop.trf.xlu0 }
 0x2ae   : > { %2198 = vmatprep.mubr.msk.f32.mxu1 %vm844_vm5, %v960_v42 }
 0x2b1   : > { %v961_v43 = vpop.trf.xlu0 }
 0x2b2   : > { %2199 = vmatmul.mubr.msk.f32.gmra.mrb[4].mxu1 %vm844_vm5, %v961_v43 }
 0x2b3   : > { %2211 = vmatprep.mubr.msk.f32.mxu1 %vm844_vm5, %v958_v40 }
 0x2b6   : > { %2212 = vmatmul.mubr.msk.f32.vlgmr.msra.gmra.mrb[6].mxu1 %vm844_vm5, %v959_v41 }
 0x2b7   : > { %2214 = vmatprep.mubr.msk.f32.mxu1 %vm844_vm5, %v960_v42 }
 0x2ba   : > { %2215 = vmatmul.mubr.msk.f32.gmra.mrb[8].mxu1 %vm844_vm5, %v961_v43 }
 0x36d   : > { %v2189_v46 = vpop.f32.mrb[2].mxu0 }
 0x36e   : > { %v1072_v47 = vadd.f32 %v2189_v46, %v805_v44  ;;  %v923_v48 = vpop.f32.mrb[3].mxu0 }
 0x36f   : > { %v1071_v49 = vadd.f32 %v923_v48, %v804_v45 }
 0x370   : > { %1080 = vst.msk [vmem:[#allocation2 + $0x8] sm:$0xff] %vm620_vm2, %v1072_v47 }
 0x371   : > { %1079 = vst.msk [vmem:[#allocation2] sm:$0xff] %vm620_vm2, %v1071_v49 }
 0x375   : > { %v2192_v52 = vpop.f32.mrb[4].mxu0 }
 0x376   : > { %v1074_v53 = vadd.f32 %v2192_v52, %v807_v50  ;;  %v933_v54 = vpop.f32.mrb[5].mxu0 }
 0x377   : > { %v1073_v55 = vadd.f32 %v933_v54, %v806_v51 }
 0x378   : > { %1082 = vst.msk [vmem:[#allocation2 + $0x18] sm:$0xff] %vm620_vm2, %v1074_v53 }
 0x379   : > { %1081 = vst.msk [vmem:[#allocation2 + $0x10] sm:$0xff] %vm620_vm2, %v1073_v55  ;;  %v2205_v58 = vpop.f32.mrb[6].mxu0 }
 0x37a   : > { %v1266_v59 = vadd.f32 %v2205_v58, %v1088_v56  ;;  %v1161_v60 = vpop.f32.mrb[7].mxu0 }
 0x37b   : > { %v1265_v61 = vadd.f32 %v1161_v60, %v1087_v57 }
 0x37c   : > { %1275 = vst.msk [vmem:[#allocation3 + $0x8] sm:$0xff] %vm1273_vm6, %v1266_v59 }
 0x37d   : > { %1274 = vst.msk [vmem:[#allocation3] sm:$0xff] %vm1273_vm6, %v1265_v61  ;;  %v2197_v2 = vpop.f32.mrb[2].mxu1  ;;  %v2208_v3 = vpop.f32.mrb[8].mxu0 }
 0x37e   : > { %v1076_v4 = vadd.f32 %v2197_v2, %v809_v62  ;;  %v1268_v5 = vadd.f32 %v2208_v3, %v1090_v63  ;;  %v1052_v6 = vpop.f32.mrb[3].mxu1  ;;  %v1171_v7 = vpop.f32.mrb[9].mxu0 }
 0x37f   : > { %v1075_v8 = vadd.f32 %v1052_v6, %v808_v0  ;;  %v1267_v9 = vadd.f32 %v1171_v7, %v1089_v1 }
 0x380   : > { %1084 = vst.msk [vmem:[#allocation2 + $0x28] sm:$0xff] %vm620_vm2, %v1076_v4 }
 0x381   : > { %1277 = vst.msk [vmem:[#allocation3 + $0x18] sm:$0xff] %vm1273_vm6, %v1268_v5  ;;  %1276 = vst.msk [vmem:[#allocation3 + $0x10] sm:$0xff] %vm1273_vm6, %v1267_v9 }
 0x382   : > { %1083 = vst.msk [vmem:[#allocation2 + $0x20] sm:$0xff] %vm620_vm2, %v1075_v8 }
 0x385   : > { %v2200_v12 = vpop.f32.mrb[4].mxu1 }
 0x386   : > { %v1078_v13 = vadd.f32 %v2200_v12, %v811_v10  ;;  %v1062_v14 = vpop.f32.mrb[5].mxu1 }
 0x387   : > { %v1077_v15 = vadd.f32 %v1062_v14, %v810_v11 }
 0x388   : > { %1086 = vst.msk [vmem:[#allocation2 + $0x38] sm:$0xff] %vm620_vm2, %v1078_v13 }
 0x389   : > { %1085 = vst.msk [vmem:[#allocation2 + $0x30] sm:$0xff] %vm620_vm2, %v1077_v15  ;;  %v2213_v18 = vpop.f32.mrb[6].mxu1 }
 0x38a   : > { %v1270_v19 = vadd.f32 %v2213_v18, %v1092_v16  ;;  %v1246_v20 = vpop.f32.mrb[7].mxu1 }
 0x38b   : > { %v1269_v21 = vadd.f32 %v1246_v20, %v1091_v17 }
 0x38c   : > { %1279 = vst.msk [vmem:[#allocation3 + $0x28] sm:$0xff] %vm1273_vm6, %v1270_v19 }
 0x38d   : > { %1278 = vst.msk [vmem:[#allocation3 + $0x20] sm:$0xff] %vm1273_vm6, %v1269_v21  ;;  %v2216_v24 = vpop.f32.mrb[8].mxu1 }
 0x38e   : > { %v1272_v25 = vadd.f32 %v2216_v24, %v1094_v22  ;;  %v1256_v26 = vpop.f32.mrb[9].mxu1 }
 0x38f   : > { %v1271_v27 = vadd.f32 %v1256_v26, %v1093_v23 }
 0x390   : > { %1281 = vst.msk [vmem:[#allocation3 + $0x38] sm:$0xff] %vm1273_vm6, %v1272_v25 }
 0x391   : > { %1280 = vst.msk [vmem:[#allocation3 + $0x30] sm:$0xff] %vm1273_vm6, %v1271_v27 }
 0x392 PF: > { %s3575_s23 = sld [smem:[#allocation27_spill]] }
 0x398   : > { %p2084_p6 = scmp.ne.s32.totalorder %s3575_s23, 1 }
 0x399   : > { %v1288_v28 = vld [vmem:[#allocation10] sm:$0xff] (!%p2084_p6)  ;;  %v1289_v29 = vld [vmem:[#allocation10 + $0x8] sm:$0xff] (!%p2084_p6)  ;;  %v1290_v30 = vld [vmem:[#allocation10 + $0x10] sm:$0xff] (!%p2084_p6)  ;;  %vm1299_vm7 = vcmask (!%p2084_p6), 261120   ;;  %v2876_v34 = vmov (!%p2084_p6), 0   ;;  %v2877_v61 = vmov (!%p2084_p6), 0.0|0.0  }
 0x39a   : > { %1285 = sbr.rel (%p2084_p6) target bundleno = 1617 (0x651), region = 108  ;;  %v2299_v31 = vpack.c.bf16 (!%p2084_p6), %v1289_v29, %v1288_v28  ;;  %v1291_v32 = vld [vmem:[#allocation10 + $0x18] sm:$0xff] (!%p2084_p6)  ;;  %v1286_v33 = vld [vmem:[%s3282_s2] sm:$0xff] (!%p2084_p6)  ;;  %2515 = vset.pattern.permute.xlu1 (!%p2084_p6), %v2876_v34  ;;  %2514 = vset.pattern.permute.xlu0 (!%p2084_p6), %v2876_v34  ;;  %v1416_v38 = vld [vmem:[#allocation3 + $0x28] sm:$0xff] (!%p2084_p6)  ;;  %vm2878_vm8 = vmmov (!%p2084_p6), 0   ;;  %v2879_v4 = vmov (!%p2084_p6), 0.0  }
 0x39b   : > { %v2303_v35 = vpack.c.bf16 (!%p2084_p6), %v1291_v32, %v1290_v30  ;;  %2225 = vmatprep.mubr.msk.f32.mxu0 (!%p2084_p6), %vm1299_vm7, %v1286_v33  ;;  %v1415_v36 = vld [vmem:[#allocation3 + $0x20] sm:$0xff] (!%p2084_p6)  ;;  %v1412_v39 = vld [vmem:[#allocation3 + $0x8] sm:$0xff] (!%p2084_p6)  ;;  %v1414_v41 = vld [vmem:[#allocation3 + $0x18] sm:$0xff] (!%p2084_p6)  ;;  %2307 = vmatprep.subr.bf16.mxu1 (!%p2084_p6), %v2877_v61  ;;  %s3576_s22 = sld [smem:[#allocation33_spill]] (!%p2084_p6)  ;;  %s3577_s16 = sld [smem:[#allocation38_spill]] (!%p2084_p6) }
 0x39c   : > { %v1411_v37 = vld [vmem:[#allocation3] sm:$0xff] (!%p2084_p6)  ;;  %2300 = vmatprep.subr.bf16.mxu0 (!%p2084_p6), %v2299_v31  ;;  %1441 = vperm.xlu1 (!%p2084_p6), %2515, %v1415_v36   ;;  %v1287_v40 = vld [vmem:[%s3282_s2 + $0x8] sm:$0xff] (!%p2084_p6)  ;;  %v1413_v42 = vld [vmem:[#allocation3 + $0x10] sm:$0xff] (!%p2084_p6)  ;;  %s1851_s4 = sld [smem:[#allocation4]] (!%p2084_p6) }
 0x39d   : > { %2302 = vmatpush3.bf16.msra.mxu0 (!%p2084_p6), %v2299_v31  ;;  %1421 = vperm.xlu0 (!%p2084_p6), %2514, %v1411_v37   ;;  %v1418_v43 = vld [vmem:[#allocation3 + $0x38] sm:$0xff] (!%p2084_p6)  ;;  %v1417_v44 = vld [vmem:[#allocation3 + $0x30] sm:$0xff] (!%p2084_p6)  ;;  %v3371_v45 = vld [vmem:[#allocation16] sm:$0xff] (!%p2084_p6)  ;;  %s3578_s23 = sld [smem:[#allocation39_spill]] (!%p2084_p6) }
 0x39e   : > { %2304 = vmatprep.subr.bf16.mxu0 (!%p2084_p6), %v2303_v35  ;;  %v1399_v46 = vld [vmem:[#allocation2 + $0x20] sm:$0xff] (!%p2084_p6)  ;;  %v3373_v47 = vld [vmem:[#allocation16 + $0x8] sm:$0xff] (!%p2084_p6)  ;;  %v1402_v54 = vld [vmem:[#allocation2 + $0x38] sm:$0xff] (!%p2084_p6)  ;;  %2236 = vmatprep.mubr.msk.f32.mxu1 (!%p2084_p6), %vm2878_vm8, %v2879_v4 }
 0x39f   : > { %v1400_v48 = vld [vmem:[#allocation2 + $0x28] sm:$0xff] (!%p2084_p6)  ;;  %v1407_v49 = vmul.f32 (!%p2084_p6), %v1399_v46, %v3371_v45  ;;  %v1395_v51 = vld [vmem:[#allocation2] sm:$0xff] (!%p2084_p6)  ;;  %v1393_v55 = vld [vmem:[#allocation16 + $0x10] sm:$0xff] (!%p2084_p6) }
 0x3a0   : > { %1446 = vperm.xlu1 (!%p2084_p6), %2515, %v1416_v38   ;;  %v1408_v50 = vmul.f32 (!%p2084_p6), %v1400_v48, %v3373_v47  ;;  %v1396_v52 = vld [vmem:[#allocation2 + $0x8] sm:$0xff] (!%p2084_p6)  ;;  %v1394_v53 = vld [vmem:[#allocation16 + $0x18] sm:$0xff] (!%p2084_p6)  ;;  %v1403_v57 = vmul.f32 (!%p2084_p6), %v1395_v51, %v3371_v45  ;;  %v1401_v60 = vld [vmem:[#allocation2 + $0x30] sm:$0xff] (!%p2084_p6) }
 0x3a1   : > { %2306 = vmatpush3.bf16.msra.mxu0 %v2303_v35  ;;  %1426 = vperm.xlu0 %2514, %v1412_v39   ;;  %v1404_v58 = vmul.f32 %v1396_v52, %v3373_v47  ;;  %v1410_v59 = vmul.f32 %v1402_v54, %v1394_v53  ;;  %v1397_v62 = vld [vmem:[#allocation2 + $0x10] sm:$0xff]  ;;  %v1398_v63 = vld [vmem:[#allocation2 + $0x18] sm:$0xff]  ;;  %v1409_v0 = vmul.f32 %v1401_v60, %v1393_v55  ;;  %v2085_v21 = vld [vmem:[%s3576_s22] ss:$0 sm:$0xff] }
 0x3a2   : > { %v2314_v56 = vpack.c.bf16 %v1408_v50, %v1407_v49  ;;  %2313 = vmatprep.subr.bf16.mxu0 %v2877_v61  ;;  %v1405_v2 = vmul.f32 %v1397_v62, %v1393_v55  ;;  %v1406_v3 = vmul.f32 %v1398_v63, %v1394_v53  ;;  %v1852_v62 = vstv %s1851_s4 }
 0x3a3   : > { %v2308_v1 = vpack.c.bf16 %v1404_v58, %v1403_v57  ;;  %v2317_v5 = vpack.c.bf16 %v1410_v59, %v1409_v0  ;;  %v2092_v60 = vld [vmem:[%s3578_s23] ss:$0 sm:$0xff] }
 0x3a4   : > { %2226 = vmatmul.mubr.msk.f32.vlgmr.msra.gmra.mrb[0].mxu0 %vm1299_vm7, %v1287_v40  ;;  %1436 = vperm.xlu1 %2515, %v1414_v41   ;;  %v2311_v6 = vpack.c.bf16 %v1406_v3, %v1405_v2  ;;  %v1757_v40 = vld [vmem:[%s3577_s16] sm:$0xff]  ;;  %v1758_v41 = vld [vmem:[%s3577_s16 + $0x8] sm:$0xff] }
 0x3a5   : > { %1431 = vperm.xlu0 %2514, %v1413_v42   ;;  %2315 = vmatpush3.bf16.msra.mxu0 %v2314_v56  ;;  %v1759_v42 = vld [vmem:[%s3577_s16 + $0x10] sm:$0xff] }
 0x3a6   : > { %2316 = vmatprep.subr.bf16.mxu0 %v2877_v61  ;;  %2247 = vmatprep.mubr.msk.f32.mxu0 %vm2878_vm8, %v2879_v4 }
 0x3a7   : > { %2309 = vmatpush3.bf16.msra.mxu1 %v2308_v1  ;;  %v1850_v1 = vld [vmem:[%s3289_s0 + $0x8] sm:$0xff] }
 0x3a8   : > { %1456 = vperm.xlu1 %2515, %v1418_v43   ;;  %2310 = vmatprep.subr.bf16.mxu1 %v2877_v61  ;;  %v2331_v43 = vpack.c.bf16 %v1758_v41, %v1757_v40 }
 0x3a9   : > { %1451 = vperm.xlu0 %2514, %v1417_v44   ;;  %2318 = vmatpush3.bf16.msra.mxu0 %v2317_v5  ;;  %v1760_v44 = vld [vmem:[%s3577_s16 + $0x18] sm:$0xff] }
 0x3aa   : > { %2325 = vmatprep.subr.bf16.mxu0 %v2877_v61 }
 0x3ab   : > { %2312 = vmatpush3.bf16.msra.mxu1 %v2311_v6 }
 0x3ac   : > { %2319 = vmatprep.subr.bf16.mxu1 %v2877_v61 }
 0x41b   : > { %v1442_v7 = vpop.permute.xlu1 %1441 }
 0x41c   : > { %v1422_v8 = vpop.permute.xlu0 %1421  ;;  %v1463_v28 = vmul.f32 %v1442_v7, %v3371_v45 }
 0x41d   : > { %v1459_v30 = vmul.f32 %v1422_v8, %v3371_v45  ;;  %v2335_v45 = vpack.c.bf16 %v1760_v44, %v1759_v42 }
 0x41f   : > { %v1447_v9 = vpop.permute.xlu1 %1446 }
 0x420   : > { %v1427_v10 = vpop.permute.xlu0 %1426  ;;  %v1464_v29 = vmul.f32 %v1447_v9, %v3373_v47 }
 0x421   : > { %v1460_v31 = vmul.f32 %v1427_v10, %v3373_v47 }
 0x422   : > { %v2326_v36 = vpack.c.bf16 %v1464_v29, %v1463_v28 }
 0x423   : > { %v1437_v11 = vpop.permute.xlu1 %1436  ;;  %v2320_v38 = vpack.c.bf16 %v1460_v31, %v1459_v30 }
 0x424   : > { %v1462_v12 = vmul.f32 %v1437_v11, %v1394_v53  ;;  %v1432_v13 = vpop.permute.xlu0 %1431 }
 0x425   : > { %v1461_v14 = vmul.f32 %v1432_v13, %v1393_v55 }
 0x427   : > { %v2323_v15 = vpack.c.bf16 %v1462_v12, %v1461_v14  ;;  %v1457_v16 = vpop.permute.xlu1 %1456 }
 0x428   : > { %v1466_v17 = vmul.f32 %v1457_v16, %v1394_v53  ;;  %v1452_v18 = vpop.permute.xlu0 %1451 }
 0x429   : > { %v1465_v19 = vmul.f32 %v1452_v18, %v1393_v55 }
 0x42b   : > { %v2329_v20 = vpack.c.bf16 %v1466_v17, %v1465_v19 }
 0x477   : > { %v2227_v22 = vpop.f32.mrb[0].mxu0 }
 0x478   : > { %v1378_v23 = vadd.f32 %v2227_v22, %v2085_v21  ;;  %v1372_v24 = vpop.f32.mrb[1].mxu0 }
 0x479   : > { %v1373_v25 = vadd.f32 %v2085_v21, %v1372_v24 }
 0x47a   : > { %v1387_v26 = vmul.f32 1.442695, %v1378_v23  ;;  %v1384_v32 = vadd.f32 1.0, %v1378_v23  ;;  %vm1382_vm9 = vcmp.gt.f32.partialorder %v1378_v23, 0.0 }
 0x47b   : > { %v1385_v27 = vmul.f32 1.442695, %v1373_v25  ;;  %v1383_v34 = vadd.f32 1.0, %v1373_v25  ;;  %vm1381_vm10 = vcmp.gt.f32.partialorder %v1373_v25, 0.0 }
 0x47c   : > { %2516 = vpow2.f32 %v1387_v26 }
 0x47d   : > { %2518 = vpow2.f32 %v1385_v27 }
 0x486   : > { %v2517_v33 = vpop.eup %2516 }
 0x487   : > { %v2519_v35 = vpop.eup %2518  ;;  %v1390_v37 = vsel %vm1382_vm9, %v1384_v32, %v2517_v33 }
 0x488   : > { %2248 = vmatmul.mubr.msk.f32.vlgmr.msra.gmra.mrb[2].mxu0 %vm1299_vm7, %v1390_v37  ;;  %v1389_v39 = vsel %vm1381_vm10, %v1383_v34, %v2519_v35 }
 0x489   : > { %2327 = vmatpush3.bf16.msra.mxu0 %v2326_v36  ;;  %2237 = vmatmul.mubr.msk.f32.vlgmr.msra.gmra.mrb[0].mxu1 %vm1299_vm7, %v1389_v39 }
 0x48a   : > { %2321 = vmatpush3.bf16.msra.mxu1 %v2320_v38  ;;  %2328 = vmatprep.subr.bf16.mxu0 %v2877_v61 }
 0x48b   : > { %2322 = vmatprep.subr.bf16.mxu1 %v2877_v61  ;;  %2269 = vmatprep.mubr.msk.f32.mxu0 %vm2878_vm8, %v2879_v4 }
 0x48c   : > { %2258 = vmatprep.mubr.msk.f32.mxu1 %vm2878_vm8, %v2879_v4  ;;  %v1849_v4 = vld [vmem:[%s3289_s0] sm:$0xff] }
 0x48d   : > { %2330 = vmatpush3.bf16.msra.mxu0 %v2329_v20 }
 0x48e   : > { %2324 = vmatpush3.bf16.msra.mxu1 %v2323_v15 }
 0x48f   : > { %2332 = vmatprep.subr.bf16.mxu1 %v2331_v43 }
 0x490   : > { %2270 = vmatmul.mubr.msk.f32.vlgmr.msra.gmra.mrb[4].mxu0 %vm1299_vm7, %v1390_v37 }
 0x491   : > { %2259 = vmatmul.mubr.msk.f32.vlgmr.msra.gmra.mrb[2].mxu1 %vm1299_vm7, %v1389_v39 }
 0x492   : > { %2334 = vmatpush3.bf16.msra.mxu1 %v2331_v43 }
 0x493   : > { %2336 = vmatprep.subr.bf16.mxu1 %v2335_v45 }
 0x496   : > { %2338 = vmatpush3.bf16.msra.mxu1 %v2335_v45 }
 0x55b   : > { %v1609_v46 = vpop.f32.mrb[2].mxu0 }
 0x55c   : > { %v1536_v47 = vpop.f32.mrb[0].mxu1  ;;  %v2249_v48 = vpop.f32.mrb[3].mxu0 }
 0x55d   : > { %v2238_v49 = vpop.f32.mrb[1].mxu1 }
 0x563   : > { %v1749_v50 = vpop.f32.mrb[4].mxu0 }
 0x564   : > { %v1750_v51 = vadd.f32 1e-06, %v1749_v50  ;;  %v1679_v52 = vpop.f32.mrb[2].mxu1  ;;  %v2271_v53 = vpop.f32.mrb[5].mxu0 }
 0x565   : > { %v1680_v54 = vadd.f32 1e-06, %v1679_v52  ;;  %v2260_v55 = vpop.f32.mrb[3].mxu1 }
 0x566   : > { %2520 = vrcp.f32 %v1750_v51 }
 0x567   : > { %2522 = vrcp.f32 %v1680_v54 }
 0x570   : > { %v2521_v56 = vpop.eup %2520 }
 0x571   : > { %v2523_v57 = vpop.eup %2522  ;;  %v1756_v58 = vmul.f32 %v2521_v56, %v1609_v46 }
 0x572   : > { %v1755_v59 = vmul.f32 %v2523_v57, %v1536_v47 }
 0x574   : > { %2280 = vmatprep.mubr.msk.f32.mxu1 %vm1299_vm7, %v1755_v59 }
 0x575   : > { %2281 = vmatmul.mubr.msk.f32.vlgmr.msra.gmra.mrb[4].mxu1 %vm1299_vm7, %v1756_v58 }
 0x648   : > { %v2282_v61 = vpop.f32.mrb[4].mxu1 }
 0x649   : > { %v1846_v63 = vadd.f32 %v2282_v61, %v2092_v60  ;;  %v1840_v0 = vpop.f32.mrb[5].mxu1 }
 0x64a   : > { %v1841_v2 = vadd.f32 %v2092_v60, %v1840_v0 }
 0x64b   : > { %v1854_v3 = vmul.f32 %v1852_v62, %v1846_v63 }
 0x64c   : > { %v1853_v5 = vmul.f32 %v1852_v62, %v1841_v2 }
 0x64d   : > { %v1856_v6 = vadd.f32 %v1854_v3, %v1850_v1 }
 0x64e   : > { %v1855_v7 = vadd.f32 %v1853_v5, %v1849_v4 }
 0x64f   : > { %1858 = vst.msk [vmem:[%s3312_s29 + $0x8] sm:$0xff] %vm1299_vm7, %v1856_v6 }
 0x650   : > { %1857 = vst.msk [vmem:[%s3312_s29] sm:$0xff] %vm1299_vm7, %v1855_v7 }
 0x651 PF: > { %s3579_s7 = sld [smem:[#allocation27_spill]]  ;;  %s3580_s9 = sld [smem:[#allocation26_spill]] }
 0x652   : > { %s3582_s2 = sld [smem:[#allocation29_spill]]  ;;  %s1876_s8 = sshll.u32 %s3312_s29, 4  ;;  %s3428_s8 = int_to_ptr.vmem [resolvable:$true] %s1876_s8 }
 0x653   : > { %s3583_s20 = sld [smem:[#allocation40_spill]]  ;;  %s3437_s11 = scalar_lea.sflag [#allocation7], %s571_s5 }
 0x654   : > { %s2724_s4 = scalar_lea.vmem %s3428_s8, 256  ;;  %s2880_s29 = smov [#allocation17]  }
 0x655   : > { %p2725_p13 = scmp.ne.s32.totalorder %s3428_s8, %s2724_s4  ;;  %s2728_s18 = sshll.u32 %s2880_s29, 4  ;;  %s2729_s18 = int_to_ptr.vmem [resolvable:$false] %s2728_s18 }
 0x656   : > { %s2730_s12 = scalar_lea.vmem %s2729_s18, 512  ;;  %p2731_p10 = scmp.lt.s32.totalorder %s3428_s8, %s2729_s18 }
 0x657   : > { %s1867_s15 = smul.u32 %s3580_s9, %s3579_s7  ;;  %p2732_p11 = scmp.lt.s32.totalorder %s2730_s12, %s2724_s4 }
 0x658   : > { %p3584_p7 = scmp.ne.s32.totalorder %s3582_s2, 0 }
 0x659   : > { %s2096_s6 = sshll.u32 %s1867_s15, 7  ;;  %p2733_p0 = por %p2732_p11, %p2731_p10 }
 0x65a   : > { %s3433_s3 = scalar_lea.hbm %s3583_s20, %s2096_s6  ;;  %p2726_p4 = pnand %p2725_p13, %p3584_p7 }
 0x65c   : > { %p2727_p3 = pneg %p2726_p4 }
 0x65e   : > { %p2734_p5 = pnand %p2733_p0, %p2727_p3 }
 0x660   : > { %2737 = shalt.err (!%p2734_p5)
}
 0x661   : > { %s2738_s5 = scalar_lea.hbm %s3433_s3, 256  ;;  %s2742_s9 = scalar_lea.hbm %s3583_s20, 512 }
 0x662   : > { %p2739_p8 = scmp.ne.s32.totalorder %s3433_s3, %s2738_s5  ;;  %p2743_p9 = scmp.lt.u32.totalorder %s3433_s3, %s3583_s20 }
 0x663   : > { %p2744_p1 = scmp.lt.u32.totalorder %s2742_s9, %s2738_s5  ;;  %p2746_p13 = scmp.lt.u32.totalorder %s2738_s5, %s3433_s3 }
 0x664   : > { %p2740_p12 = pnand %p2739_p8, %p3584_p7 }
 0x665   : > { %p2745_p6 = por %p2744_p1, %p2743_p9 }
 0x666   : > { %p2741_p2 = pneg %p2740_p12 }
 0x667   : > { %p2747_p4 = por %p2746_p13, %p2745_p6 }
 0x669   : > { %p2748_p3 = pnand %p2747_p4, %p2741_p2 }
 0x66b   : > { %2751 = shalt.err (!%p2748_p3)
}
 0x66c   : > { %s2881_s6 = smov 128   ;;  %s2882_s17 = smov 256  }
 0x66d   : > { %s2883_s0 = smov 8  }
 0x66e   : > { %2363 = dma.vmem_to_hbm [thread:$0]  (%p3584_p7), %s3428_s8, 256, %s3433_s3, %s3437_s11, %s2881_s6, %s2882_s17, %s2883_s0  }
 0x66f PF: > { %s3585_s4 = sld [smem:[#allocation24_spill]]  ;;  %s3586_s29 = sld [smem:[#allocation30_spill]] }
 0x670   : > { %p2403_p10 = scmp.ge.s32.totalorder %s2862_s14, 2 }
 0x675   : > { %s1891_s18 = sand.u32 1, %s3585_s4   ;;  %p3587_p11 = scmp.ne.s32.totalorder %s3586_s29, 0 }
 0x676   : > { %s1892_s12 = scalar_lea.sflag [#allocation7], %s1891_s18 }
 0x677   : > { %p2389_p0 = pnand %p2403_p10, %p3587_p11 }
 0x679   : > { %2817 = dma.done.wait (!%p2389_p0), %s1892_s12, 256  }
 0x67a   : > { %2819 = vsyncadd (!%p2389_p0), %s1892_s12, 4294967040  ;;  %s34_s14 = sadd.s32 1, %s2862_s14   ;;  %s3588_s23 = sld [smem:[#allocation25_spill]] }
 0x67b   : > { %p31_p5 = scmp.ge.s32.totalorder %s34_s14, 6   ;;  %s3589_s5 = smov %s3197_s24 }
 0x67c   : > { %s3590_s2 = smov %s3601_s26  ;;  %s3591_s24 = smov %s2830_s25 }
 0x67d   : > { %s3592_s25 = smov %s3589_s5  ;;  %s3593_s26 = smov %s2838_s27 }
 0x67e   : > { %s3594_s27 = smov %s2842_s28  ;;  %s3595_s28 = smov %s3180_s19 }
 0x67f   : > { %s3596_s11 = smov %s2854_s30  ;;  %s3597_s29 = smov %s2858_s13 }
 0x680   : > { %s3598_s30 = smov %s3590_s2  ;;  %s3599_s13 = smov %s3605_s21 }
 0x681   :  { %33 = sbr.rel (!%p31_p5) target bundleno = 25 (0x19), region = 158 }
 0x688   :  { %1897 = vsyncpa [#allocation6], 1 }
 0x689   :  { %1899 = vsyncpa [#allocation6 + $0x1], 1 }
 0x68a   :  { %1900 = vsyncpa [#allocation9], 1 }
 0x68b   :  { %1902 = vsyncpa [#allocation9 + $0x1], 1 }
 0x68c   :  { %1903 = vsyncpa [#allocation12], 1 }
 0x68d   :  { %1904 = vsyncpa [#allocation15], 1 }
 0x68e   :  { %1905 = vsyncpa [#allocation7], 1 }
 0x68f   :  { %1907 = vsyncpa [#allocation7 + $0x1], 1 }

// kernel: tpu_custom_call.1
= control target key start
LH: loop header
LB: loop body
LE: loop exit
PB: predicated region body
PF: predicated region fallthrough
CT: control target
= control target key end

     0   :  { %s3498_s0 = inlined_call_operand.hbm [shape: f32[2,16,32], index: 0, kind: input, shape index: {}]   ;;  %s3499_s1 = inlined_call_operand.hbm [shape: f32[2,16,32], index: 1, kind: input, shape index: {}]   ;;  %s3500_s2 = inlined_call_operand.hbm [shape: f32[32,32], index: 2, kind: input, shape index: {}]   ;;  %s3501_s3 = inlined_call_operand.vmem [shape: f32[1,32], index: 3, kind: input, shape index: {}]   ;;  %s3502_s4 = inlined_call_operand.hbm [shape: f32[32,32], index: 4, kind: input, shape index: {}]   ;;  %s3503_s5 = inlined_call_operand.vmem [shape: f32[1,32], index: 5, kind: input, shape index: {}]   ;;  %s3504_s6 = inlined_call_operand.hbm [shape: f32[32,32], index: 6, kind: input, shape index: {}]   ;;  %s3505_s7 = inlined_call_operand.hbm [shape: f32[1,32], index: 7, kind: input, shape index: {}]   ;;  %s3506_s8 = inlined_call_operand.vmem [shape: f32[32,32], index: 8, kind: input, shape index: {}]   ;;  %s3507_s9 = inlined_call_operand.vmem [shape: f32[1,32], index: 9, kind: input, shape index: {}]   ;;  %s3508_s10 = inlined_call_operand.hbm [shape: f32[32,32], index: 10, kind: input, shape index: {}]   ;;  %s3509_s11 = inlined_call_operand.<no memory space> [shape: f32[1], index: 11, kind: input, shape index: {}]   ;;  %s3510_s12 = inlined_call_operand.hbm [shape: f32[2,16,32], index: 12, kind: output, shape index: {}]  }
   0x1   :  { %3529 = sst [smem:[#allocation31_spill]] %s3498_s0 }
   0x2   :  { %3530 = sst [smem:[#allocation32_spill]] %s3500_s2 }
   0x3   :  { %3531 = sst [smem:[#allocation33_spill]] %s3501_s3 }
   0x4   :  { %3532 = sst [smem:[#allocation34_spill]] %s3502_s4 }
   0x5   :  { %3533 = sst [smem:[#allocation35_spill]] %s3503_s5 }
   0x6   :  { %3534 = sst [smem:[#allocation36_spill]] %s3504_s6 }
   0x7   :  { %3535 = sst [smem:[#allocation37_spill]] %s3505_s7 }
   0x8   :  { %3536 = sst [smem:[#allocation38_spill]] %s3506_s8 }
   0x9   :  { %3537 = sst [smem:[#allocation39_spill]] %s3507_s9 }
   0xa   :  { %3538 = sst [smem:[#allocation40_spill]] %s3510_s12 }
   0xb   :  { %17 = sst [smem:[#allocation4]] %s3509_s11 }
   0xc   :  { %18 = vsyncpa [#allocation6], 0 }
   0xd   :  { %20 = vsyncpa [#allocation6 + $0x1], 0 }
   0xe   :  { %21 = vsyncpa [#allocation9], 0 }
   0xf   :  { %23 = vsyncpa [#allocation9 + $0x1], 0 }
  0x10   :  { %24 = vsyncpa [#allocation12], 0 }
  0x11   :  { %25 = vsyncpa [#allocation15], 0 }
  0x12   :  { %26 = vsyncpa [#allocation7], 0 }
  0x13   :  { %28 = vsyncpa [#allocation7 + $0x1], 0  ;;  %s2952_s23 = smov 0   ;;  %s2954_s24 = smov 0  }
  0x14   :  { %s2956_s25 = smov 0   ;;  %s2958_s26 = smov 0  }
  0x15   :  { %s2960_s27 = smov 0   ;;  %s2962_s28 = smov 0  }
  0x16   :  { %s2964_s11 = smov 0   ;;  %s2966_s29 = smov 0  }
  0x17   :  { %s2968_s30 = smov 0   ;;  %s2970_s13 = smov 0  }
  0x18   :  { %s2972_s14 = smov 0  }
  0x19 LB: > { %3539 = sst [smem:[#allocation24_spill]] %s2822_s23  ;;  %s3006_s15 = sadd.s32 4294967295, %s2862_s14   ;;  %s2862_s14 = sphi %s2972_s14, %s34_s14   ;;  %s2858_s13 = sphi %s2970_s13, %s3599_s13   ;;  %s2854_s30 = sphi %s2968_s30, %s3598_s30   ;;  %s2850_s29 = sphi %s2966_s29, %s3597_s29   ;;  %s2846_s11 = sphi %s2964_s11, %s3596_s11   ;;  %s2842_s28 = sphi %s2962_s28, %s3595_s28   ;;  %s2838_s27 = sphi %s2960_s27, %s3594_s27   ;;  %s2834_s26 = sphi %s2958_s26, %s3593_s26   ;;  %s2830_s25 = sphi %s2956_s25, %s3592_s25   ;;  %s2826_s24 = sphi %s2954_s24, %s3591_s24   ;;  %s2822_s23 = sphi %s2952_s23, %s3588_s23  }
  0x1a   : > { %3540 = sst [smem:[#allocation25_spill]] %s2826_s24  ;;  %s2040_s16 = sadd.s32 4294967294, %s2862_s14  }
  0x1b   : > { %3541 = sst [smem:[#allocation26_spill]] %s2846_s11  ;;  %p75_p0 = scmp.ne.s32.totalorder %s2838_s27, %s2834_s26 }
  0x1c   : > { %3542 = sst [smem:[#allocation27_spill]] %s2850_s29  ;;  %p3517_p1 = scmp.eq.s32.totalorder %s3006_s15, 0 }
  0x1d   : > { %3543 = sst [smem:[#allocation28_spill]] %s3006_s15  ;;  %p340_p2 = scmp.ne.s32.totalorder %s2830_s25, %s2826_s24 }
  0x1e   : > { %p341_p3 = scmp.eq.s32.totalorder %s3006_s15, 3  ;;  %p3016_p4 = por %p3517_p1, %p75_p0 }
  0x1f   : > { %p346_p5 = scmp.ne.s32.totalorder %s2826_s24, %s2822_s23  ;;  %p347_p7 = scmp.eq.s32.totalorder %s2040_s16, 3 }
  0x20   : > { %s3544_s17 = scalar_select %p3016_p4, 1, 0 }
  0x21   : > { %p3022_p6 = por %p341_p3, %p340_p2  ;;  %p2041_p8 = scmp.ge.s32.totalorder %s2862_s14, 1 }
  0x22   : > { %p354_p9 = scmp.lt.s32.totalorder %s2862_s14, 5  ;;  %p3028_p10 = por %p347_p7, %p346_p5 }
  0x23   : > { %s3545_s18 = scalar_select %p3022_p6, 1, 0 }
  0x24   : > { %s3547_s19 = scalar_select %p3028_p10, 1, 0 }
  0x25   : > { %3546 = sst [smem:[#allocation29_spill]] %s3545_s18  ;;  %p3032_p11 = pnand %p2041_p8, %p354_p9 }
  0x26   : > { %3548 = sst [smem:[#allocation30_spill]] %s3547_s19  ;;  %s2864_s21 = smov [#allocation10]  }
  0x27   : > { %s3549_s20 = scalar_select %p3032_p11, 1, 0 }
  0x28   : > { %s366_s22 = sshll.u32 %s2864_s21, 4  ;;  %p2365_p12 = pneg %p3032_p11  ;;  %s367_s22 = int_to_ptr.vmem [resolvable:$true] %s366_s22 }
  0x29   : > { %s2865_s16 = smov [#allocation11]   ;;  %s3551_s2 = sld [smem:[#allocation32_spill]] }
  0x2a   : > { %p3040_p13 = pnand %p2365_p12, %p3517_p1  ;;  %s382_s23 = sshll.u32 %s2865_s16, 4  ;;  %s3044_s23 = int_to_ptr.vmem [resolvable:$true] %s382_s23 }
  0x2c   : > { %p3054_p2 = pneg %p3040_p13 }
  0x2f   : > { %s2524_s18 = scalar_lea.hbm %s3551_s2, 512 }
  0x30   : > { %p2525_p0 = scmp.ne.s32.totalorder %s3551_s2, %s2524_s18  ;;  %p2531_p7 = scmp.lt.u32.totalorder %s2524_s18, %s3551_s2 }
  0x32   : > { %p2527_p3 = pnand %p3054_p2, %p2525_p0 }
  0x34   : > { %p2528_p5 = pneg %p2527_p3 }
  0x36   : > { %p2533_p8 = pnand %p2531_p7, %p2528_p5 }
  0x38   : > { %2536 = shalt.err (!%p2533_p8)
}
  0x39   : > { %s2537_s12 = scalar_lea.vmem %s367_s22, 512  ;;  %p2545_p10 = scmp.lt.s32.totalorder %s367_s22, %s367_s22 }
  0x3a   : > { %p2538_p9 = scmp.ne.s32.totalorder %s367_s22, %s2537_s12  ;;  %p2546_p6 = scmp.lt.s32.totalorder %s2537_s12, %s2537_s12 }
  0x3c   : > { %p2540_p12 = pnand %p2538_p9, %p3054_p2  ;;  %p2547_p4 = por %p2546_p6, %p2545_p10 }
  0x3e   : > { %p2541_p1 = pneg %p2540_p12 }
  0x40   : > { %p2548_p11 = pnand %p2547_p4, %p2541_p1 }
  0x42   : > { %2551 = shalt.err (!%p2548_p11)
}
  0x43   : > { %s3525_s8 = smov 128   ;;  %s3527_s9 = smov 8  }
  0x44   : > { %2368 = dma.hbm_to_vmem [thread:$0]  (!%p3040_p13), %s3551_s2, 512, %s367_s22, [#allocation9], %s3525_s8, %s3525_s8, %s3527_s9  }
  0x45   : > { %s3553_s4 = sld [smem:[#allocation34_spill]] }
  0x4b   : > { %s2552_s5 = scalar_lea.hbm %s3553_s4, 512 }
  0x4c   : > { %p2553_p1 = scmp.ne.s32.totalorder %s3553_s4, %s2552_s5  ;;  %p2559_p10 = scmp.lt.u32.totalorder %s2552_s5, %s3553_s4 }
  0x4e   : > { %p2555_p4 = pnand %p2553_p1, %p3054_p2 }
  0x50   : > { %p2556_p6 = pneg %p2555_p4 }
  0x52   : > { %p2561_p11 = pnand %p2559_p10, %p2556_p6 }
  0x54   : > { %2564 = shalt.err (!%p2561_p11)
}
  0x55   : > { %s2565_s22 = scalar_lea.vmem %s3044_s23, 512  ;;  %p2573_p7 = scmp.lt.s32.totalorder %s3044_s23, %s3044_s23 }
  0x56   : > { %p2566_p0 = scmp.ne.s32.totalorder %s3044_s23, %s2565_s22  ;;  %p2574_p8 = scmp.lt.s32.totalorder %s2565_s22, %s2565_s22 }
  0x58   : > { %p2568_p3 = pnand %p2566_p0, %p3054_p2  ;;  %p2575_p9 = por %p2574_p8, %p2573_p7 }
  0x5a   : > { %p2569_p5 = pneg %p2568_p3 }
  0x5c   : > { %p2576_p12 = pnand %p2575_p9, %p2569_p5 }
  0x5e   : > { %2579 = shalt.err (!%p2576_p12)
}
  0x5f   : > { %2371 = dma.hbm_to_vmem [thread:$0]  (!%p3040_p13), %s3553_s4, 512, %s3044_s23, [#allocation12], %s3525_s8, %s3525_s8, %s3527_s9  }
  0x60   : > { %s2868_s11 = smov [#allocation14]   ;;  %s2869_s3 = smov [#allocation13]  }
  0x61   : > { %s412_s29 = sshll.u32 %s2868_s11, 4  ;;  %s398_s18 = sshll.u32 %s2869_s3, 4  ;;  %s413_s29 = int_to_ptr.vmem [resolvable:$true] %s412_s29  ;;  %s399_s18 = int_to_ptr.vmem [resolvable:$true] %s398_s18 }
  0x62   : > { %s3554_s7 = sld [smem:[#allocation37_spill]] }
  0x68   : > { %s2580_s12 = scalar_lea.hbm %s3554_s7, 16 }
  0x69   : > { %p2581_p1 = scmp.ne.s32.totalorder %s3554_s7, %s2580_s12  ;;  %p2587_p10 = scmp.lt.u32.totalorder %s2580_s12, %s3554_s7 }
  0x6b   : > { %p2583_p4 = pnand %p2581_p1, %p3054_p2 }
  0x6d   : > { %p2584_p6 = pneg %p2583_p4 }
  0x6f   : > { %p2589_p11 = pnand %p2587_p10, %p2584_p6 }
  0x71   : > { %2592 = shalt.err (!%p2589_p11)
}
  0x72   : > { %s2593_s23 = scalar_lea.vmem %s413_s29, 16  ;;  %s2600_s24 = scalar_lea.vmem %s413_s29, 32 }
  0x73   : > { %p2594_p0 = scmp.ne.s32.totalorder %s413_s29, %s2593_s23  ;;  %p2601_p7 = scmp.lt.s32.totalorder %s413_s29, %s413_s29 }
  0x74   : > { %p2602_p8 = scmp.lt.s32.totalorder %s2600_s24, %s2593_s23 }
  0x75   : > { %p2596_p3 = pnand %p2594_p0, %p3054_p2 }
  0x76   : > { %p2603_p9 = por %p2602_p8, %p2601_p7 }
  0x77   : > { %p2597_p5 = pneg %p2596_p3 }
  0x79   : > { %p2604_p12 = pnand %p2603_p9, %p2597_p5 }
  0x7b   : > { %2607 = shalt.err (!%p2604_p12)
}
  0x7c   : > { %2377 = dma.hbm_to_vmem [thread:$0]  (!%p3040_p13), %s3554_s7, 16, %s413_s29, [#allocation15]  }
  0x7d   : > { %s3555_s6 = sld [smem:[#allocation36_spill]] }
  0x83   : > { %s2608_s19 = scalar_lea.hbm %s3555_s6, 512 }
  0x84   : > { %p2609_p1 = scmp.ne.s32.totalorder %s3555_s6, %s2608_s19  ;;  %p2615_p10 = scmp.lt.u32.totalorder %s2608_s19, %s3555_s6 }
  0x86   : > { %p2611_p4 = pnand %p2609_p1, %p3054_p2 }
  0x88   : > { %p2612_p6 = pneg %p2611_p4 }
  0x8a   : > { %p2617_p11 = pnand %p2615_p10, %p2612_p6 }
  0x8c   : > { %2620 = shalt.err (!%p2617_p11)
}
  0x8d   : > { %s2621_s23 = scalar_lea.vmem %s399_s18, 512  ;;  %p2629_p7 = scmp.lt.s32.totalorder %s399_s18, %s399_s18 }
  0x8e   : > { %p2622_p0 = scmp.ne.s32.totalorder %s399_s18, %s2621_s23  ;;  %p2630_p8 = scmp.lt.s32.totalorder %s2621_s23, %s2621_s23 }
  0x90   : > { %p2624_p3 = pnand %p2622_p0, %p3054_p2  ;;  %p2631_p9 = por %p2630_p8, %p2629_p7 }
  0x92   : > { %p2625_p5 = pneg %p2624_p3 }
  0x94   : > { %p2632_p12 = pnand %p2631_p9, %p2625_p5 }
  0x96   : > { %2635 = shalt.err (!%p2632_p12)
}
  0x97   : > { %2374 = dma.hbm_to_vmem [thread:$0]  (!%p3040_p13), %s3555_s6, 512, %s399_s18, [#allocation12], %s3525_s8, %s3525_s8, %s3527_s9  }
  0x98   : > { %s2870_s2 = smov [#allocation16]   ;;  %s2636_s19 = scalar_lea.hbm %s3508_s10, 512 }
  0x99   : > { %s428_s11 = sshll.u32 %s2870_s2, 4  ;;  %p2637_p1 = scmp.ne.s32.totalorder %s3508_s10, %s2636_s19  ;;  %s429_s11 = int_to_ptr.vmem [resolvable:$true] %s428_s11 }
  0x9a   : > { %p2643_p10 = scmp.lt.u32.totalorder %s2636_s19, %s3508_s10 }
  0x9b   : > { %p2639_p4 = pnand %p2637_p1, %p3054_p2 }
  0x9d   : > { %p2640_p6 = pneg %p2639_p4 }
  0x9f   : > { %p2645_p11 = pnand %p2643_p10, %p2640_p6 }
  0xa1   : > { %2648 = shalt.err (!%p2645_p11)
}
  0xa2   : > { %s2649_s18 = scalar_lea.vmem %s429_s11, 512  ;;  %p2657_p7 = scmp.lt.s32.totalorder %s429_s11, %s429_s11 }
  0xa3   : > { %p2650_p0 = scmp.ne.s32.totalorder %s429_s11, %s2649_s18  ;;  %p2658_p8 = scmp.lt.s32.totalorder %s2649_s18, %s2649_s18 }
  0xa5   : > { %p2652_p3 = pnand %p2650_p0, %p3054_p2  ;;  %p2659_p9 = por %p2658_p8, %p2657_p7 }
  0xa7   : > { %p2653_p5 = pneg %p2652_p3 }
  0xa9   : > { %p2660_p12 = pnand %p2659_p9, %p2653_p5 }
  0xab   : > { %2663 = shalt.err (!%p2660_p12)
}
  0xac   : > { %2380 = dma.hbm_to_vmem [thread:$0]  (!%p3040_p13), %s3508_s10, 512, %s429_s11, [#allocation15], %s3525_s8, %s3525_s8, %s3527_s9  }
  0xad   : > { %s46_s26 = sadd.s32 1, %s2854_s30  ;;  %s49_s21 = sadd.s32 1, %s2858_s13 }
  0xae   : > { %p47_p2 = scmp.ge.s32.totalorder %s46_s26, 2  ;;  %s62_s24 = sadd.s32 1, %s2842_s28 }
  0xaf   : > { %p69_p1 = scmp.ne.s32.totalorder %s2842_s28, %s2838_s27  ;;  %p70_p4 = scmp.eq.s32.totalorder %s2862_s14, 0 }
  0xb0   : > { %s3601_s26 = smov (%p47_p2, %s46_s26), 0  ;;  %s3603_s21 = smov (!%p47_p2, %s49_s21), %s2858_s13 }
  0xb1   : > { %s58_s2 = ssub.s32 %s2854_s30, %s3601_s26  ;;  %p3170_p6 = por %p70_p4, %p69_p1 }
  0xb2   : > { %p51_p13 = scmp.ge.s32.totalorder %s3603_s21, 2  ;;  %p60_p10 = scmp.eq.s32.totalorder %s58_s2, 0 }
  0xb3   : > { %s323_s15 = smul.u32 %s2854_s30, %s2858_s13  ;;  %s330_s3 = sadd.s32 1, %s2830_s25 }
  0xb4   : > { %s3605_s21 = smov (%p51_p13, %s3603_s21), 0  ;;  %p2397_p11 = scmp.lt.s32.totalorder %s2862_s14, 4 }
  0xb5   : > { %s3180_s19 = scalar_select %p60_p10, %s2842_s28, %s62_s24  }
  0xb6   : > { %s324_s16 = smul.u32 %s3605_s21, %s3601_s26  ;;  %s445_s12 = sand.u32 1, %s2842_s28  }
  0xb7   : > { %s2049_s22 = sshll.u32 %s2854_s30, 7  ;;  %s3187_s18 = sshll.u32 %s445_s12, 4 }
  0xb8   : > { %s326_s5 = ssub.s32 %s323_s15, %s324_s16  ;;  %s3557_s0 = sld [smem:[#allocation31_spill]] }
  0xb9   : > { %p328_p0 = scmp.eq.s32.totalorder %s326_s5, 0  ;;  %s449_s8 = scalar_lea.vmem [#allocation5], %s3187_s18 }
  0xba   : > { %s458_s9 = sshll.u32 %s449_s8, 4  ;;  %p3202_p3 = pnand %p2397_p11, %p3170_p6  ;;  %s3206_s9 = int_to_ptr.vmem [resolvable:$true] %s458_s9 }
  0xbb   : > { %s3197_s24 = scalar_select %p328_p0, %s2830_s25, %s330_s3  }
  0xbc   : > { %s3208_s16 = scalar_lea.sflag [#allocation6], %s445_s12  ;;  %p2666_p7 = pneg %p3202_p3 }
  0xbe   : > { %s3194_s2 = scalar_lea.hbm %s3557_s0, %s2049_s22  ;;  %s2669_s3 = scalar_lea.hbm %s3557_s0, 512 }
  0xbf   : > { %s2664_s5 = scalar_lea.hbm %s3194_s2, 256  ;;  %p2670_p12 = scmp.lt.u32.totalorder %s3194_s2, %s3557_s0 }
  0xc0   : > { %p2665_p5 = scmp.ne.s32.totalorder %s3194_s2, %s2664_s5  ;;  %p2671_p2 = scmp.lt.u32.totalorder %s2669_s3, %s2664_s5 }
  0xc1   : > { %p2673_p4 = scmp.lt.u32.totalorder %s2664_s5, %s3194_s2 }
  0xc2   : > { %p2667_p8 = pnand %p2666_p7, %p2665_p5  ;;  %p2672_p1 = por %p2671_p2, %p2670_p12 }
  0xc4   : > { %p2668_p9 = pneg %p2667_p8  ;;  %p2674_p6 = por %p2673_p4, %p2672_p1 }
  0xc6   : > { %p2675_p13 = pnand %p2674_p6, %p2668_p9 }
  0xc8   : > { %2678 = shalt.err (!%p2675_p13)
}
  0xc9   : > { %s2679_s12 = scalar_lea.vmem %s3206_s9, 256  ;;  %s2871_s8 = smov [#allocation5]  }
  0xca   : > { %p2680_p10 = scmp.ne.s32.totalorder %s3206_s9, %s2679_s12  ;;  %s2684_s11 = sshll.u32 %s2871_s8, 4  ;;  %s2685_s11 = int_to_ptr.vmem [resolvable:$false] %s2684_s11 }
  0xcb   : > { %s2686_s23 = scalar_lea.vmem %s2685_s11, 512  ;;  %p2687_p5 = scmp.lt.s32.totalorder %s3206_s9, %s2685_s11 }
  0xcc   : > { %p2682_p11 = pnand %p2680_p10, %p2666_p7  ;;  %p2688_p8 = scmp.lt.s32.totalorder %s2686_s23, %s2679_s12 }
  0xce   : > { %p2683_p0 = pneg %p2682_p11  ;;  %p2689_p12 = por %p2688_p8, %p2687_p5 }
  0xd0   : > { %p2690_p2 = pnand %p2689_p12, %p2683_p0 }
  0xd2   : > { %2693 = shalt.err (!%p2690_p2)
}
  0xd3   : > { %s2872_s5 = smov 256   ;;  %s3559_s3 = smov 8  }
  0xd4   : > { %s3560_s29 = smov 128   ;;  %s3244_s11 = scalar_lea.hbm %s3499_s1, %s2049_s22 }
  0xd5   : > { %2384 = dma.hbm_to_vmem [thread:$0]  (!%p3202_p3), %s3194_s2, 256, %s3206_s9, %s3208_s16, %s2872_s5, %s3560_s29, %s3559_s3  }
  0xd6   : > { %s472_s23 = scalar_lea.vmem [#allocation8], %s3187_s18  ;;  %s468_s4 = sand.u32 1, %s2862_s14  }
  0xd7   : > { %s481_s0 = sshll.u32 %s472_s23, 4  ;;  %s3250_s6 = scalar_lea.sflag [#allocation9], %s468_s4  ;;  %s3247_s0 = int_to_ptr.vmem [resolvable:$true] %s481_s0 }
  0xd8   : > { %s2694_s7 = scalar_lea.hbm %s3244_s11, 256  ;;  %s2699_s2 = scalar_lea.hbm %s3499_s1, 512 }
  0xd9   : > { %p2695_p9 = scmp.ne.s32.totalorder %s3244_s11, %s2694_s7  ;;  %p2700_p6 = scmp.lt.u32.totalorder %s3244_s11, %s3499_s1 }
  0xda   : > { %p2701_p13 = scmp.lt.u32.totalorder %s2699_s2, %s2694_s7  ;;  %p2703_p11 = scmp.lt.u32.totalorder %s2694_s7, %s3244_s11 }
  0xdb   : > { %p2697_p1 = pnand %p2695_p9, %p2666_p7 }
  0xdc   : > { %p2702_p10 = por %p2701_p13, %p2700_p6 }
  0xdd   : > { %p2698_p4 = pneg %p2697_p1 }
  0xde   : > { %p2704_p0 = por %p2703_p11, %p2702_p10 }
  0xe0   : > { %p2705_p5 = pnand %p2704_p0, %p2698_p4 }
  0xe2   : > { %2708 = shalt.err (!%p2705_p5)
}
  0xe3   : > { %s2709_s4 = scalar_lea.vmem %s3247_s0, 256  ;;  %s2873_s18 = smov [#allocation8]  }
  0xe4   : > { %p2710_p8 = scmp.ne.s32.totalorder %s3247_s0, %s2709_s4  ;;  %s2714_s12 = sshll.u32 %s2873_s18, 4  ;;  %s2715_s12 = int_to_ptr.vmem [resolvable:$false] %s2714_s12 }
  0xe5   : > { %s2716_s23 = scalar_lea.vmem %s2715_s12, 512  ;;  %p2717_p9 = scmp.lt.s32.totalorder %s3247_s0, %s2715_s12 }
  0xe6   : > { %p2712_p12 = pnand %p2710_p8, %p2666_p7  ;;  %p2718_p1 = scmp.lt.s32.totalorder %s2716_s23, %s2709_s4 }
  0xe8   : > { %p2713_p2 = pneg %p2712_p12  ;;  %p2719_p6 = por %p2718_p1, %p2717_p9 }
  0xea   : > { %p2720_p13 = pnand %p2719_p6, %p2713_p2 }
  0xec   : > { %2723 = shalt.err (!%p2720_p13)
}
  0xed   : > { %2387 = dma.hbm_to_vmem [thread:$0]  (!%p3202_p3), %s3244_s11, 256, %s3247_s0, %s3250_s6, %s2872_s5, %s3560_s29, %s3559_s3  }
  0xee   : > { %p3561_p7 = scmp.ne.s32.totalorder %s3549_s20, 0 }
  0xef   : > { %s495_s7 = sand.u32 (!%p3561_p7), 1, %s2838_s27   ;;  %p3562_p4 = scmp.ne.s32.totalorder (!%p3561_p7), %s3544_s17, 0 }
  0xf0   : > { %493 = sbr.rel (%p3561_p7) target bundleno = 1647 (0x66f), region = 68  ;;  %s2053_s9 = sshll.u32 (!%p3561_p7), %s495_s7, 4 }
  0xf1   : > { %s496_s22 = scalar_lea.sflag (!%p3561_p7), [#allocation6], %s495_s7  ;;  %s3282_s2 = scalar_lea.vmem (!%p3561_p7), [#allocation5], %s2053_s9 }
  0xf7   : > { %2797 = dma.done.wait (%p3562_p4), %s496_s22, 256  }
  0xf8   : > { %2799 = vsyncadd (%p3562_p4), %s496_s22, 4294967040  ;;  %s3563_s15 = sld [smem:[#allocation28_spill]]  ;;  %s3289_s0 = scalar_lea.vmem [#allocation8], %s2053_s9 }
  0xfe   : > { %s504_s16 = sand.u32 1, %s3563_s15  }
  0xff   : > { %s505_s8 = scalar_lea.sflag [#allocation9], %s504_s16 }
 0x100   : > { %2801 = dma.done.wait (%p3562_p4), %s505_s8, 256  }
 0x101   : > { %2803 = vsyncadd (%p3562_p4), %s505_s8, 4294967040  ;;  %p3564_p3 = scmp.eq.s32.totalorder %s3563_s15, 0 }
 0x103   : > { %2805 = dma.done.wait (%p3564_p3), [#allocation9], 512   ;;  %p3565_p10 = pmov %p3564_p3 }
 0x104   : > { %p3566_p11 = pmov %p3564_p3 }
 0x105   : > { %2807 = vsyncadd (%p3565_p10), [#allocation9], 4294966784 }
 0x106   : > { %2809 = dma.done.wait (%p3566_p11), [#allocation12], 1024   ;;  %p3567_p0 = pmov %p3564_p3 }
 0x108   : > { %2811 = vsyncadd (%p3567_p0), [#allocation12], 4294966272  ;;  %p3568_p5 = pmov %p3567_p0 }
 0x109   : > { %p3569_p8 = pmov %p3567_p0 }
 0x10a   : > { %2813 = dma.done.wait (%p3568_p5), [#allocation15], 528  }
 0x10b   : > { %2815 = vsyncadd (%p3569_p8), [#allocation15], 4294966768  ;;  %s3570_s6 = sld [smem:[#allocation25_spill]]  ;;  %s3571_s17 = sld [smem:[#allocation27_spill]] }
 0x10c   : > { %s3572_s20 = sld [smem:[#allocation26_spill]] }
 0x111   : > { %s571_s5 = sand.u32 1, %s3570_s6   ;;  %p578_p12 = scmp.eq.s32.totalorder %s3571_s17, 0 }
 0x112   : > { %s2060_s3 = sshll.u32 %s571_s5, 4  ;;  %p579_p2 = scmp.eq.s32.totalorder %s3572_s20, 0 }
 0x113   : > { %s3312_s29 = scalar_lea.vmem [#allocation17], %s2060_s3 }
 0x114   : > { %p580_p9 = pnand %p579_p2, %p578_p12 }
 0x115   : > { %vm584_vm0 = vcmask (!%p580_p9), 261120   ;;  %vm593_vm1 = vcmask (!%p580_p9), 7168   ;;  %v2874_v0 = vmov (!%p580_p9), 0.0  }
 0x116   : > { %583 = sbr.rel (%p580_p9) target bundleno = 286 (0x11e), region = 100  ;;  %585 = vst.msk [vmem:[#allocation2] sm:$0xff] (!%p580_p9), %vm584_vm0, %v2874_v0  ;;  %586 = vst.msk [vmem:[#allocation2 + $0x8] sm:$0xff] (!%p580_p9), %vm584_vm0, %v2874_v0 }
 0x117   : > { %587 = vst.msk [vmem:[#allocation2 + $0x10] sm:$0xff] (!%p580_p9), %vm584_vm0, %v2874_v0  ;;  %588 = vst.msk [vmem:[#allocation2 + $0x18] sm:$0xff] (!%p580_p9), %vm584_vm0, %v2874_v0 }
 0x118   : > { %589 = vst.msk [vmem:[#allocation2 + $0x20] sm:$0xff] (!%p580_p9), %vm584_vm0, %v2874_v0  ;;  %590 = vst.msk [vmem:[#allocation2 + $0x28] sm:$0xff] (!%p580_p9), %vm584_vm0, %v2874_v0 }
 0x119   : > { %591 = vst.msk [vmem:[#allocation2 + $0x30] sm:$0xff] (!%p580_p9), %vm584_vm0, %v2874_v0  ;;  %592 = vst.msk [vmem:[#allocation2 + $0x38] sm:$0xff] (!%p580_p9), %vm584_vm0, %v2874_v0 }
 0x11a   : > { %594 = vst.msk [vmem:[#allocation3] sm:$0xff] (!%p580_p9), %vm593_vm1, %v2874_v0  ;;  %595 = vst.msk [vmem:[#allocation3 + $0x8] sm:$0xff] (!%p580_p9), %vm593_vm1, %v2874_v0 }
 0x11b   : > { %596 = vst.msk [vmem:[#allocation3 + $0x10] sm:$0xff] (!%p580_p9), %vm593_vm1, %v2874_v0  ;;  %597 = vst.msk [vmem:[#allocation3 + $0x18] sm:$0xff] (!%p580_p9), %vm593_vm1, %v2874_v0 }
 0x11c   : > { %598 = vst.msk [vmem:[#allocation3 + $0x20] sm:$0xff] (!%p580_p9), %vm593_vm1, %v2874_v0  ;;  %599 = vst.msk [vmem:[#allocation3 + $0x28] sm:$0xff] (!%p580_p9), %vm593_vm1, %v2874_v0 }
 0x11d   : > { %600 = vst.msk [vmem:[#allocation3 + $0x30] sm:$0xff] %vm593_vm1, %v2874_v0  ;;  %601 = vst.msk [vmem:[#allocation3 + $0x38] sm:$0xff] %vm593_vm1, %v2874_v0 }
 0x11e PF: > { %s3573_s11 = sld [smem:[#allocation27_spill]] }
 0x124   : > { %p2061_p1 = scmp.ne.s32.totalorder %s3573_s11, 0 }
 0x125   : > { %v609_v1 = vld [vmem:[#allocation11] sm:$0xff] (!%p2061_p1)  ;;  %v610_v2 = vld [vmem:[#allocation11 + $0x8] sm:$0xff] (!%p2061_p1)  ;;  %v611_v3 = vld [vmem:[#allocation11 + $0x10] sm:$0xff] (!%p2061_p1)  ;;  %vm620_vm2 = vcmask (!%p2061_p1), 261120   ;;  %s3574_s12 = sld [smem:[#allocation35_spill]] (!%p2061_p1)  ;;  %v2875_v35 = vmov (!%p2061_p1), 1.0  }
 0x126   : > { %604 = sbr.rel (%p2061_p1) target bundleno = 914 (0x392), region = 104  ;;  %v2283_v4 = vpack.c.bf16 (!%p2061_p1), %v610_v2, %v609_v1  ;;  %v612_v5 = vld [vmem:[#allocation11 + $0x18] sm:$0xff] (!%p2061_p1)  ;;  %v605_v6 = vld [vmem:[%s3282_s2] sm:$0xff] (!%p2061_p1)  ;;  %v703_v9 = vld [vmem:[#allocation13 + $0x8] sm:$0xff] (!%p2061_p1)  ;;  %vm844_vm5 = vcmask (!%p2061_p1), 64512   ;;  %vm1273_vm6 = vcmask (!%p2061_p1), 7168  }
 0x127   : > { %v2287_v7 = vpack.c.bf16 (!%p2061_p1), %v612_v5, %v611_v3  ;;  %2171 = vmatprep.mubr.msk.f32.mxu0 (!%p2061_p1), %vm620_vm2, %v605_v6  ;;  %v702_v8 = vld [vmem:[#allocation13] sm:$0xff] (!%p2061_p1)  ;;  %v704_v10 = vld [vmem:[#allocation13 + $0x10] sm:$0xff] (!%p2061_p1)  ;;  %v705_v12 = vld [vmem:[#allocation13 + $0x18] sm:$0xff] (!%p2061_p1) }
 0x128   : > { %2284 = vmatprep.subr.bf16.mxu0 (!%p2061_p1), %v2283_v4  ;;  %v2291_v11 = vpack.c.bf16 (!%p2061_p1), %v703_v9, %v702_v8  ;;  %v607_v13 = vld [vmem:[%s3289_s0] sm:$0xff] (!%p2061_p1)  ;;  %v2295_v14 = vpack.c.bf16 (!%p2061_p1), %v705_v12, %v704_v10  ;;  %v606_v15 = vld [vmem:[%s3282_s2 + $0x8] sm:$0xff] (!%p2061_p1) }
 0x129   : > { %2286 = vmatpush3.bf16.msra.mxu0 (!%p2061_p1), %v2283_v4  ;;  %2182 = vmatprep.mubr.msk.f32.mxu1 (!%p2061_p1), %vm620_vm2, %v607_v13  ;;  %v608_v16 = vld [vmem:[%s3289_s0 + $0x8] sm:$0xff] (!%p2061_p1)  ;;  %v2065_v20 = vld [vmem:[#allocation14] ss:$0 sm:$0xff] (!%p2061_p1)  ;;  %v806_v51 = vld [vmem:[#allocation2 + $0x10] sm:$0xff] (!%p2061_p1) }
 0x12a   : > { %2288 = vmatprep.subr.bf16.mxu0 (!%p2061_p1), %v2287_v7  ;;  %2292 = vmatprep.subr.bf16.mxu1 (!%p2061_p1), %v2291_v11  ;;  %v805_v44 = vld [vmem:[#allocation2 + $0x8] sm:$0xff] (!%p2061_p1)  ;;  %v804_v45 = vld [vmem:[#allocation2] sm:$0xff] (!%p2061_p1)  ;;  %v807_v50 = vld [vmem:[#allocation2 + $0x18] sm:$0xff] (!%p2061_p1) }
 0x12b   : > { %2294 = vmatpush3.bf16.msra.mxu1 (!%p2061_p1), %v2291_v11  ;;  %v2062_v17 = vld [vmem:[%s3574_s12] ss:$0 sm:$0xff] (!%p2061_p1)  ;;  %v1088_v56 = vld [vmem:[#allocation3 + $0x8] sm:$0xff] (!%p2061_p1)  ;;  %v1090_v63 = vld [vmem:[#allocation3 + $0x18] sm:$0xff] (!%p2061_p1) }
 0x12c   : > { %2296 = vmatprep.subr.bf16.mxu1 (!%p2061_p1), %v2295_v14  ;;  %v1087_v57 = vld [vmem:[#allocation3] sm:$0xff] (!%p2061_p1)  ;;  %v809_v62 = vld [vmem:[#allocation2 + $0x28] sm:$0xff] (!%p2061_p1)  ;;  %v1089_v1 = vld [vmem:[#allocation3 + $0x10] sm:$0xff] (!%p2061_p1) }
 0x12d   : > { %2290 = vmatpush3.bf16.msra.mxu0 %v2287_v7  ;;  %v808_v0 = vld [vmem:[#allocation2 + $0x20] sm:$0xff]  ;;  %v811_v10 = vld [vmem:[#allocation2 + $0x38] sm:$0xff]  ;;  %v810_v11 = vld [vmem:[#allocation2 + $0x30] sm:$0xff] }
 0x12f   : > { %2298 = vmatpush3.bf16.msra.mxu1 %v2295_v14 }
 0x130   : > { %2172 = vmatmul.mubr.msk.f32.vlgmr.msra.gmra.mrb[0].mxu0 %vm620_vm2, %v606_v15 }
 0x132   : > { %2183 = vmatmul.mubr.msk.f32.vlgmr.msra.gmra.mrb[0].mxu1 %vm620_vm2, %v608_v16  ;;  %v1092_v16 = vld [vmem:[#allocation3 + $0x28] sm:$0xff] }
 0x203   : > { %v2173_v18 = vpop.f32.mrb[0].mxu0 }
 0x204   : > { %v693_v19 = vpop.f32.mrb[1].mxu0  ;;  %v699_v27 = vadd.f32 %v2173_v18, %v2062_v17 }
 0x205   : > { %v694_v21 = vadd.f32 %v2062_v17, %v693_v19  ;;  %v2184_v22 = vpop.f32.mrb[0].mxu1  ;;  %v1091_v17 = vld [vmem:[#allocation3 + $0x20] sm:$0xff] }
 0x206   : > { %v791_v23 = vadd.f32 %v2184_v22, %v2065_v20  ;;  %v785_v24 = vpop.f32.mrb[1].mxu1  ;;  %v800_v28 = vmul.f32 1.442695, %v699_v27  ;;  %v797_v33 = vadd.f32 1.0, %v699_v27  ;;  %vm795_vm4 = vcmp.gt.f32.partialorder %v699_v27, 0.0  ;;  %v1094_v22 = vld [vmem:[#allocation3 + $0x38] sm:$0xff] }
 0x207   : > { %v798_v25 = vmul.f32 1.442695, %v694_v21  ;;  %v786_v26 = vadd.f32 %v2065_v20, %v785_v24  ;;  %v796_v29 = vadd.f32 1.0, %v694_v21  ;;  %vm794_vm3 = vcmp.gt.f32.partialorder %v694_v21, 0.0 }
 0x208   : > { %2193 = vmatprep.subr.mxu1 %v791_v23 }
 0x209   : > { %2510 = vpow2.f32 %v798_v25  ;;  %2185 = vmatprep.subr.mxu0 %v786_v26  ;;  %2194 = vmatpush3.msra.mxu1 %v791_v23  ;;  %v1093_v23 = vld [vmem:[#allocation3 + $0x30] sm:$0xff] }
 0x20a   : > { %2186 = vmatpush3.msra.mxu0 %v786_v26  ;;  %2512 = vpow2.f32 %v800_v28  ;;  %2209 = vmatprep.subr.mxu1 %v2875_v35 }
 0x20b   : > { %2201 = vmatprep.subr.mxu0 %v2875_v35 }
 0x213   : > { %v2511_v30 = vpop.eup %2510 }
 0x214   : > { %v802_v31 = vsel %vm794_vm3, %v796_v29, %v2511_v30  ;;  %v2513_v32 = vpop.eup %2512 }
 0x215   : > { %812 = vxpose.xlu0.b32.start.end [1/1] (short) (narrow) %v802_v31, 32  ;;  %v803_v34 = vsel %vm795_vm4, %v797_v33, %v2513_v32 }
 0x222   : > { %942 = vxpose.xlu0.b32.start.end [1/1] (short) (narrow) %v803_v34, 32 }
 0x295   : > { %v828_v36 = vpop.trf.xlu0 }
 0x296   : > { %2187 = vmatprep.mubr.msk.f32.mxu0 %vm844_vm5, %v828_v36 }
 0x299   : > { %v829_v37 = vpop.trf.xlu0 }
 0x29a   : > { %2188 = vmatmul.mubr.msk.f32.vlgmr.msra.gmra.mrb[2].mxu0 %vm844_vm5, %v829_v37 }
 0x29b   : > { %2202 = vmatpush3.msra.mxu0 %v2875_v35 }
 0x29d   : > { %v830_v38 = vpop.trf.xlu0 }
 0x29e   : > { %2190 = vmatprep.mubr.msk.f32.mxu0 %vm844_vm5, %v830_v38 }
 0x2a1   : > { %v831_v39 = vpop.trf.xlu0 }
 0x2a2   : > { %2191 = vmatmul.mubr.msk.f32.gmra.mrb[4].mxu0 %vm844_vm5, %v831_v39 }
 0x2a3   : > { %2203 = vmatprep.mubr.msk.f32.mxu0 %vm844_vm5, %v828_v36 }
 0x2a5   : > { %v958_v40 = vpop.trf.xlu0 }
 0x2a6   : > { %2195 = vmatprep.mubr.msk.f32.mxu1 %vm844_vm5, %v958_v40  ;;  %2204 = vmatmul.mubr.msk.f32.vlgmr.msra.gmra.mrb[6].mxu0 %vm844_vm5, %v829_v37 }
 0x2a7   : > { %2206 = vmatprep.mubr.msk.f32.mxu0 %vm844_vm5, %v830_v38 }
 0x2a9   : > { %v959_v41 = vpop.trf.xlu0 }
 0x2aa   : > { %2196 = vmatmul.mubr.msk.f32.vlgmr.msra.gmra.mrb[2].mxu1 %vm844_vm5, %v959_v41  ;;  %2207 = vmatmul.mubr.msk.f32.gmra.mrb[8].mxu0 %vm844_vm5, %v831_v39 }
 0x2ab   : > { %2210 = vmatpush3.msra.mxu1 %v2875_v35 }
 0x2ad   : > { %v960_v42 = vpop.trf.xlu0 }
 0x2ae   : > { %2198 = vmatprep.mubr.msk.f32.mxu1 %vm844_vm5, %v960_v42 }
 0x2b1   : > { %v961_v43 = vpop.trf.xlu0 }
 0x2b2   : > { %2199 = vmatmul.mubr.msk.f32.gmra.mrb[4].mxu1 %vm844_vm5, %v961_v43 }
 0x2b3   : > { %2211 = vmatprep.mubr.msk.f32.mxu1 %vm844_vm5, %v958_v40 }
 0x2b6   : > { %2212 = vmatmul.mubr.msk.f32.vlgmr.msra.gmra.mrb[6].mxu1 %vm844_vm5, %v959_v41 }
 0x2b7   : > { %2214 = vmatprep.mubr.msk.f32.mxu1 %vm844_vm5, %v960_v42 }
 0x2ba   : > { %2215 = vmatmul.mubr.msk.f32.gmra.mrb[8].mxu1 %vm844_vm5, %v961_v43 }
 0x36d   : > { %v2189_v46 = vpop.f32.mrb[2].mxu0 }
 0x36e   : > { %v1072_v47 = vadd.f32 %v2189_v46, %v805_v44  ;;  %v923_v48 = vpop.f32.mrb[3].mxu0 }
 0x36f   : > { %v1071_v49 = vadd.f32 %v923_v48, %v804_v45 }
 0x370   : > { %1080 = vst.msk [vmem:[#allocation2 + $0x8] sm:$0xff] %vm620_vm2, %v1072_v47 }
 0x371   : > { %1079 = vst.msk [vmem:[#allocation2] sm:$0xff] %vm620_vm2, %v1071_v49 }
 0x375   : > { %v2192_v52 = vpop.f32.mrb[4].mxu0 }
 0x376   : > { %v1074_v53 = vadd.f32 %v2192_v52, %v807_v50  ;;  %v933_v54 = vpop.f32.mrb[5].mxu0 }
 0x377   : > { %v1073_v55 = vadd.f32 %v933_v54, %v806_v51 }
 0x378   : > { %1082 = vst.msk [vmem:[#allocation2 + $0x18] sm:$0xff] %vm620_vm2, %v1074_v53 }
 0x379   : > { %1081 = vst.msk [vmem:[#allocation2 + $0x10] sm:$0xff] %vm620_vm2, %v1073_v55  ;;  %v2205_v58 = vpop.f32.mrb[6].mxu0 }
 0x37a   : > { %v1266_v59 = vadd.f32 %v2205_v58, %v1088_v56  ;;  %v1161_v60 = vpop.f32.mrb[7].mxu0 }
 0x37b   : > { %v1265_v61 = vadd.f32 %v1161_v60, %v1087_v57 }
 0x37c   : > { %1275 = vst.msk [vmem:[#allocation3 + $0x8] sm:$0xff] %vm1273_vm6, %v1266_v59 }
 0x37d   : > { %1274 = vst.msk [vmem:[#allocation3] sm:$0xff] %vm1273_vm6, %v1265_v61  ;;  %v2197_v2 = vpop.f32.mrb[2].mxu1  ;;  %v2208_v3 = vpop.f32.mrb[8].mxu0 }
 0x37e   : > { %v1076_v4 = vadd.f32 %v2197_v2, %v809_v62  ;;  %v1268_v5 = vadd.f32 %v2208_v3, %v1090_v63  ;;  %v1052_v6 = vpop.f32.mrb[3].mxu1  ;;  %v1171_v7 = vpop.f32.mrb[9].mxu0 }
 0x37f   : > { %v1075_v8 = vadd.f32 %v1052_v6, %v808_v0  ;;  %v1267_v9 = vadd.f32 %v1171_v7, %v1089_v1 }
 0x380   : > { %1084 = vst.msk [vmem:[#allocation2 + $0x28] sm:$0xff] %vm620_vm2, %v1076_v4 }
 0x381   : > { %1277 = vst.msk [vmem:[#allocation3 + $0x18] sm:$0xff] %vm1273_vm6, %v1268_v5  ;;  %1276 = vst.msk [vmem:[#allocation3 + $0x10] sm:$0xff] %vm1273_vm6, %v1267_v9 }
 0x382   : > { %1083 = vst.msk [vmem:[#allocation2 + $0x20] sm:$0xff] %vm620_vm2, %v1075_v8 }
 0x385   : > { %v2200_v12 = vpop.f32.mrb[4].mxu1 }
 0x386   : > { %v1078_v13 = vadd.f32 %v2200_v12, %v811_v10  ;;  %v1062_v14 = vpop.f32.mrb[5].mxu1 }
 0x387   : > { %v1077_v15 = vadd.f32 %v1062_v14, %v810_v11 }
 0x388   : > { %1086 = vst.msk [vmem:[#allocation2 + $0x38] sm:$0xff] %vm620_vm2, %v1078_v13 }
 0x389   : > { %1085 = vst.msk [vmem:[#allocation2 + $0x30] sm:$0xff] %vm620_vm2, %v1077_v15  ;;  %v2213_v18 = vpop.f32.mrb[6].mxu1 }
 0x38a   : > { %v1270_v19 = vadd.f32 %v2213_v18, %v1092_v16  ;;  %v1246_v20 = vpop.f32.mrb[7].mxu1 }
 0x38b   : > { %v1269_v21 = vadd.f32 %v1246_v20, %v1091_v17 }
 0x38c   : > { %1279 = vst.msk [vmem:[#allocation3 + $0x28] sm:$0xff] %vm1273_vm6, %v1270_v19 }
 0x38d   : > { %1278 = vst.msk [vmem:[#allocation3 + $0x20] sm:$0xff] %vm1273_vm6, %v1269_v21  ;;  %v2216_v24 = vpop.f32.mrb[8].mxu1 }
 0x38e   : > { %v1272_v25 = vadd.f32 %v2216_v24, %v1094_v22  ;;  %v1256_v26 = vpop.f32.mrb[9].mxu1 }
 0x38f   : > { %v1271_v27 = vadd.f32 %v1256_v26, %v1093_v23 }
 0x390   : > { %1281 = vst.msk [vmem:[#allocation3 + $0x38] sm:$0xff] %vm1273_vm6, %v1272_v25 }
 0x391   : > { %1280 = vst.msk [vmem:[#allocation3 + $0x30] sm:$0xff] %vm1273_vm6, %v1271_v27 }
 0x392 PF: > { %s3575_s23 = sld [smem:[#allocation27_spill]] }
 0x398   : > { %p2084_p6 = scmp.ne.s32.totalorder %s3575_s23, 1 }
 0x399   : > { %v1288_v28 = vld [vmem:[#allocation10] sm:$0xff] (!%p2084_p6)  ;;  %v1289_v29 = vld [vmem:[#allocation10 + $0x8] sm:$0xff] (!%p2084_p6)  ;;  %v1290_v30 = vld [vmem:[#allocation10 + $0x10] sm:$0xff] (!%p2084_p6)  ;;  %vm1299_vm7 = vcmask (!%p2084_p6), 261120   ;;  %v2876_v34 = vmov (!%p2084_p6), 0   ;;  %v2877_v61 = vmov (!%p2084_p6), 0.0|0.0  }
 0x39a   : > { %1285 = sbr.rel (%p2084_p6) target bundleno = 1617 (0x651), region = 108  ;;  %v2299_v31 = vpack.c.bf16 (!%p2084_p6), %v1289_v29, %v1288_v28  ;;  %v1291_v32 = vld [vmem:[#allocation10 + $0x18] sm:$0xff] (!%p2084_p6)  ;;  %v1286_v33 = vld [vmem:[%s3282_s2] sm:$0xff] (!%p2084_p6)  ;;  %2515 = vset.pattern.permute.xlu1 (!%p2084_p6), %v2876_v34  ;;  %2514 = vset.pattern.permute.xlu0 (!%p2084_p6), %v2876_v34  ;;  %v1416_v38 = vld [vmem:[#allocation3 + $0x28] sm:$0xff] (!%p2084_p6)  ;;  %vm2878_vm8 = vmmov (!%p2084_p6), 0   ;;  %v2879_v4 = vmov (!%p2084_p6), 0.0  }
 0x39b   : > { %v2303_v35 = vpack.c.bf16 (!%p2084_p6), %v1291_v32, %v1290_v30  ;;  %2225 = vmatprep.mubr.msk.f32.mxu0 (!%p2084_p6), %vm1299_vm7, %v1286_v33  ;;  %v1415_v36 = vld [vmem:[#allocation3 + $0x20] sm:$0xff] (!%p2084_p6)  ;;  %v1412_v39 = vld [vmem:[#allocation3 + $0x8] sm:$0xff] (!%p2084_p6)  ;;  %v1414_v41 = vld [vmem:[#allocation3 + $0x18] sm:$0xff] (!%p2084_p6)  ;;  %2307 = vmatprep.subr.bf16.mxu1 (!%p2084_p6), %v2877_v61  ;;  %s3576_s22 = sld [smem:[#allocation33_spill]] (!%p2084_p6)  ;;  %s3577_s16 = sld [smem:[#allocation38_spill]] (!%p2084_p6) }
 0x39c   : > { %v1411_v37 = vld [vmem:[#allocation3] sm:$0xff] (!%p2084_p6)  ;;  %2300 = vmatprep.subr.bf16.mxu0 (!%p2084_p6), %v2299_v31  ;;  %1441 = vperm.xlu1 (!%p2084_p6), %2515, %v1415_v36   ;;  %v1287_v40 = vld [vmem:[%s3282_s2 + $0x8] sm:$0xff] (!%p2084_p6)  ;;  %v1413_v42 = vld [vmem:[#allocation3 + $0x10] sm:$0xff] (!%p2084_p6)  ;;  %s1851_s4 = sld [smem:[#allocation4]] (!%p2084_p6) }
 0x39d   : > { %2302 = vmatpush3.bf16.msra.mxu0 (!%p2084_p6), %v2299_v31  ;;  %1421 = vperm.xlu0 (!%p2084_p6), %2514, %v1411_v37   ;;  %v1418_v43 = vld [vmem:[#allocation3 + $0x38] sm:$0xff] (!%p2084_p6)  ;;  %v1417_v44 = vld [vmem:[#allocation3 + $0x30] sm:$0xff] (!%p2084_p6)  ;;  %v3371_v45 = vld [vmem:[#allocation16] sm:$0xff] (!%p2084_p6)  ;;  %s3578_s23 = sld [smem:[#allocation39_spill]] (!%p2084_p6) }
 0x39e   : > { %2304 = vmatprep.subr.bf16.mxu0 (!%p2084_p6), %v2303_v35  ;;  %v1399_v46 = vld [vmem:[#allocation2 + $0x20] sm:$0xff] (!%p2084_p6)  ;;  %v3373_v47 = vld [vmem:[#allocation16 + $0x8] sm:$0xff] (!%p2084_p6)  ;;  %v1402_v54 = vld [vmem:[#allocation2 + $0x38] sm:$0xff] (!%p2084_p6)  ;;  %2236 = vmatprep.mubr.msk.f32.mxu1 (!%p2084_p6), %vm2878_vm8, %v2879_v4 }
 0x39f   : > { %v1400_v48 = vld [vmem:[#allocation2 + $0x28] sm:$0xff] (!%p2084_p6)  ;;  %v1407_v49 = vmul.f32 (!%p2084_p6), %v1399_v46, %v3371_v45  ;;  %v1395_v51 = vld [vmem:[#allocation2] sm:$0xff] (!%p2084_p6)  ;;  %v1393_v55 = vld [vmem:[#allocation16 + $0x10] sm:$0xff] (!%p2084_p6) }
 0x3a0   : > { %1446 = vperm.xlu1 (!%p2084_p6), %2515, %v1416_v38   ;;  %v1408_v50 = vmul.f32 (!%p2084_p6), %v1400_v48, %v3373_v47  ;;  %v1396_v52 = vld [vmem:[#allocation2 + $0x8] sm:$0xff] (!%p2084_p6)  ;;  %v1394_v53 = vld [vmem:[#allocation16 + $0x18] sm:$0xff] (!%p2084_p6)  ;;  %v1403_v57 = vmul.f32 (!%p2084_p6), %v1395_v51, %v3371_v45  ;;  %v1401_v60 = vld [vmem:[#allocation2 + $0x30] sm:$0xff] (!%p2084_p6) }
 0x3a1   : > { %2306 = vmatpush3.bf16.msra.mxu0 %v2303_v35  ;;  %1426 = vperm.xlu0 %2514, %v1412_v39   ;;  %v1404_v58 = vmul.f32 %v1396_v52, %v3373_v47  ;;  %v1410_v59 = vmul.f32 %v1402_v54, %v1394_v53  ;;  %v1397_v62 = vld [vmem:[#allocation2 + $0x10] sm:$0xff]  ;;  %v1398_v63 = vld [vmem:[#allocation2 + $0x18] sm:$0xff]  ;;  %v1409_v0 = vmul.f32 %v1401_v60, %v1393_v55  ;;  %v2085_v21 = vld [vmem:[%s3576_s22] ss:$0 sm:$0xff] }
 0x3a2   : > { %v2314_v56 = vpack.c.bf16 %v1408_v50, %v1407_v49  ;;  %2313 = vmatprep.subr.bf16.mxu0 %v2877_v61  ;;  %v1405_v2 = vmul.f32 %v1397_v62, %v1393_v55  ;;  %v1406_v3 = vmul.f32 %v1398_v63, %v1394_v53  ;;  %v1852_v62 = vstv %s1851_s4 }
 0x3a3   : > { %v2308_v1 = vpack.c.bf16 %v1404_v58, %v1403_v57  ;;  %v2317_v5 = vpack.c.bf16 %v1410_v59, %v1409_v0  ;;  %v2092_v60 = vld [vmem:[%s3578_s23] ss:$0 sm:$0xff] }
 0x3a4   : > { %2226 = vmatmul.mubr.msk.f32.vlgmr.msra.gmra.mrb[0].mxu0 %vm1299_vm7, %v1287_v40  ;;  %1436 = vperm.xlu1 %2515, %v1414_v41   ;;  %v2311_v6 = vpack.c.bf16 %v1406_v3, %v1405_v2  ;;  %v1757_v40 = vld [vmem:[%s3577_s16] sm:$0xff]  ;;  %v1758_v41 = vld [vmem:[%s3577_s16 + $0x8] sm:$0xff] }
 0x3a5   : > { %1431 = vperm.xlu0 %2514, %v1413_v42   ;;  %2315 = vmatpush3.bf16.msra.mxu0 %v2314_v56  ;;  %v1759_v42 = vld [vmem:[%s3577_s16 + $0x10] sm:$0xff] }
 0x3a6   : > { %2316 = vmatprep.subr.bf16.mxu0 %v2877_v61  ;;  %2247 = vmatprep.mubr.msk.f32.mxu0 %vm2878_vm8, %v2879_v4 }
 0x3a7   : > { %2309 = vmatpush3.bf16.msra.mxu1 %v2308_v1  ;;  %v1850_v1 = vld [vmem:[%s3289_s0 + $0x8] sm:$0xff] }
 0x3a8   : > { %1456 = vperm.xlu1 %2515, %v1418_v43   ;;  %2310 = vmatprep.subr.bf16.mxu1 %v2877_v61  ;;  %v2331_v43 = vpack.c.bf16 %v1758_v41, %v1757_v40 }
 0x3a9   : > { %1451 = vperm.xlu0 %2514, %v1417_v44   ;;  %2318 = vmatpush3.bf16.msra.mxu0 %v2317_v5  ;;  %v1760_v44 = vld [vmem:[%s3577_s16 + $0x18] sm:$0xff] }
 0x3aa   : > { %2325 = vmatprep.subr.bf16.mxu0 %v2877_v61 }
 0x3ab   : > { %2312 = vmatpush3.bf16.msra.mxu1 %v2311_v6 }
 0x3ac   : > { %2319 = vmatprep.subr.bf16.mxu1 %v2877_v61 }
 0x41b   : > { %v1442_v7 = vpop.permute.xlu1 %1441 }
 0x41c   : > { %v1422_v8 = vpop.permute.xlu0 %1421  ;;  %v1463_v28 = vmul.f32 %v1442_v7, %v3371_v45 }
 0x41d   : > { %v1459_v30 = vmul.f32 %v1422_v8, %v3371_v45  ;;  %v2335_v45 = vpack.c.bf16 %v1760_v44, %v1759_v42 }
 0x41f   : > { %v1447_v9 = vpop.permute.xlu1 %1446 }
 0x420   : > { %v1427_v10 = vpop.permute.xlu0 %1426  ;;  %v1464_v29 = vmul.f32 %v1447_v9, %v3373_v47 }
 0x421   : > { %v1460_v31 = vmul.f32 %v1427_v10, %v3373_v47 }
 0x422   : > { %v2326_v36 = vpack.c.bf16 %v1464_v29, %v1463_v28 }
 0x423   : > { %v1437_v11 = vpop.permute.xlu1 %1436  ;;  %v2320_v38 = vpack.c.bf16 %v1460_v31, %v1459_v30 }
 0x424   : > { %v1462_v12 = vmul.f32 %v1437_v11, %v1394_v53  ;;  %v1432_v13 = vpop.permute.xlu0 %1431 }
 0x425   : > { %v1461_v14 = vmul.f32 %v1432_v13, %v1393_v55 }
 0x427   : > { %v2323_v15 = vpack.c.bf16 %v1462_v12, %v1461_v14  ;;  %v1457_v16 = vpop.permute.xlu1 %1456 }
 0x428   : > { %v1466_v17 = vmul.f32 %v1457_v16, %v1394_v53  ;;  %v1452_v18 = vpop.permute.xlu0 %1451 }
 0x429   : > { %v1465_v19 = vmul.f32 %v1452_v18, %v1393_v55 }
 0x42b   : > { %v2329_v20 = vpack.c.bf16 %v1466_v17, %v1465_v19 }
 0x477   : > { %v2227_v22 = vpop.f32.mrb[0].mxu0 }
 0x478   : > { %v1378_v23 = vadd.f32 %v2227_v22, %v2085_v21  ;;  %v1372_v24 = vpop.f32.mrb[1].mxu0 }
 0x479   : > { %v1373_v25 = vadd.f32 %v2085_v21, %v1372_v24 }
 0x47a   : > { %v1387_v26 = vmul.f32 1.442695, %v1378_v23  ;;  %v1384_v32 = vadd.f32 1.0, %v1378_v23  ;;  %vm1382_vm9 = vcmp.gt.f32.partialorder %v1378_v23, 0.0 }
 0x47b   : > { %v1385_v27 = vmul.f32 1.442695, %v1373_v25  ;;  %v1383_v34 = vadd.f32 1.0, %v1373_v25  ;;  %vm1381_vm10 = vcmp.gt.f32.partialorder %v1373_v25, 0.0 }
 0x47c   : > { %2516 = vpow2.f32 %v1387_v26 }
 0x47d   : > { %2518 = vpow2.f32 %v1385_v27 }
 0x486   : > { %v2517_v33 = vpop.eup %2516 }
 0x487   : > { %v2519_v35 = vpop.eup %2518  ;;  %v1390_v37 = vsel %vm1382_vm9, %v1384_v32, %v2517_v33 }
 0x488   : > { %2248 = vmatmul.mubr.msk.f32.vlgmr.msra.gmra.mrb[2].mxu0 %vm1299_vm7, %v1390_v37  ;;  %v1389_v39 = vsel %vm1381_vm10, %v1383_v34, %v2519_v35 }
 0x489   : > { %2327 = vmatpush3.bf16.msra.mxu0 %v2326_v36  ;;  %2237 = vmatmul.mubr.msk.f32.vlgmr.msra.gmra.mrb[0].mxu1 %vm1299_vm7, %v1389_v39 }
 0x48a   : > { %2321 = vmatpush3.bf16.msra.mxu1 %v2320_v38  ;;  %2328 = vmatprep.subr.bf16.mxu0 %v2877_v61 }
 0x48b   : > { %2322 = vmatprep.subr.bf16.mxu1 %v2877_v61  ;;  %2269 = vmatprep.mubr.msk.f32.mxu0 %vm2878_vm8, %v2879_v4 }
 0x48c   : > { %2258 = vmatprep.mubr.msk.f32.mxu1 %vm2878_vm8, %v2879_v4  ;;  %v1849_v4 = vld [vmem:[%s3289_s0] sm:$0xff] }
 0x48d   : > { %2330 = vmatpush3.bf16.msra.mxu0 %v2329_v20 }
 0x48e   : > { %2324 = vmatpush3.bf16.msra.mxu1 %v2323_v15 }
 0x48f   : > { %2332 = vmatprep.subr.bf16.mxu1 %v2331_v43 }
 0x490   : > { %2270 = vmatmul.mubr.msk.f32.vlgmr.msra.gmra.mrb[4].mxu0 %vm1299_vm7, %v1390_v37 }
 0x491   : > { %2259 = vmatmul.mubr.msk.f32.vlgmr.msra.gmra.mrb[2].mxu1 %vm1299_vm7, %v1389_v39 }
 0x492   : > { %2334 = vmatpush3.bf16.msra.mxu1 %v2331_v43 }
 0x493   : > { %2336 = vmatprep.subr.bf16.mxu1 %v2335_v45 }
 0x496   : > { %2338 = vmatpush3.bf16.msra.mxu1 %v2335_v45 }
 0x55b   : > { %v1609_v46 = vpop.f32.mrb[2].mxu0 }
 0x55c   : > { %v1536_v47 = vpop.f32.mrb[0].mxu1  ;;  %v2249_v48 = vpop.f32.mrb[3].mxu0 }
 0x55d   : > { %v2238_v49 = vpop.f32.mrb[1].mxu1 }
 0x563   : > { %v1749_v50 = vpop.f32.mrb[4].mxu0 }
 0x564   : > { %v1750_v51 = vadd.f32 1e-06, %v1749_v50  ;;  %v1679_v52 = vpop.f32.mrb[2].mxu1  ;;  %v2271_v53 = vpop.f32.mrb[5].mxu0 }
 0x565   : > { %v1680_v54 = vadd.f32 1e-06, %v1679_v52  ;;  %v2260_v55 = vpop.f32.mrb[3].mxu1 }
 0x566   : > { %2520 = vrcp.f32 %v1750_v51 }
 0x567   : > { %2522 = vrcp.f32 %v1680_v54 }
 0x570   : > { %v2521_v56 = vpop.eup %2520 }
 0x571   : > { %v2523_v57 = vpop.eup %2522  ;;  %v1756_v58 = vmul.f32 %v2521_v56, %v1609_v46 }
 0x572   : > { %v1755_v59 = vmul.f32 %v2523_v57, %v1536_v47 }
 0x574   : > { %2280 = vmatprep.mubr.msk.f32.mxu1 %vm1299_vm7, %v1755_v59 }
 0x575   : > { %2281 = vmatmul.mubr.msk.f32.vlgmr.msra.gmra.mrb[4].mxu1 %vm1299_vm7, %v1756_v58 }
 0x648   : > { %v2282_v61 = vpop.f32.mrb[4].mxu1 }
 0x649   : > { %v1846_v63 = vadd.f32 %v2282_v61, %v2092_v60  ;;  %v1840_v0 = vpop.f32.mrb[5].mxu1 }
 0x64a   : > { %v1841_v2 = vadd.f32 %v2092_v60, %v1840_v0 }
 0x64b   : > { %v1854_v3 = vmul.f32 %v1852_v62, %v1846_v63 }
 0x64c   : > { %v1853_v5 = vmul.f32 %v1852_v62, %v1841_v2 }
 0x64d   : > { %v1856_v6 = vadd.f32 %v1854_v3, %v1850_v1 }
 0x64e   : > { %v1855_v7 = vadd.f32 %v1853_v5, %v1849_v4 }
 0x64f   : > { %1858 = vst.msk [vmem:[%s3312_s29 + $0x8] sm:$0xff] %vm1299_vm7, %v1856_v6 }
 0x650   : > { %1857 = vst.msk [vmem:[%s3312_s29] sm:$0xff] %vm1299_vm7, %v1855_v7 }
 0x651 PF: > { %s3579_s7 = sld [smem:[#allocation27_spill]]  ;;  %s3580_s9 = sld [smem:[#allocation26_spill]] }
 0x652   : > { %s3582_s2 = sld [smem:[#allocation29_spill]]  ;;  %s1876_s8 = sshll.u32 %s3312_s29, 4  ;;  %s3428_s8 = int_to_ptr.vmem [resolvable:$true] %s1876_s8 }
 0x653   : > { %s3583_s20 = sld [smem:[#allocation40_spill]]  ;;  %s3437_s11 = scalar_lea.sflag [#allocation7], %s571_s5 }
 0x654   : > { %s2724_s4 = scalar_lea.vmem %s3428_s8, 256  ;;  %s2880_s29 = smov [#allocation17]  }
 0x655   : > { %p2725_p13 = scmp.ne.s32.totalorder %s3428_s8, %s2724_s4  ;;  %s2728_s18 = sshll.u32 %s2880_s29, 4  ;;  %s2729_s18 = int_to_ptr.vmem [resolvable:$false] %s2728_s18 }
 0x656   : > { %s2730_s12 = scalar_lea.vmem %s2729_s18, 512  ;;  %p2731_p10 = scmp.lt.s32.totalorder %s3428_s8, %s2729_s18 }
 0x657   : > { %s1867_s15 = smul.u32 %s3580_s9, %s3579_s7  ;;  %p2732_p11 = scmp.lt.s32.totalorder %s2730_s12, %s2724_s4 }
 0x658   : > { %p3584_p7 = scmp.ne.s32.totalorder %s3582_s2, 0 }
 0x659   : > { %s2096_s6 = sshll.u32 %s1867_s15, 7  ;;  %p2733_p0 = por %p2732_p11, %p2731_p10 }
 0x65a   : > { %s3433_s3 = scalar_lea.hbm %s3583_s20, %s2096_s6  ;;  %p2726_p4 = pnand %p2725_p13, %p3584_p7 }
 0x65c   : > { %p2727_p3 = pneg %p2726_p4 }
 0x65e   : > { %p2734_p5 = pnand %p2733_p0, %p2727_p3 }
 0x660   : > { %2737 = shalt.err (!%p2734_p5)
}
 0x661   : > { %s2738_s5 = scalar_lea.hbm %s3433_s3, 256  ;;  %s2742_s9 = scalar_lea.hbm %s3583_s20, 512 }
 0x662   : > { %p2739_p8 = scmp.ne.s32.totalorder %s3433_s3, %s2738_s5  ;;  %p2743_p9 = scmp.lt.u32.totalorder %s3433_s3, %s3583_s20 }
 0x663   : > { %p2744_p1 = scmp.lt.u32.totalorder %s2742_s9, %s2738_s5  ;;  %p2746_p13 = scmp.lt.u32.totalorder %s2738_s5, %s3433_s3 }
 0x664   : > { %p2740_p12 = pnand %p2739_p8, %p3584_p7 }
 0x665   : > { %p2745_p6 = por %p2744_p1, %p2743_p9 }
 0x666   : > { %p2741_p2 = pneg %p2740_p12 }
 0x667   : > { %p2747_p4 = por %p2746_p13, %p2745_p6 }
 0x669   : > { %p2748_p3 = pnand %p2747_p4, %p2741_p2 }
 0x66b   : > { %2751 = shalt.err (!%p2748_p3)
}
 0x66c   : > { %s2881_s6 = smov 128   ;;  %s2882_s17 = smov 256  }
 0x66d   : > { %s2883_s0 = smov 8  }
 0x66e   : > { %2363 = dma.vmem_to_hbm [thread:$0]  (%p3584_p7), %s3428_s8, 256, %s3433_s3, %s3437_s11, %s2881_s6, %s2882_s17, %s2883_s0  }
 0x66f PF: > { %s3585_s4 = sld [smem:[#allocation24_spill]]  ;;  %s3586_s29 = sld [smem:[#allocation30_spill]] }
 0x670   : > { %p2403_p10 = scmp.ge.s32.totalorder %s2862_s14, 2 }
 0x675   : > { %s1891_s18 = sand.u32 1, %s3585_s4   ;;  %p3587_p11 = scmp.ne.s32.totalorder %s3586_s29, 0 }
 0x676   : > { %s1892_s12 = scalar_lea.sflag [#allocation7], %s1891_s18 }
 0x677   : > { %p2389_p0 = pnand %p2403_p10, %p3587_p11 }
 0x679   : > { %2817 = dma.done.wait (!%p2389_p0), %s1892_s12, 256  }
 0x67a   : > { %2819 = vsyncadd (!%p2389_p0), %s1892_s12, 4294967040  ;;  %s34_s14 = sadd.s32 1, %s2862_s14   ;;  %s3588_s23 = sld [smem:[#allocation25_spill]] }
 0x67b   : > { %p31_p5 = scmp.ge.s32.totalorder %s34_s14, 6   ;;  %s3589_s5 = smov %s3197_s24 }
 0x67c   : > { %s3590_s2 = smov %s3601_s26  ;;  %s3591_s24 = smov %s2830_s25 }
 0x67d   : > { %s3592_s25 = smov %s3589_s5  ;;  %s3593_s26 = smov %s2838_s27 }
 0x67e   : > { %s3594_s27 = smov %s2842_s28  ;;  %s3595_s28 = smov %s3180_s19 }
 0x67f   : > { %s3596_s11 = smov %s2854_s30  ;;  %s3597_s29 = smov %s2858_s13 }
 0x680   : > { %s3598_s30 = smov %s3590_s2  ;;  %s3599_s13 = smov %s3605_s21 }
 0x681   :  { %33 = sbr.rel (!%p31_p5) target bundleno = 25 (0x19), region = 158 }
 0x688   :  { %1897 = vsyncpa [#allocation6], 1 }
 0x689   :  { %1899 = vsyncpa [#allocation6 + $0x1], 1 }
 0x68a   :  { %1900 = vsyncpa [#allocation9], 1 }
 0x68b   :  { %1902 = vsyncpa [#allocation9 + $0x1], 1 }
 0x68c   :  { %1903 = vsyncpa [#allocation12], 1 }
 0x68d   :  { %1904 = vsyncpa [#allocation15], 1 }
 0x68e   :  { %1905 = vsyncpa [#allocation7], 1 }
 0x68f   :  { %1907 = vsyncpa [#allocation7 + $0x1], 1 }

</bundles_post_ra>
